<compile_context>
chip_gen: v7x
topology: tpu7x:2x2x1
jax: 0.10.0
libtpu: 0.0.40
codegen_flags: <defaults>
</compile_context>

<pallas_src>
import functools

import jax
import jax.numpy as jnp
from jax.experimental import pallas as pl
from jax.experimental.pallas import tpu as pltpu


# ----------------------------------------------------------------------------
# Fused Pallas kernel: num_layers LSTM layers + Linear/ReLU regression head.
# ----------------------------------------------------------------------------
def _fused_lstm_mlp_kernel(*refs, seq_len, batch_padded, hidden,
                           num_layers, num_lin, n_pref):
    # refs layout:
    #   x (T*Bp, D)                               VMEM
    #   per LSTM layer: wih (D,4H), whh (H,4H), bias (1,4H)   VMEM (f32)
    #   MLP biases b_k (1, out_k)                 VMEM (f32)
    #   small MLP weights W_k (in,out), k >= n_pref            VMEM (f32)
    #   large MLP weights W_k (in,out), k <  n_pref            HBM (pl.ANY, bf16)
    #   out (Bp, out_dim)                         VMEM
    #   scratch: n_pref bf16 VMEM buffers + DMA semaphores (n_pref,)
    T, Bp, H = seq_len, batch_padded, hidden

    pos = 0
    x_ref = refs[pos]; pos += 1
    lstm_refs = refs[pos:pos + 3 * num_layers]; pos += 3 * num_layers
    mlp_b_refs = refs[pos:pos + num_lin]; pos += num_lin
    mlp_w_small_refs = refs[pos:pos + (num_lin - n_pref)]; pos += (num_lin - n_pref)
    mlp_w_hbm_refs = refs[pos:pos + n_pref]; pos += n_pref
    out_ref = refs[pos]; pos += 1
    mlp_w_buf_refs = refs[pos:pos + n_pref]; pos += n_pref
    dma_sem = refs[pos] if n_pref else None

    # ---- Start MLP-head weight prefetch immediately: these DMAs overlap the entire
    # ---- recurrence and are only waited on right before each head matmul.
    copies = []
    for k in range(n_pref):
        cp = pltpu.make_async_copy(mlp_w_hbm_refs[k], mlp_w_buf_refs[k], dma_sem.at[k])
        cp.start()
        copies.append(cp)

    # Gate columns were pre-reordered to (i, f, o, g): sigmoid covers the contiguous first
    # 3H lanes and tanh the trailing H lanes -> one masked whole-tile activation.
    lane = jax.lax.broadcasted_iota(jnp.int32, (Bp, 4 * H), 1)
    sig_mask = lane < 3 * H

    # Layer 0: hoisted input projection (+ folded bias) for all T steps in one matmul.
    wih0 = lstm_refs[0][...]          # (D_in, 4H)
    bias0 = lstm_refs[2][...]         # (1, 4H)
    xw = jnp.dot(x_ref[...], wih0, preferred_element_type=jnp.float32) + bias0  # (T*Bp, 4H)
    # Static, sublane-aligned (Bp-row) per-step slices.
    xw_steps = [xw[t * Bp:(t + 1) * Bp, :] for t in range(T)]

    hs = None
    for layer in range(num_layers):
        whh = lstm_refs[3 * layer + 1][...]     # (H, 4H)
        last = layer + 1 == num_layers
        if not last:
            wih_next = lstm_refs[3 * (layer + 1)][...]       # (H, 4H)
            bias_next = lstm_refs[3 * (layer + 1) + 2][...]  # (1, 4H)

        h = jnp.zeros((Bp, H), jnp.float32)
        c = jnp.zeros((Bp, H), jnp.float32)
        hs = []
        next_xw = []
        for t in range(T):  # fully unrolled; static indices, scheduler sees across steps
            gates = xw_steps[t] + jnp.dot(h, whh, preferred_element_type=jnp.float32)
            act = jnp.where(sig_mask, jax.nn.sigmoid(gates), jnp.tanh(gates))
            i_g = act[:, 0 * H:1 * H]
            f_g = act[:, 1 * H:2 * H]
            o_g = act[:, 2 * H:3 * H]
            g_g = act[:, 3 * H:4 * H]
            c = f_g * c + i_g * g_g
            h = o_g * jnp.tanh(c)
            hs.append(h)
            if not last:
                # Next layer's input projection for this step: depends only on h_t, so it is
                # independent MXU work that overlaps the serial h @ whh chain.
                next_xw.append(
                    jnp.dot(h, wih_next, preferred_element_type=jnp.float32) + bias_next)
        xw_steps = next_xw

    # output.contiguous().view(B, -1): lane-dense (Bp, T*H), built in-register once.
    act = jnp.concatenate(hs, axis=1)

    for k in range(num_lin):
        if k < n_pref:
            copies[k].wait()                     # weight k is now resident in VMEM
            W = mlp_w_buf_refs[k][...]           # bf16
            a_in = act.astype(jnp.bfloat16)      # bf16 operands, f32 accumulation
        else:
            W = mlp_w_small_refs[k - n_pref][...]  # f32 (tiny)
            a_in = act
        y = jnp.dot(a_in, W, preferred_element_type=jnp.float32) + mlp_b_refs[k][...]
        act = jnp.maximum(y, 0.0) if k + 1 < num_lin else y
    out_ref[...] = act


# ----------------------------------------------------------------------------
# One-time parameter layout prep (transposes / gate reorder / bias fold / bf16).
# ----------------------------------------------------------------------------
def prepare_params(lstm_params, lin_params):
    H = lstm_params[0][1].shape[1]   # w_hh: (4H, H)

    def reorder(m):  # gate column blocks (i, f, g, o) -> (i, f, o, g)
        return jnp.concatenate(
            [m[:, 0:H], m[:, H:2 * H], m[:, 3 * H:4 * H], m[:, 2 * H:3 * H]], axis=1)

    lstm_args = []
    for (w_ih, w_hh, b_ih, b_hh) in lstm_params:
        lstm_args.append(reorder(jnp.transpose(w_ih)).astype(jnp.float32))            # (D, 4H)
        lstm_args.append(reorder(jnp.transpose(w_hh)).astype(jnp.float32))            # (H, 4H)
        lstm_args.append(reorder((b_ih + b_hh).reshape(1, -1)).astype(jnp.float32))   # (1, 4H)

    Ws = [jnp.transpose(W) for (W, _) in lin_params]                 # (in, out)
    bs = tuple(b.reshape(1, -1).astype(jnp.float32) for (_, b) in lin_params)

    # Prefix of "large, lane-aligned" head weights -> bf16 + manual in-kernel prefetch.
    n_pref = 0
    for W in Ws:
        if W.shape[1] % 128 == 0 and W.size >= 32768:
            n_pref += 1
        else:
            break
    mlp_w_big = tuple(W.astype(jnp.bfloat16) for W in Ws[:n_pref])
    mlp_w_small = tuple(W.astype(jnp.float32) for W in Ws[n_pref:])
    return tuple(lstm_args), bs, mlp_w_small, mlp_w_big


# ----------------------------------------------------------------------------
# Wrapper: batch pad + time-major flatten + single pallas_call.
# ----------------------------------------------------------------------------
def lstm_model_forward(x_btd, prepped):
    """x_btd: (B, T, D_in), batch_first like the PyTorch module."""
    lstm_args, mlp_b, mlp_w_small, mlp_w_big = prepped
    B, T, D = x_btd.shape
    H = lstm_args[1].shape[0]
    num_layers = len(lstm_args) // 3
    num_lin = len(mlp_b)
    n_pref = len(mlp_w_big)
    out_dim = mlp_b[-1].shape[1]
    assert num_layers >= 1 and num_lin >= 1

    # Zero-pad batch to f32 sublane granularity so every per-step tile is (8,*)-aligned.
    Bp = max(8, -(-B // 8) * 8)
    x = x_btd.astype(jnp.float32)
    if Bp != B:
        x = jnp.zeros((Bp, T, D), jnp.float32).at[:B].set(x)
    # Time-major flatten so the layer-0 input projection is a single matmul.
    x_tb = jnp.transpose(x, (1, 0, 2)).reshape(T * Bp, D)

    args = [x_tb, *lstm_args, *mlp_b, *mlp_w_small, *mlp_w_big]
    n_vmem_inputs = 1 + len(lstm_args) + num_lin + len(mlp_w_small)
    in_specs = ([pl.BlockSpec(memory_space=pltpu.VMEM)] * n_vmem_inputs
                + [pl.BlockSpec(memory_space=pl.ANY)] * n_pref)

    scratch_shapes = [pltpu.VMEM(w.shape, w.dtype) for w in mlp_w_big]
    if n_pref:
        scratch_shapes.append(pltpu.SemaphoreType.DMA((n_pref,)))

    kernel = functools.partial(
        _fused_lstm_mlp_kernel, seq_len=T, batch_padded=Bp, hidden=H,
        num_layers=num_layers, num_lin=num_lin, n_pref=n_pref)

    # TODO(synk): at large batch, add a batch grid axis with dimension_semantics=("parallel",)
    # so v7x's two TensorCores both run, and tile the head weights via BlockSpec instead of
    # whole-array VMEM residency.
    out = pl.pallas_call(
        kernel,
        out_shape=jax.ShapeDtypeStruct((Bp, out_dim), jnp.float32),
        in_specs=in_specs,
        out_specs=pl.BlockSpec(memory_space=pltpu.VMEM),
        scratch_shapes=scratch_shapes,
    )(*args)
    return out[:B]


# ----------------------------------------------------------------------------
# Pure-JAX reference (for correctness) and parameter init.
# ----------------------------------------------------------------------------
def _reference_forward(x_btd, lstm_params, lin_params):
    hp = jax.lax.Precision.HIGHEST
    B, T, _ = x_btd.shape
    H = lstm_params[0][1].shape[1]
    seq = jnp.transpose(x_btd, (1, 0, 2))  # (T, B, D)
    for (w_ih, w_hh, b_ih, b_hh) in lstm_params:
        h = jnp.zeros((B, H), jnp.float32)
        c = jnp.zeros((B, H), jnp.float32)
        outs = []
        for t in range(T):
            gates = (jnp.dot(seq[t], w_ih.T, precision=hp)
                     + jnp.dot(h, w_hh.T, precision=hp) + b_ih + b_hh)
            i_g = jax.nn.sigmoid(gates[:, 0 * H:1 * H])
            f_g = jax.nn.sigmoid(gates[:, 1 * H:2 * H])
            g_g = jnp.tanh(gates[:, 2 * H:3 * H])
            o_g = jax.nn.sigmoid(gates[:, 3 * H:4 * H])
            c = f_g * c + i_g * g_g
            h = o_g * jnp.tanh(c)
            outs.append(h)
        seq = jnp.stack(outs, axis=0)  # (T, B, H)
    flat = jnp.transpose(seq, (1, 0, 2)).reshape(B, -1)
    act = flat
    for k, (W, b) in enumerate(lin_params):
        act = jnp.dot(act, W.T, precision=hp) + b
        if k + 1 < len(lin_params):
            act = jnp.maximum(act, 0.0)
    return act


def init_params(key, inp_dim, mid_dim, num_layers, out_dim, seq_len):
    """Deterministic init mimicking PyTorch default uniform(-1/sqrt(fan), 1/sqrt(fan))."""
    lstm_params = []
    for layer in range(num_layers):
        d_in = inp_dim if layer == 0 else mid_dim
        k = 1.0 / jnp.sqrt(mid_dim)
        key, k1, k2, k3, k4 = jax.random.split(key, 5)
        w_ih = jax.random.uniform(k1, (4 * mid_dim, d_in), jnp.float32, -k, k)
        w_hh = jax.random.uniform(k2, (4 * mid_dim, mid_dim), jnp.float32, -k, k)
        b_ih = jax.random.uniform(k3, (4 * mid_dim,), jnp.float32, -k, k)
        b_hh = jax.random.uniform(k4, (4 * mid_dim,), jnp.float32, -k, k)
        lstm_params.append((w_ih, w_hh, b_ih, b_hh))

    dims = [mid_dim * seq_len, 512, 256, 128, 64, out_dim]
    lin_params = []
    for i in range(5):
        fan_in, fan_out = dims[i], dims[i + 1]
        k = 1.0 / jnp.sqrt(fan_in)
        key, k1, k2 = jax.random.split(key, 3)
        W = jax.random.uniform(k1, (fan_out, fan_in), jnp.float32, -k, k)
        b = jax.random.uniform(k2, (fan_out,), jnp.float32, -k, k)
        lin_params.append((W, b))
    return lstm_params, lin_params


if __name__ == "__main__":
    # Small shapes consistent with the module's forward.
    batch_size = 2
    inp_dim = 8
    mid_dim = 32
    num_layers = 2
    out_dim = 4
    seq_len = 8

    key = jax.random.PRNGKey(0)
    key, pkey, xkey = jax.random.split(key, 3)
    lstm_params, lin_params = init_params(
        pkey, inp_dim, mid_dim, num_layers, out_dim, seq_len
    )
    x = jax.random.normal(xkey, (batch_size, seq_len, inp_dim), jnp.float32)

    # One-time layout prep (outside the per-call path).
    prepped = prepare_params(lstm_params, lin_params)
    prepped = jax.tree_util.tree_map(jax.block_until_ready, prepped)

    fwd = jax.jit(lambda xx: lstm_model_forward(xx, prepped))
    y = fwd(x)
    jax.block_until_ready(y)

    assert y.shape == (batch_size, out_dim), y.shape
    assert jnp.all(jnp.isfinite(y))

    y_ref = _reference_forward(x, lstm_params, lin_params)
    max_err = float(jnp.max(jnp.abs(y - y_ref)))
    assert max_err < 5e-2, f"mismatch vs reference: {max_err}"

    print("KERNEL_OK")
</pallas_src>

<mosaic_0001>
module attributes {stable_mosaic.version = 11 : i64} {
  func.func @_fused_lstm_mlp_kernel(%arg0: memref<64x8xf32, #tpu.memory_space<vmem>>, %arg1: memref<8x128xf32, #tpu.memory_space<vmem>>, %arg2: memref<32x128xf32, #tpu.memory_space<vmem>>, %arg3: memref<1x128xf32, #tpu.memory_space<vmem>>, %arg4: memref<32x128xf32, #tpu.memory_space<vmem>>, %arg5: memref<32x128xf32, #tpu.memory_space<vmem>>, %arg6: memref<1x128xf32, #tpu.memory_space<vmem>>, %arg7: memref<1x512xf32, #tpu.memory_space<vmem>>, %arg8: memref<1x256xf32, #tpu.memory_space<vmem>>, %arg9: memref<1x128xf32, #tpu.memory_space<vmem>>, %arg10: memref<1x64xf32, #tpu.memory_space<vmem>>, %arg11: memref<1x4xf32, #tpu.memory_space<vmem>>, %arg12: memref<128x64xf32, #tpu.memory_space<vmem>>, %arg13: memref<64x4xf32, #tpu.memory_space<vmem>>, %arg14: memref<256x512xbf16, #tpu.memory_space<any>>, %arg15: memref<512x256xbf16, #tpu.memory_space<any>>, %arg16: memref<256x128xbf16, #tpu.memory_space<any>>, %arg17: memref<8x4xf32, #tpu.memory_space<vmem>>, %arg18: memref<256x512xbf16, #tpu.memory_space<vmem>>, %arg19: memref<512x256xbf16, #tpu.memory_space<vmem>>, %arg20: memref<256x128xbf16, #tpu.memory_space<vmem>>, %arg21: memref<3x!tpu.dma_semaphore, #tpu.memory_space<semaphore_mem>>) attributes {dimension_semantics = [], scalar_prefetch = 0 : i64, scratch_operands = 4 : i64, tpu.core_type = #tpu.core_type<tc>} {
    %c0_i32 = arith.constant 0 : i32
    %0 = tpu.memref_slice %arg21[%c0_i32] : memref<3x!tpu.dma_semaphore, #tpu.memory_space<semaphore_mem>> -> memref<1x!tpu.dma_semaphore, #tpu.memory_space<semaphore_mem>>
    %1 = tpu.memref_squeeze %0 : memref<1x!tpu.dma_semaphore, #tpu.memory_space<semaphore_mem>> -> memref<!tpu.dma_semaphore, #tpu.memory_space<semaphore_mem>>
    tpu.enqueue_dma source(%arg14 : memref<256x512xbf16, #tpu.memory_space<any>>) target(%arg18 : memref<256x512xbf16, #tpu.memory_space<vmem>>) target_semaphore(%1 : memref<!tpu.dma_semaphore, #tpu.memory_space<semaphore_mem>>)
    %c1_i32 = arith.constant 1 : i32
    %2 = tpu.memref_slice %arg21[%c1_i32] : memref<3x!tpu.dma_semaphore, #tpu.memory_space<semaphore_mem>> -> memref<1x!tpu.dma_semaphore, #tpu.memory_space<semaphore_mem>>
    %3 = tpu.memref_squeeze %2 : memref<1x!tpu.dma_semaphore, #tpu.memory_space<semaphore_mem>> -> memref<!tpu.dma_semaphore, #tpu.memory_space<semaphore_mem>>
    tpu.enqueue_dma source(%arg15 : memref<512x256xbf16, #tpu.memory_space<any>>) target(%arg19 : memref<512x256xbf16, #tpu.memory_space<vmem>>) target_semaphore(%3 : memref<!tpu.dma_semaphore, #tpu.memory_space<semaphore_mem>>)
    %c2_i32 = arith.constant 2 : i32
    %4 = tpu.memref_slice %arg21[%c2_i32] : memref<3x!tpu.dma_semaphore, #tpu.memory_space<semaphore_mem>> -> memref<1x!tpu.dma_semaphore, #tpu.memory_space<semaphore_mem>>
    %5 = tpu.memref_squeeze %4 : memref<1x!tpu.dma_semaphore, #tpu.memory_space<semaphore_mem>> -> memref<!tpu.dma_semaphore, #tpu.memory_space<semaphore_mem>>
    tpu.enqueue_dma source(%arg16 : memref<256x128xbf16, #tpu.memory_space<any>>) target(%arg20 : memref<256x128xbf16, #tpu.memory_space<vmem>>) target_semaphore(%5 : memref<!tpu.dma_semaphore, #tpu.memory_space<semaphore_mem>>)
    %6 = tpu.iota {dimensions = array<i32: 1>} : vector<8x128xi32>
    %c96_i32 = arith.constant 96 : i32
    %7 = vector.broadcast %c96_i32 : i32 to vector<8x128xi32>
    %8 = arith.cmpi slt, %6, %7 : vector<8x128xi32>
    %c0 = arith.constant 0 : index
    %c0_0 = arith.constant 0 : index
    %9 = vector.load %arg1[%c0, %c0_0] : memref<8x128xf32, #tpu.memory_space<vmem>>, vector<8x128xf32>
    %c0_1 = arith.constant 0 : index
    %c0_2 = arith.constant 0 : index
    %10 = vector.load %arg3[%c0_1, %c0_2] : memref<1x128xf32, #tpu.memory_space<vmem>>, vector<1x128xf32>
    %c0_3 = arith.constant 0 : index
    %c0_4 = arith.constant 0 : index
    %11 = vector.load %arg0[%c0_3, %c0_4] : memref<64x8xf32, #tpu.memory_space<vmem>>, vector<64x8xf32>
    %cst = arith.constant dense<0.000000e+00> : vector<64x128xf32>
    %12 = tpu.matmul %11, %9, %cst {dimension_numbers = #tpu.dot_dimension_numbers<[1], [0], [0], [1], [0, 0, 1, 1], [], []>} : vector<64x8xf32>, vector<8x128xf32>, vector<64x128xf32> -> vector<64x128xf32>
    %13 = vector.broadcast %10 : vector<1x128xf32> to vector<64x128xf32>
    %14 = arith.addf %12, %13 : vector<64x128xf32>
    %15 = vector.extract_strided_slice %14 {offsets = [0, 0], sizes = [8, 128], strides = [1, 1]} : vector<64x128xf32> to vector<8x128xf32>
    %16 = vector.extract_strided_slice %14 {offsets = [8, 0], sizes = [8, 128], strides = [1, 1]} : vector<64x128xf32> to vector<8x128xf32>
    %17 = vector.extract_strided_slice %14 {offsets = [16, 0], sizes = [8, 128], strides = [1, 1]} : vector<64x128xf32> to vector<8x128xf32>
    %18 = vector.extract_strided_slice %14 {offsets = [24, 0], sizes = [8, 128], strides = [1, 1]} : vector<64x128xf32> to vector<8x128xf32>
    %19 = vector.extract_strided_slice %14 {offsets = [32, 0], sizes = [8, 128], strides = [1, 1]} : vector<64x128xf32> to vector<8x128xf32>
    %20 = vector.extract_strided_slice %14 {offsets = [40, 0], sizes = [8, 128], strides = [1, 1]} : vector<64x128xf32> to vector<8x128xf32>
    %21 = vector.extract_strided_slice %14 {offsets = [48, 0], sizes = [8, 128], strides = [1, 1]} : vector<64x128xf32> to vector<8x128xf32>
    %22 = vector.extract_strided_slice %14 {offsets = [56, 0], sizes = [8, 128], strides = [1, 1]} : vector<64x128xf32> to vector<8x128xf32>
    %c0_5 = arith.constant 0 : index
    %c0_6 = arith.constant 0 : index
    %23 = vector.load %arg2[%c0_5, %c0_6] : memref<32x128xf32, #tpu.memory_space<vmem>>, vector<32x128xf32>
    %c0_7 = arith.constant 0 : index
    %c0_8 = arith.constant 0 : index
    %24 = vector.load %arg4[%c0_7, %c0_8] : memref<32x128xf32, #tpu.memory_space<vmem>>, vector<32x128xf32>
    %c0_9 = arith.constant 0 : index
    %c0_10 = arith.constant 0 : index
    %25 = vector.load %arg6[%c0_9, %c0_10] : memref<1x128xf32, #tpu.memory_space<vmem>>, vector<1x128xf32>
    %cst_11 = arith.constant 0.000000e+00 : f32
    %26 = vector.broadcast %cst_11 : f32 to vector<8x32xf32>
    %cst_12 = arith.constant 0.000000e+00 : f32
    %27 = vector.broadcast %cst_12 : f32 to vector<8x32xf32>
    %cst_13 = arith.constant dense<0.000000e+00> : vector<8x128xf32>
    %28 = tpu.matmul %26, %23, %cst_13 {dimension_numbers = #tpu.dot_dimension_numbers<[1], [0], [0], [1], [0, 0, 1, 1], [], []>} : vector<8x32xf32>, vector<32x128xf32>, vector<8x128xf32> -> vector<8x128xf32>
    %29 = arith.addf %15, %28 : vector<8x128xf32>
    %30 = arith.negf %29 : vector<8x128xf32>
    %31 = math.exp %30 : vector<8x128xf32>
    %cst_14 = arith.constant 1.000000e+00 : f32
    %32 = vector.broadcast %cst_14 : f32 to vector<8x128xf32>
    %33 = arith.addf %32, %31 : vector<8x128xf32>
    %34 = arith.divf %32, %33 : vector<8x128xf32>
    %35 = math.tanh %29 : vector<8x128xf32>
    %36 = arith.select %8, %34, %35 : vector<8x128xi1>, vector<8x128xf32>
    %37 = vector.extract_strided_slice %36 {offsets = [0, 0], sizes = [8, 32], strides = [1, 1]} : vector<8x128xf32> to vector<8x32xf32>
    %38 = vector.extract_strided_slice %36 {offsets = [0, 32], sizes = [8, 32], strides = [1, 1]} : vector<8x128xf32> to vector<8x32xf32>
    %39 = vector.extract_strided_slice %36 {offsets = [0, 64], sizes = [8, 32], strides = [1, 1]} : vector<8x128xf32> to vector<8x32xf32>
    %40 = vector.extract_strided_slice %36 {offsets = [0, 96], sizes = [8, 32], strides = [1, 1]} : vector<8x128xf32> to vector<8x32xf32>
    %41 = arith.mulf %38, %27 : vector<8x32xf32>
    %42 = arith.mulf %37, %40 : vector<8x32xf32>
    %43 = arith.addf %41, %42 : vector<8x32xf32>
    %44 = math.tanh %43 : vector<8x32xf32>
    %45 = arith.mulf %39, %44 : vector<8x32xf32>
    %cst_15 = arith.constant dense<0.000000e+00> : vector<8x128xf32>
    %46 = tpu.matmul %45, %24, %cst_15 {dimension_numbers = #tpu.dot_dimension_numbers<[1], [0], [0], [1], [0, 0, 1, 1], [], []>} : vector<8x32xf32>, vector<32x128xf32>, vector<8x128xf32> -> vector<8x128xf32>
    %47 = vector.broadcast %25 : vector<1x128xf32> to vector<8x128xf32>
    %48 = arith.addf %46, %47 : vector<8x128xf32>
    %cst_16 = arith.constant dense<0.000000e+00> : vector<8x128xf32>
    %49 = tpu.matmul %45, %23, %cst_16 {dimension_numbers = #tpu.dot_dimension_numbers<[1], [0], [0], [1], [0, 0, 1, 1], [], []>} : vector<8x32xf32>, vector<32x128xf32>, vector<8x128xf32> -> vector<8x128xf32>
    %50 = arith.addf %16, %49 : vector<8x128xf32>
    %51 = arith.negf %50 : vector<8x128xf32>
    %52 = math.exp %51 : vector<8x128xf32>
    %cst_17 = arith.constant 1.000000e+00 : f32
    %53 = vector.broadcast %cst_17 : f32 to vector<8x128xf32>
    %54 = arith.addf %53, %52 : vector<8x128xf32>
    %55 = arith.divf %53, %54 : vector<8x128xf32>
    %56 = math.tanh %50 : vector<8x128xf32>
    %57 = arith.select %8, %55, %56 : vector<8x128xi1>, vector<8x128xf32>
    %58 = vector.extract_strided_slice %57 {offsets = [0, 0], sizes = [8, 32], strides = [1, 1]} : vector<8x128xf32> to vector<8x32xf32>
    %59 = vector.extract_strided_slice %57 {offsets = [0, 32], sizes = [8, 32], strides = [1, 1]} : vector<8x128xf32> to vector<8x32xf32>
    %60 = vector.extract_strided_slice %57 {offsets = [0, 64], sizes = [8, 32], strides = [1, 1]} : vector<8x128xf32> to vector<8x32xf32>
    %61 = vector.extract_strided_slice %57 {offsets = [0, 96], sizes = [8, 32], strides = [1, 1]} : vector<8x128xf32> to vector<8x32xf32>
    %62 = arith.mulf %59, %43 : vector<8x32xf32>
    %63 = arith.mulf %58, %61 : vector<8x32xf32>
    %64 = arith.addf %62, %63 : vector<8x32xf32>
    %65 = math.tanh %64 : vector<8x32xf32>
    %66 = arith.mulf %60, %65 : vector<8x32xf32>
    %cst_18 = arith.constant dense<0.000000e+00> : vector<8x128xf32>
    %67 = tpu.matmul %66, %24, %cst_18 {dimension_numbers = #tpu.dot_dimension_numbers<[1], [0], [0], [1], [0, 0, 1, 1], [], []>} : vector<8x32xf32>, vector<32x128xf32>, vector<8x128xf32> -> vector<8x128xf32>
    %68 = vector.broadcast %25 : vector<1x128xf32> to vector<8x128xf32>
    %69 = arith.addf %67, %68 : vector<8x128xf32>
    %cst_19 = arith.constant dense<0.000000e+00> : vector<8x128xf32>
    %70 = tpu.matmul %66, %23, %cst_19 {dimension_numbers = #tpu.dot_dimension_numbers<[1], [0], [0], [1], [0, 0, 1, 1], [], []>} : vector<8x32xf32>, vector<32x128xf32>, vector<8x128xf32> -> vector<8x128xf32>
    %71 = arith.addf %17, %70 : vector<8x128xf32>
    %72 = arith.negf %71 : vector<8x128xf32>
    %73 = math.exp %72 : vector<8x128xf32>
    %cst_20 = arith.constant 1.000000e+00 : f32
    %74 = vector.broadcast %cst_20 : f32 to vector<8x128xf32>
    %75 = arith.addf %74, %73 : vector<8x128xf32>
    %76 = arith.divf %74, %75 : vector<8x128xf32>
    %77 = math.tanh %71 : vector<8x128xf32>
    %78 = arith.select %8, %76, %77 : vector<8x128xi1>, vector<8x128xf32>
    %79 = vector.extract_strided_slice %78 {offsets = [0, 0], sizes = [8, 32], strides = [1, 1]} : vector<8x128xf32> to vector<8x32xf32>
    %80 = vector.extract_strided_slice %78 {offsets = [0, 32], sizes = [8, 32], strides = [1, 1]} : vector<8x128xf32> to vector<8x32xf32>
    %81 = vector.extract_strided_slice %78 {offsets = [0, 64], sizes = [8, 32], strides = [1, 1]} : vector<8x128xf32> to vector<8x32xf32>
    %82 = vector.extract_strided_slice %78 {offsets = [0, 96], sizes = [8, 32], strides = [1, 1]} : vector<8x128xf32> to vector<8x32xf32>
    %83 = arith.mulf %80, %64 : vector<8x32xf32>
    %84 = arith.mulf %79, %82 : vector<8x32xf32>
    %85 = arith.addf %83, %84 : vector<8x32xf32>
    %86 = math.tanh %85 : vector<8x32xf32>
    %87 = arith.mulf %81, %86 : vector<8x32xf32>
    %cst_21 = arith.constant dense<0.000000e+00> : vector<8x128xf32>
    %88 = tpu.matmul %87, %24, %cst_21 {dimension_numbers = #tpu.dot_dimension_numbers<[1], [0], [0], [1], [0, 0, 1, 1], [], []>} : vector<8x32xf32>, vector<32x128xf32>, vector<8x128xf32> -> vector<8x128xf32>
    %89 = vector.broadcast %25 : vector<1x128xf32> to vector<8x128xf32>
    %90 = arith.addf %88, %89 : vector<8x128xf32>
    %cst_22 = arith.constant dense<0.000000e+00> : vector<8x128xf32>
    %91 = tpu.matmul %87, %23, %cst_22 {dimension_numbers = #tpu.dot_dimension_numbers<[1], [0], [0], [1], [0, 0, 1, 1], [], []>} : vector<8x32xf32>, vector<32x128xf32>, vector<8x128xf32> -> vector<8x128xf32>
    %92 = arith.addf %18, %91 : vector<8x128xf32>
    %93 = arith.negf %92 : vector<8x128xf32>
    %94 = math.exp %93 : vector<8x128xf32>
    %cst_23 = arith.constant 1.000000e+00 : f32
    %95 = vector.broadcast %cst_23 : f32 to vector<8x128xf32>
    %96 = arith.addf %95, %94 : vector<8x128xf32>
    %97 = arith.divf %95, %96 : vector<8x128xf32>
    %98 = math.tanh %92 : vector<8x128xf32>
    %99 = arith.select %8, %97, %98 : vector<8x128xi1>, vector<8x128xf32>
    %100 = vector.extract_strided_slice %99 {offsets = [0, 0], sizes = [8, 32], strides = [1, 1]} : vector<8x128xf32> to vector<8x32xf32>
    %101 = vector.extract_strided_slice %99 {offsets = [0, 32], sizes = [8, 32], strides = [1, 1]} : vector<8x128xf32> to vector<8x32xf32>
    %102 = vector.extract_strided_slice %99 {offsets = [0, 64], sizes = [8, 32], strides = [1, 1]} : vector<8x128xf32> to vector<8x32xf32>
    %103 = vector.extract_strided_slice %99 {offsets = [0, 96], sizes = [8, 32], strides = [1, 1]} : vector<8x128xf32> to vector<8x32xf32>
    %104 = arith.mulf %101, %85 : vector<8x32xf32>
    %105 = arith.mulf %100, %103 : vector<8x32xf32>
    %106 = arith.addf %104, %105 : vector<8x32xf32>
    %107 = math.tanh %106 : vector<8x32xf32>
    %108 = arith.mulf %102, %107 : vector<8x32xf32>
    %cst_24 = arith.constant dense<0.000000e+00> : vector<8x128xf32>
    %109 = tpu.matmul %108, %24, %cst_24 {dimension_numbers = #tpu.dot_dimension_numbers<[1], [0], [0], [1], [0, 0, 1, 1], [], []>} : vector<8x32xf32>, vector<32x128xf32>, vector<8x128xf32> -> vector<8x128xf32>
    %110 = vector.broadcast %25 : vector<1x128xf32> to vector<8x128xf32>
    %111 = arith.addf %109, %110 : vector<8x128xf32>
    %cst_25 = arith.constant dense<0.000000e+00> : vector<8x128xf32>
    %112 = tpu.matmul %108, %23, %cst_25 {dimension_numbers = #tpu.dot_dimension_numbers<[1], [0], [0], [1], [0, 0, 1, 1], [], []>} : vector<8x32xf32>, vector<32x128xf32>, vector<8x128xf32> -> vector<8x128xf32>
    %113 = arith.addf %19, %112 : vector<8x128xf32>
    %114 = arith.negf %113 : vector<8x128xf32>
    %115 = math.exp %114 : vector<8x128xf32>
    %cst_26 = arith.constant 1.000000e+00 : f32
    %116 = vector.broadcast %cst_26 : f32 to vector<8x128xf32>
    %117 = arith.addf %116, %115 : vector<8x128xf32>
    %118 = arith.divf %116, %117 : vector<8x128xf32>
    %119 = math.tanh %113 : vector<8x128xf32>
    %120 = arith.select %8, %118, %119 : vector<8x128xi1>, vector<8x128xf32>
    %121 = vector.extract_strided_slice %120 {offsets = [0, 0], sizes = [8, 32], strides = [1, 1]} : vector<8x128xf32> to vector<8x32xf32>
    %122 = vector.extract_strided_slice %120 {offsets = [0, 32], sizes = [8, 32], strides = [1, 1]} : vector<8x128xf32> to vector<8x32xf32>
    %123 = vector.extract_strided_slice %120 {offsets = [0, 64], sizes = [8, 32], strides = [1, 1]} : vector<8x128xf32> to vector<8x32xf32>
    %124 = vector.extract_strided_slice %120 {offsets = [0, 96], sizes = [8, 32], strides = [1, 1]} : vector<8x128xf32> to vector<8x32xf32>
    %125 = arith.mulf %122, %106 : vector<8x32xf32>
    %126 = arith.mulf %121, %124 : vector<8x32xf32>
    %127 = arith.addf %125, %126 : vector<8x32xf32>
    %128 = math.tanh %127 : vector<8x32xf32>
    %129 = arith.mulf %123, %128 : vector<8x32xf32>
    %cst_27 = arith.constant dense<0.000000e+00> : vector<8x128xf32>
    %130 = tpu.matmul %129, %24, %cst_27 {dimension_numbers = #tpu.dot_dimension_numbers<[1], [0], [0], [1], [0, 0, 1, 1], [], []>} : vector<8x32xf32>, vector<32x128xf32>, vector<8x128xf32> -> vector<8x128xf32>
    %131 = vector.broadcast %25 : vector<1x128xf32> to vector<8x128xf32>
    %132 = arith.addf %130, %131 : vector<8x128xf32>
    %cst_28 = arith.constant dense<0.000000e+00> : vector<8x128xf32>
    %133 = tpu.matmul %129, %23, %cst_28 {dimension_numbers = #tpu.dot_dimension_numbers<[1], [0], [0], [1], [0, 0, 1, 1], [], []>} : vector<8x32xf32>, vector<32x128xf32>, vector<8x128xf32> -> vector<8x128xf32>
    %134 = arith.addf %20, %133 : vector<8x128xf32>
    %135 = arith.negf %134 : vector<8x128xf32>
    %136 = math.exp %135 : vector<8x128xf32>
    %cst_29 = arith.constant 1.000000e+00 : f32
    %137 = vector.broadcast %cst_29 : f32 to vector<8x128xf32>
    %138 = arith.addf %137, %136 : vector<8x128xf32>
    %139 = arith.divf %137, %138 : vector<8x128xf32>
    %140 = math.tanh %134 : vector<8x128xf32>
    %141 = arith.select %8, %139, %140 : vector<8x128xi1>, vector<8x128xf32>
    %142 = vector.extract_strided_slice %141 {offsets = [0, 0], sizes = [8, 32], strides = [1, 1]} : vector<8x128xf32> to vector<8x32xf32>
    %143 = vector.extract_strided_slice %141 {offsets = [0, 32], sizes = [8, 32], strides = [1, 1]} : vector<8x128xf32> to vector<8x32xf32>
    %144 = vector.extract_strided_slice %141 {offsets = [0, 64], sizes = [8, 32], strides = [1, 1]} : vector<8x128xf32> to vector<8x32xf32>
    %145 = vector.extract_strided_slice %141 {offsets = [0, 96], sizes = [8, 32], strides = [1, 1]} : vector<8x128xf32> to vector<8x32xf32>
    %146 = arith.mulf %143, %127 : vector<8x32xf32>
    %147 = arith.mulf %142, %145 : vector<8x32xf32>
    %148 = arith.addf %146, %147 : vector<8x32xf32>
    %149 = math.tanh %148 : vector<8x32xf32>
    %150 = arith.mulf %144, %149 : vector<8x32xf32>
    %cst_30 = arith.constant dense<0.000000e+00> : vector<8x128xf32>
    %151 = tpu.matmul %150, %24, %cst_30 {dimension_numbers = #tpu.dot_dimension_numbers<[1], [0], [0], [1], [0, 0, 1, 1], [], []>} : vector<8x32xf32>, vector<32x128xf32>, vector<8x128xf32> -> vector<8x128xf32>
    %152 = vector.broadcast %25 : vector<1x128xf32> to vector<8x128xf32>
    %153 = arith.addf %151, %152 : vector<8x128xf32>
    %cst_31 = arith.constant dense<0.000000e+00> : vector<8x128xf32>
    %154 = tpu.matmul %150, %23, %cst_31 {dimension_numbers = #tpu.dot_dimension_numbers<[1], [0], [0], [1], [0, 0, 1, 1], [], []>} : vector<8x32xf32>, vector<32x128xf32>, vector<8x128xf32> -> vector<8x128xf32>
    %155 = arith.addf %21, %154 : vector<8x128xf32>
    %156 = arith.negf %155 : vector<8x128xf32>
    %157 = math.exp %156 : vector<8x128xf32>
    %cst_32 = arith.constant 1.000000e+00 : f32
    %158 = vector.broadcast %cst_32 : f32 to vector<8x128xf32>
    %159 = arith.addf %158, %157 : vector<8x128xf32>
    %160 = arith.divf %158, %159 : vector<8x128xf32>
    %161 = math.tanh %155 : vector<8x128xf32>
    %162 = arith.select %8, %160, %161 : vector<8x128xi1>, vector<8x128xf32>
    %163 = vector.extract_strided_slice %162 {offsets = [0, 0], sizes = [8, 32], strides = [1, 1]} : vector<8x128xf32> to vector<8x32xf32>
    %164 = vector.extract_strided_slice %162 {offsets = [0, 32], sizes = [8, 32], strides = [1, 1]} : vector<8x128xf32> to vector<8x32xf32>
    %165 = vector.extract_strided_slice %162 {offsets = [0, 64], sizes = [8, 32], strides = [1, 1]} : vector<8x128xf32> to vector<8x32xf32>
    %166 = vector.extract_strided_slice %162 {offsets = [0, 96], sizes = [8, 32], strides = [1, 1]} : vector<8x128xf32> to vector<8x32xf32>
    %167 = arith.mulf %164, %148 : vector<8x32xf32>
    %168 = arith.mulf %163, %166 : vector<8x32xf32>
    %169 = arith.addf %167, %168 : vector<8x32xf32>
    %170 = math.tanh %169 : vector<8x32xf32>
    %171 = arith.mulf %165, %170 : vector<8x32xf32>
    %cst_33 = arith.constant dense<0.000000e+00> : vector<8x128xf32>
    %172 = tpu.matmul %171, %24, %cst_33 {dimension_numbers = #tpu.dot_dimension_numbers<[1], [0], [0], [1], [0, 0, 1, 1], [], []>} : vector<8x32xf32>, vector<32x128xf32>, vector<8x128xf32> -> vector<8x128xf32>
    %173 = vector.broadcast %25 : vector<1x128xf32> to vector<8x128xf32>
    %174 = arith.addf %172, %173 : vector<8x128xf32>
    %cst_34 = arith.constant dense<0.000000e+00> : vector<8x128xf32>
    %175 = tpu.matmul %171, %23, %cst_34 {dimension_numbers = #tpu.dot_dimension_numbers<[1], [0], [0], [1], [0, 0, 1, 1], [], []>} : vector<8x32xf32>, vector<32x128xf32>, vector<8x128xf32> -> vector<8x128xf32>
    %176 = arith.addf %22, %175 : vector<8x128xf32>
    %177 = arith.negf %176 : vector<8x128xf32>
    %178 = math.exp %177 : vector<8x128xf32>
    %cst_35 = arith.constant 1.000000e+00 : f32
    %179 = vector.broadcast %cst_35 : f32 to vector<8x128xf32>
    %180 = arith.addf %179, %178 : vector<8x128xf32>
    %181 = arith.divf %179, %180 : vector<8x128xf32>
    %182 = math.tanh %176 : vector<8x128xf32>
    %183 = arith.select %8, %181, %182 : vector<8x128xi1>, vector<8x128xf32>
    %184 = vector.extract_strided_slice %183 {offsets = [0, 0], sizes = [8, 32], strides = [1, 1]} : vector<8x128xf32> to vector<8x32xf32>
    %185 = vector.extract_strided_slice %183 {offsets = [0, 32], sizes = [8, 32], strides = [1, 1]} : vector<8x128xf32> to vector<8x32xf32>
    %186 = vector.extract_strided_slice %183 {offsets = [0, 64], sizes = [8, 32], strides = [1, 1]} : vector<8x128xf32> to vector<8x32xf32>
    %187 = vector.extract_strided_slice %183 {offsets = [0, 96], sizes = [8, 32], strides = [1, 1]} : vector<8x128xf32> to vector<8x32xf32>
    %188 = arith.mulf %185, %169 : vector<8x32xf32>
    %189 = arith.mulf %184, %187 : vector<8x32xf32>
    %190 = arith.addf %188, %189 : vector<8x32xf32>
    %191 = math.tanh %190 : vector<8x32xf32>
    %192 = arith.mulf %186, %191 : vector<8x32xf32>
    %cst_36 = arith.constant dense<0.000000e+00> : vector<8x128xf32>
    %193 = tpu.matmul %192, %24, %cst_36 {dimension_numbers = #tpu.dot_dimension_numbers<[1], [0], [0], [1], [0, 0, 1, 1], [], []>} : vector<8x32xf32>, vector<32x128xf32>, vector<8x128xf32> -> vector<8x128xf32>
    %194 = vector.broadcast %25 : vector<1x128xf32> to vector<8x128xf32>
    %195 = arith.addf %193, %194 : vector<8x128xf32>
    %c0_37 = arith.constant 0 : index
    %c0_38 = arith.constant 0 : index
    %196 = vector.load %arg5[%c0_37, %c0_38] : memref<32x128xf32, #tpu.memory_space<vmem>>, vector<32x128xf32>
    %cst_39 = arith.constant 0.000000e+00 : f32
    %197 = vector.broadcast %cst_39 : f32 to vector<8x32xf32>
    %cst_40 = arith.constant 0.000000e+00 : f32
    %198 = vector.broadcast %cst_40 : f32 to vector<8x32xf32>
    %cst_41 = arith.constant dense<0.000000e+00> : vector<8x128xf32>
    %199 = tpu.matmul %197, %196, %cst_41 {dimension_numbers = #tpu.dot_dimension_numbers<[1], [0], [0], [1], [0, 0, 1, 1], [], []>} : vector<8x32xf32>, vector<32x128xf32>, vector<8x128xf32> -> vector<8x128xf32>
    %200 = arith.addf %48, %199 : vector<8x128xf32>
    %201 = arith.negf %200 : vector<8x128xf32>
    %202 = math.exp %201 : vector<8x128xf32>
    %cst_42 = arith.constant 1.000000e+00 : f32
    %203 = vector.broadcast %cst_42 : f32 to vector<8x128xf32>
    %204 = arith.addf %203, %202 : vector<8x128xf32>
    %205 = arith.divf %203, %204 : vector<8x128xf32>
    %206 = math.tanh %200 : vector<8x128xf32>
    %207 = arith.select %8, %205, %206 : vector<8x128xi1>, vector<8x128xf32>
    %208 = vector.extract_strided_slice %207 {offsets = [0, 0], sizes = [8, 32], strides = [1, 1]} : vector<8x128xf32> to vector<8x32xf32>
    %209 = vector.extract_strided_slice %207 {offsets = [0, 32], sizes = [8, 32], strides = [1, 1]} : vector<8x128xf32> to vector<8x32xf32>
    %210 = vector.extract_strided_slice %207 {offsets = [0, 64], sizes = [8, 32], strides = [1, 1]} : vector<8x128xf32> to vector<8x32xf32>
    %211 = vector.extract_strided_slice %207 {offsets = [0, 96], sizes = [8, 32], strides = [1, 1]} : vector<8x128xf32> to vector<8x32xf32>
    %212 = arith.mulf %209, %198 : vector<8x32xf32>
    %213 = arith.mulf %208, %211 : vector<8x32xf32>
    %214 = arith.addf %212, %213 : vector<8x32xf32>
    %215 = math.tanh %214 : vector<8x32xf32>
    %216 = arith.mulf %210, %215 : vector<8x32xf32>
    %cst_43 = arith.constant dense<0.000000e+00> : vector<8x128xf32>
    %217 = tpu.matmul %216, %196, %cst_43 {dimension_numbers = #tpu.dot_dimension_numbers<[1], [0], [0], [1], [0, 0, 1, 1], [], []>} : vector<8x32xf32>, vector<32x128xf32>, vector<8x128xf32> -> vector<8x128xf32>
    %218 = arith.addf %69, %217 : vector<8x128xf32>
    %219 = arith.negf %218 : vector<8x128xf32>
    %220 = math.exp %219 : vector<8x128xf32>
    %cst_44 = arith.constant 1.000000e+00 : f32
    %221 = vector.broadcast %cst_44 : f32 to vector<8x128xf32>
    %222 = arith.addf %221, %220 : vector<8x128xf32>
    %223 = arith.divf %221, %222 : vector<8x128xf32>
    %224 = math.tanh %218 : vector<8x128xf32>
    %225 = arith.select %8, %223, %224 : vector<8x128xi1>, vector<8x128xf32>
    %226 = vector.extract_strided_slice %225 {offsets = [0, 0], sizes = [8, 32], strides = [1, 1]} : vector<8x128xf32> to vector<8x32xf32>
    %227 = vector.extract_strided_slice %225 {offsets = [0, 32], sizes = [8, 32], strides = [1, 1]} : vector<8x128xf32> to vector<8x32xf32>
    %228 = vector.extract_strided_slice %225 {offsets = [0, 64], sizes = [8, 32], strides = [1, 1]} : vector<8x128xf32> to vector<8x32xf32>
    %229 = vector.extract_strided_slice %225 {offsets = [0, 96], sizes = [8, 32], strides = [1, 1]} : vector<8x128xf32> to vector<8x32xf32>
    %230 = arith.mulf %227, %214 : vector<8x32xf32>
    %231 = arith.mulf %226, %229 : vector<8x32xf32>
    %232 = arith.addf %230, %231 : vector<8x32xf32>
    %233 = math.tanh %232 : vector<8x32xf32>
    %234 = arith.mulf %228, %233 : vector<8x32xf32>
    %cst_45 = arith.constant dense<0.000000e+00> : vector<8x128xf32>
    %235 = tpu.matmul %234, %196, %cst_45 {dimension_numbers = #tpu.dot_dimension_numbers<[1], [0], [0], [1], [0, 0, 1, 1], [], []>} : vector<8x32xf32>, vector<32x128xf32>, vector<8x128xf32> -> vector<8x128xf32>
    %236 = arith.addf %90, %235 : vector<8x128xf32>
    %237 = arith.negf %236 : vector<8x128xf32>
    %238 = math.exp %237 : vector<8x128xf32>
    %cst_46 = arith.constant 1.000000e+00 : f32
    %239 = vector.broadcast %cst_46 : f32 to vector<8x128xf32>
    %240 = arith.addf %239, %238 : vector<8x128xf32>
    %241 = arith.divf %239, %240 : vector<8x128xf32>
    %242 = math.tanh %236 : vector<8x128xf32>
    %243 = arith.select %8, %241, %242 : vector<8x128xi1>, vector<8x128xf32>
    %244 = vector.extract_strided_slice %243 {offsets = [0, 0], sizes = [8, 32], strides = [1, 1]} : vector<8x128xf32> to vector<8x32xf32>
    %245 = vector.extract_strided_slice %243 {offsets = [0, 32], sizes = [8, 32], strides = [1, 1]} : vector<8x128xf32> to vector<8x32xf32>
    %246 = vector.extract_strided_slice %243 {offsets = [0, 64], sizes = [8, 32], strides = [1, 1]} : vector<8x128xf32> to vector<8x32xf32>
    %247 = vector.extract_strided_slice %243 {offsets = [0, 96], sizes = [8, 32], strides = [1, 1]} : vector<8x128xf32> to vector<8x32xf32>
    %248 = arith.mulf %245, %232 : vector<8x32xf32>
    %249 = arith.mulf %244, %247 : vector<8x32xf32>
    %250 = arith.addf %248, %249 : vector<8x32xf32>
    %251 = math.tanh %250 : vector<8x32xf32>
    %252 = arith.mulf %246, %251 : vector<8x32xf32>
    %cst_47 = arith.constant dense<0.000000e+00> : vector<8x128xf32>
    %253 = tpu.matmul %252, %196, %cst_47 {dimension_numbers = #tpu.dot_dimension_numbers<[1], [0], [0], [1], [0, 0, 1, 1], [], []>} : vector<8x32xf32>, vector<32x128xf32>, vector<8x128xf32> -> vector<8x128xf32>
    %254 = arith.addf %111, %253 : vector<8x128xf32>
    %255 = arith.negf %254 : vector<8x128xf32>
    %256 = math.exp %255 : vector<8x128xf32>
    %cst_48 = arith.constant 1.000000e+00 : f32
    %257 = vector.broadcast %cst_48 : f32 to vector<8x128xf32>
    %258 = arith.addf %257, %256 : vector<8x128xf32>
    %259 = arith.divf %257, %258 : vector<8x128xf32>
    %260 = math.tanh %254 : vector<8x128xf32>
    %261 = arith.select %8, %259, %260 : vector<8x128xi1>, vector<8x128xf32>
    %262 = vector.extract_strided_slice %261 {offsets = [0, 0], sizes = [8, 32], strides = [1, 1]} : vector<8x128xf32> to vector<8x32xf32>
    %263 = vector.extract_strided_slice %261 {offsets = [0, 32], sizes = [8, 32], strides = [1, 1]} : vector<8x128xf32> to vector<8x32xf32>
    %264 = vector.extract_strided_slice %261 {offsets = [0, 64], sizes = [8, 32], strides = [1, 1]} : vector<8x128xf32> to vector<8x32xf32>
    %265 = vector.extract_strided_slice %261 {offsets = [0, 96], sizes = [8, 32], strides = [1, 1]} : vector<8x128xf32> to vector<8x32xf32>
    %266 = arith.mulf %263, %250 : vector<8x32xf32>
    %267 = arith.mulf %262, %265 : vector<8x32xf32>
    %268 = arith.addf %266, %267 : vector<8x32xf32>
    %269 = math.tanh %268 : vector<8x32xf32>
    %270 = arith.mulf %264, %269 : vector<8x32xf32>
    %cst_49 = arith.constant dense<0.000000e+00> : vector<8x128xf32>
    %271 = tpu.matmul %270, %196, %cst_49 {dimension_numbers = #tpu.dot_dimension_numbers<[1], [0], [0], [1], [0, 0, 1, 1], [], []>} : vector<8x32xf32>, vector<32x128xf32>, vector<8x128xf32> -> vector<8x128xf32>
    %272 = arith.addf %132, %271 : vector<8x128xf32>
    %273 = arith.negf %272 : vector<8x128xf32>
    %274 = math.exp %273 : vector<8x128xf32>
    %cst_50 = arith.constant 1.000000e+00 : f32
    %275 = vector.broadcast %cst_50 : f32 to vector<8x128xf32>
    %276 = arith.addf %275, %274 : vector<8x128xf32>
    %277 = arith.divf %275, %276 : vector<8x128xf32>
    %278 = math.tanh %272 : vector<8x128xf32>
    %279 = arith.select %8, %277, %278 : vector<8x128xi1>, vector<8x128xf32>
    %280 = vector.extract_strided_slice %279 {offsets = [0, 0], sizes = [8, 32], strides = [1, 1]} : vector<8x128xf32> to vector<8x32xf32>
    %281 = vector.extract_strided_slice %279 {offsets = [0, 32], sizes = [8, 32], strides = [1, 1]} : vector<8x128xf32> to vector<8x32xf32>
    %282 = vector.extract_strided_slice %279 {offsets = [0, 64], sizes = [8, 32], strides = [1, 1]} : vector<8x128xf32> to vector<8x32xf32>
    %283 = vector.extract_strided_slice %279 {offsets = [0, 96], sizes = [8, 32], strides = [1, 1]} : vector<8x128xf32> to vector<8x32xf32>
    %284 = arith.mulf %281, %268 : vector<8x32xf32>
    %285 = arith.mulf %280, %283 : vector<8x32xf32>
    %286 = arith.addf %284, %285 : vector<8x32xf32>
    %287 = math.tanh %286 : vector<8x32xf32>
    %288 = arith.mulf %282, %287 : vector<8x32xf32>
    %cst_51 = arith.constant dense<0.000000e+00> : vector<8x128xf32>
    %289 = tpu.matmul %288, %196, %cst_51 {dimension_numbers = #tpu.dot_dimension_numbers<[1], [0], [0], [1], [0, 0, 1, 1], [], []>} : vector<8x32xf32>, vector<32x128xf32>, vector<8x128xf32> -> vector<8x128xf32>
    %290 = arith.addf %153, %289 : vector<8x128xf32>
    %291 = arith.negf %290 : vector<8x128xf32>
    %292 = math.exp %291 : vector<8x128xf32>
    %cst_52 = arith.constant 1.000000e+00 : f32
    %293 = vector.broadcast %cst_52 : f32 to vector<8x128xf32>
    %294 = arith.addf %293, %292 : vector<8x128xf32>
    %295 = arith.divf %293, %294 : vector<8x128xf32>
    %296 = math.tanh %290 : vector<8x128xf32>
    %297 = arith.select %8, %295, %296 : vector<8x128xi1>, vector<8x128xf32>
    %298 = vector.extract_strided_slice %297 {offsets = [0, 0], sizes = [8, 32], strides = [1, 1]} : vector<8x128xf32> to vector<8x32xf32>
    %299 = vector.extract_strided_slice %297 {offsets = [0, 32], sizes = [8, 32], strides = [1, 1]} : vector<8x128xf32> to vector<8x32xf32>
    %300 = vector.extract_strided_slice %297 {offsets = [0, 64], sizes = [8, 32], strides = [1, 1]} : vector<8x128xf32> to vector<8x32xf32>
    %301 = vector.extract_strided_slice %297 {offsets = [0, 96], sizes = [8, 32], strides = [1, 1]} : vector<8x128xf32> to vector<8x32xf32>
    %302 = arith.mulf %299, %286 : vector<8x32xf32>
    %303 = arith.mulf %298, %301 : vector<8x32xf32>
    %304 = arith.addf %302, %303 : vector<8x32xf32>
    %305 = math.tanh %304 : vector<8x32xf32>
    %306 = arith.mulf %300, %305 : vector<8x32xf32>
    %cst_53 = arith.constant dense<0.000000e+00> : vector<8x128xf32>
    %307 = tpu.matmul %306, %196, %cst_53 {dimension_numbers = #tpu.dot_dimension_numbers<[1], [0], [0], [1], [0, 0, 1, 1], [], []>} : vector<8x32xf32>, vector<32x128xf32>, vector<8x128xf32> -> vector<8x128xf32>
    %308 = arith.addf %174, %307 : vector<8x128xf32>
    %309 = arith.negf %308 : vector<8x128xf32>
    %310 = math.exp %309 : vector<8x128xf32>
    %cst_54 = arith.constant 1.000000e+00 : f32
    %311 = vector.broadcast %cst_54 : f32 to vector<8x128xf32>
    %312 = arith.addf %311, %310 : vector<8x128xf32>
    %313 = arith.divf %311, %312 : vector<8x128xf32>
    %314 = math.tanh %308 : vector<8x128xf32>
    %315 = arith.select %8, %313, %314 : vector<8x128xi1>, vector<8x128xf32>
    %316 = vector.extract_strided_slice %315 {offsets = [0, 0], sizes = [8, 32], strides = [1, 1]} : vector<8x128xf32> to vector<8x32xf32>
    %317 = vector.extract_strided_slice %315 {offsets = [0, 32], sizes = [8, 32], strides = [1, 1]} : vector<8x128xf32> to vector<8x32xf32>
    %318 = vector.extract_strided_slice %315 {offsets = [0, 64], sizes = [8, 32], strides = [1, 1]} : vector<8x128xf32> to vector<8x32xf32>
    %319 = vector.extract_strided_slice %315 {offsets = [0, 96], sizes = [8, 32], strides = [1, 1]} : vector<8x128xf32> to vector<8x32xf32>
    %320 = arith.mulf %317, %304 : vector<8x32xf32>
    %321 = arith.mulf %316, %319 : vector<8x32xf32>
    %322 = arith.addf %320, %321 : vector<8x32xf32>
    %323 = math.tanh %322 : vector<8x32xf32>
    %324 = arith.mulf %318, %323 : vector<8x32xf32>
    %cst_55 = arith.constant dense<0.000000e+00> : vector<8x128xf32>
    %325 = tpu.matmul %324, %196, %cst_55 {dimension_numbers = #tpu.dot_dimension_numbers<[1], [0], [0], [1], [0, 0, 1, 1], [], []>} : vector<8x32xf32>, vector<32x128xf32>, vector<8x128xf32> -> vector<8x128xf32>
    %326 = arith.addf %195, %325 : vector<8x128xf32>
    %327 = arith.negf %326 : vector<8x128xf32>
    %328 = math.exp %327 : vector<8x128xf32>
    %cst_56 = arith.constant 1.000000e+00 : f32
    %329 = vector.broadcast %cst_56 : f32 to vector<8x128xf32>
    %330 = arith.addf %329, %328 : vector<8x128xf32>
    %331 = arith.divf %329, %330 : vector<8x128xf32>
    %332 = math.tanh %326 : vector<8x128xf32>
    %333 = arith.select %8, %331, %332 : vector<8x128xi1>, vector<8x128xf32>
    %334 = vector.extract_strided_slice %333 {offsets = [0, 0], sizes = [8, 32], strides = [1, 1]} : vector<8x128xf32> to vector<8x32xf32>
    %335 = vector.extract_strided_slice %333 {offsets = [0, 32], sizes = [8, 32], strides = [1, 1]} : vector<8x128xf32> to vector<8x32xf32>
    %336 = vector.extract_strided_slice %333 {offsets = [0, 64], sizes = [8, 32], strides = [1, 1]} : vector<8x128xf32> to vector<8x32xf32>
    %337 = vector.extract_strided_slice %333 {offsets = [0, 96], sizes = [8, 32], strides = [1, 1]} : vector<8x128xf32> to vector<8x32xf32>
    %338 = arith.mulf %335, %322 : vector<8x32xf32>
    %339 = arith.mulf %334, %337 : vector<8x32xf32>
    %340 = arith.addf %338, %339 : vector<8x32xf32>
    %341 = math.tanh %340 : vector<8x32xf32>
    %342 = arith.mulf %336, %341 : vector<8x32xf32>
    %343 = tpu.concatenate %216, %234, %252, %270, %288, %306, %324, %342 in 1 : vector<8x32xf32>, vector<8x32xf32>, vector<8x32xf32>, vector<8x32xf32>, vector<8x32xf32>, vector<8x32xf32>, vector<8x32xf32>, vector<8x32xf32> -> vector<8x256xf32>
    %c0_i32_57 = arith.constant 0 : i32
    %344 = tpu.memref_slice %arg21[%c0_i32_57] : memref<3x!tpu.dma_semaphore, #tpu.memory_space<semaphore_mem>> -> memref<1x!tpu.dma_semaphore, #tpu.memory_space<semaphore_mem>>
    %345 = tpu.memref_squeeze %344 : memref<1x!tpu.dma_semaphore, #tpu.memory_space<semaphore_mem>> -> memref<!tpu.dma_semaphore, #tpu.memory_space<semaphore_mem>>
    tpu.wait_dma2 semaphore(%345 : memref<!tpu.dma_semaphore, #tpu.memory_space<semaphore_mem>>) src(%arg14 : memref<256x512xbf16, #tpu.memory_space<any>>) dst(%arg18 : memref<256x512xbf16, #tpu.memory_space<vmem>>)
    %c0_58 = arith.constant 0 : index
    %c0_59 = arith.constant 0 : index
    %346 = vector.load %arg18[%c0_58, %c0_59] : memref<256x512xbf16, #tpu.memory_space<vmem>>, vector<256x512xbf16>
    %347 = arith.truncf %343 : vector<8x256xf32> to vector<8x256xbf16>
    %cst_60 = arith.constant dense<0.000000e+00> : vector<8x512xf32>
    %348 = tpu.matmul %347, %346, %cst_60 {dimension_numbers = #tpu.dot_dimension_numbers<[1], [0], [0], [1], [0, 0, 1, 1], [], []>} : vector<8x256xbf16>, vector<256x512xbf16>, vector<8x512xf32> -> vector<8x512xf32>
    %c0_61 = arith.constant 0 : index
    %c0_62 = arith.constant 0 : index
    %349 = vector.load %arg7[%c0_61, %c0_62] : memref<1x512xf32, #tpu.memory_space<vmem>>, vector<1x512xf32>
    %350 = vector.broadcast %349 : vector<1x512xf32> to vector<8x512xf32>
    %351 = arith.addf %348, %350 : vector<8x512xf32>
    %cst_63 = arith.constant 0.000000e+00 : f32
    %352 = vector.broadcast %cst_63 : f32 to vector<8x512xf32>
    %353 = arith.maximumf %351, %352 : vector<8x512xf32>
    %c1_i32_64 = arith.constant 1 : i32
    %354 = tpu.memref_slice %arg21[%c1_i32_64] : memref<3x!tpu.dma_semaphore, #tpu.memory_space<semaphore_mem>> -> memref<1x!tpu.dma_semaphore, #tpu.memory_space<semaphore_mem>>
    %355 = tpu.memref_squeeze %354 : memref<1x!tpu.dma_semaphore, #tpu.memory_space<semaphore_mem>> -> memref<!tpu.dma_semaphore, #tpu.memory_space<semaphore_mem>>
    tpu.wait_dma2 semaphore(%355 : memref<!tpu.dma_semaphore, #tpu.memory_space<semaphore_mem>>) src(%arg15 : memref<512x256xbf16, #tpu.memory_space<any>>) dst(%arg19 : memref<512x256xbf16, #tpu.memory_space<vmem>>)
    %c0_65 = arith.constant 0 : index
    %c0_66 = arith.constant 0 : index
    %356 = vector.load %arg19[%c0_65, %c0_66] : memref<512x256xbf16, #tpu.memory_space<vmem>>, vector<512x256xbf16>
    %357 = arith.truncf %353 : vector<8x512xf32> to vector<8x512xbf16>
    %cst_67 = arith.constant dense<0.000000e+00> : vector<8x256xf32>
    %358 = tpu.matmul %357, %356, %cst_67 {dimension_numbers = #tpu.dot_dimension_numbers<[1], [0], [0], [1], [0, 0, 1, 1], [], []>} : vector<8x512xbf16>, vector<512x256xbf16>, vector<8x256xf32> -> vector<8x256xf32>
    %c0_68 = arith.constant 0 : index
    %c0_69 = arith.constant 0 : index
    %359 = vector.load %arg8[%c0_68, %c0_69] : memref<1x256xf32, #tpu.memory_space<vmem>>, vector<1x256xf32>
    %360 = vector.broadcast %359 : vector<1x256xf32> to vector<8x256xf32>
    %361 = arith.addf %358, %360 : vector<8x256xf32>
    %cst_70 = arith.constant 0.000000e+00 : f32
    %362 = vector.broadcast %cst_70 : f32 to vector<8x256xf32>
    %363 = arith.maximumf %361, %362 : vector<8x256xf32>
    %c2_i32_71 = arith.constant 2 : i32
    %364 = tpu.memref_slice %arg21[%c2_i32_71] : memref<3x!tpu.dma_semaphore, #tpu.memory_space<semaphore_mem>> -> memref<1x!tpu.dma_semaphore, #tpu.memory_space<semaphore_mem>>
    %365 = tpu.memref_squeeze %364 : memref<1x!tpu.dma_semaphore, #tpu.memory_space<semaphore_mem>> -> memref<!tpu.dma_semaphore, #tpu.memory_space<semaphore_mem>>
    tpu.wait_dma2 semaphore(%365 : memref<!tpu.dma_semaphore, #tpu.memory_space<semaphore_mem>>) src(%arg16 : memref<256x128xbf16, #tpu.memory_space<any>>) dst(%arg20 : memref<256x128xbf16, #tpu.memory_space<vmem>>)
    %c0_72 = arith.constant 0 : index
    %c0_73 = arith.constant 0 : index
    %366 = vector.load %arg20[%c0_72, %c0_73] : memref<256x128xbf16, #tpu.memory_space<vmem>>, vector<256x128xbf16>
    %367 = arith.truncf %363 : vector<8x256xf32> to vector<8x256xbf16>
    %cst_74 = arith.constant dense<0.000000e+00> : vector<8x128xf32>
    %368 = tpu.matmul %367, %366, %cst_74 {dimension_numbers = #tpu.dot_dimension_numbers<[1], [0], [0], [1], [0, 0, 1, 1], [], []>} : vector<8x256xbf16>, vector<256x128xbf16>, vector<8x128xf32> -> vector<8x128xf32>
    %c0_75 = arith.constant 0 : index
    %c0_76 = arith.constant 0 : index
    %369 = vector.load %arg9[%c0_75, %c0_76] : memref<1x128xf32, #tpu.memory_space<vmem>>, vector<1x128xf32>
    %370 = vector.broadcast %369 : vector<1x128xf32> to vector<8x128xf32>
    %371 = arith.addf %368, %370 : vector<8x128xf32>
    %cst_77 = arith.constant 0.000000e+00 : f32
    %372 = vector.broadcast %cst_77 : f32 to vector<8x128xf32>
    %373 = arith.maximumf %371, %372 : vector<8x128xf32>
    %c0_78 = arith.constant 0 : index
    %c0_79 = arith.constant 0 : index
    %374 = vector.load %arg12[%c0_78, %c0_79] : memref<128x64xf32, #tpu.memory_space<vmem>>, vector<128x64xf32>
    %cst_80 = arith.constant dense<0.000000e+00> : vector<8x64xf32>
    %375 = tpu.matmul %373, %374, %cst_80 {dimension_numbers = #tpu.dot_dimension_numbers<[1], [0], [0], [1], [0, 0, 1, 1], [], []>} : vector<8x128xf32>, vector<128x64xf32>, vector<8x64xf32> -> vector<8x64xf32>
    %c0_81 = arith.constant 0 : index
    %c0_82 = arith.constant 0 : index
    %376 = vector.load %arg10[%c0_81, %c0_82] : memref<1x64xf32, #tpu.memory_space<vmem>>, vector<1x64xf32>
    %377 = vector.broadcast %376 : vector<1x64xf32> to vector<8x64xf32>
    %378 = arith.addf %375, %377 : vector<8x64xf32>
    %cst_83 = arith.constant 0.000000e+00 : f32
    %379 = vector.broadcast %cst_83 : f32 to vector<8x64xf32>
    %380 = arith.maximumf %378, %379 : vector<8x64xf32>
    %c0_84 = arith.constant 0 : index
    %c0_85 = arith.constant 0 : index
    %381 = vector.load %arg13[%c0_84, %c0_85] : memref<64x4xf32, #tpu.memory_space<vmem>>, vector<64x4xf32>
    %cst_86 = arith.constant dense<0.000000e+00> : vector<8x4xf32>
    %382 = tpu.matmul %380, %381, %cst_86 {dimension_numbers = #tpu.dot_dimension_numbers<[1], [0], [0], [1], [0, 0, 1, 1], [], []>} : vector<8x64xf32>, vector<64x4xf32>, vector<8x4xf32> -> vector<8x4xf32>
    %c0_87 = arith.constant 0 : index
    %c0_88 = arith.constant 0 : index
    %383 = vector.load %arg11[%c0_87, %c0_88] : memref<1x4xf32, #tpu.memory_space<vmem>>, vector<1x4xf32>
    %384 = vector.broadcast %383 : vector<1x4xf32> to vector<8x4xf32>
    %385 = arith.addf %382, %384 : vector<8x4xf32>
    %c0_89 = arith.constant 0 : index
    %c0_90 = arith.constant 0 : index
    %386 = vector.load %arg17[%c0_89, %c0_90] : memref<8x4xf32, #tpu.memory_space<vmem>>, vector<8x4xf32>
    tpu.vector_store %arg17[%c0_89, %c0_90], %385 {strides = array<i32>} : memref<8x4xf32, #tpu.memory_space<vmem>>, vector<8x4xf32>,
    return
  }
}

</mosaic_0001>

<bundles_post_ra>
// kernel: _lambda_.1
= control target key start
LH: loop header
LB: loop body
LE: loop exit
PB: predicated region body
PF: predicated region fallthrough
CT: control target
= control target key end

     0   :  { %s6589_s0 = inlined_call_operand.vmem [shape: f32[64,8], index: 0, kind: input, shape index: {}]   ;;  %s6590_s1 = inlined_call_operand.vmem [shape: f32[8,128], index: 1, kind: input, shape index: {}]   ;;  %s6591_s2 = inlined_call_operand.vmem [shape: f32[32,128], index: 2, kind: input, shape index: {}]   ;;  %s6592_s3 = inlined_call_operand.vmem [shape: f32[1,128], index: 3, kind: input, shape index: {}]   ;;  %s6593_s4 = inlined_call_operand.vmem [shape: f32[32,128], index: 4, kind: input, shape index: {}]   ;;  %s6594_s5 = inlined_call_operand.vmem [shape: f32[32,128], index: 5, kind: input, shape index: {}]   ;;  %s6595_s6 = inlined_call_operand.vmem [shape: f32[1,128], index: 6, kind: input, shape index: {}]   ;;  %s6596_s7 = inlined_call_operand.vmem [shape: f32[1,512], index: 7, kind: input, shape index: {}]   ;;  %s6597_s8 = inlined_call_operand.vmem [shape: f32[1,256], index: 8, kind: input, shape index: {}]   ;;  %s6598_s9 = inlined_call_operand.vmem [shape: f32[1,128], index: 9, kind: input, shape index: {}]   ;;  %s6599_s10 = inlined_call_operand.vmem [shape: f32[1,64], index: 10, kind: input, shape index: {}]   ;;  %s6600_s11 = inlined_call_operand.vmem [shape: f32[1,4], index: 11, kind: input, shape index: {}]   ;;  %s6601_s12 = inlined_call_operand.vmem [shape: f32[128,64], index: 12, kind: input, shape index: {}]   ;;  %s6602_s13 = inlined_call_operand.vmem [shape: f32[64,4], index: 13, kind: input, shape index: {}]   ;;  %s6603_s14 = inlined_call_operand.vmem [shape: bf16[256,512], index: 14, kind: input, shape index: {}]   ;;  %s6604_s15 = inlined_call_operand.vmem [shape: bf16[512,256], index: 15, kind: input, shape index: {}]   ;;  %s6605_s16 = inlined_call_operand.vmem [shape: bf16[256,128], index: 16, kind: input, shape index: {}]   ;;  %s6606_s17 = inlined_call_operand.vmem [shape: f32[8,4], index: 17, kind: output, shape index: {}]  }
   0x1   :  { %6608 = sst [smem:[#allocation12_spill]] %s6589_s0  ;;  %v68_v0 = vld [vmem:[%s6603_s14] sm:$0xf]  ;;  %v70_v1 = vld [vmem:[%s6603_s14 + $0x10] sm:$0xf] }
   0x2   :  { %6609 = sst [smem:[#allocation13_spill]] %s6590_s1  ;;  %v72_v2 = vld [vmem:[%s6603_s14 + $0x4] sm:$0xf]  ;;  %69 = vst [vmem:[#allocation2] sm:$0xf] %v68_v0  ;;  %v82_v7 = vld [vmem:[%s6603_s14 + $0x1c] sm:$0xff]  }
   0x3   :  { %71 = vst [vmem:[#allocation2 + $0x4] sm:$0xf] %v70_v1  ;;  %73 = vst [vmem:[#allocation2 + $0x8] sm:$0xf] %v72_v2  ;;  %v74_v3 = vld [vmem:[%s6603_s14 + $0x14] sm:$0xf] }
   0x4   :  { %v76_v4 = vld [vmem:[%s6603_s14 + $0x8] sm:$0xf]  ;;  %v78_v5 = vld [vmem:[%s6603_s14 + $0x18] sm:$0xf]  ;;  %75 = vst [vmem:[#allocation2 + $0xc] sm:$0xf] %v74_v3 }
   0x5   :  { %77 = vst [vmem:[#allocation2 + $0x10] sm:$0xf] %v76_v4  ;;  %79 = vst [vmem:[#allocation2 + $0x14] sm:$0xf] %v78_v5  ;;  %v80_v6 = vld [vmem:[%s6603_s14 + $0xc] sm:$0xf] }
   0x6   :  { %v86_v8 = vld [vmem:[%s6603_s14 + $0x30] sm:$0xf]  ;;  %81 = vst [vmem:[#allocation2 + $0x18] sm:$0xf] %v80_v6  ;;  %83 = vst [vmem:[#allocation2 + $0x1c] sm:$0xff] %v82_v7   ;;  %v98_v14 = vld [vmem:[%s6603_s14 + $0x3c] sm:$0xff]  }
   0x7   :  { %87 = vst [vmem:[#allocation2 + $0x24] sm:$0xf] %v86_v8  ;;  %v88_v9 = vld [vmem:[%s6603_s14 + $0x24] sm:$0xf]  ;;  %v90_v10 = vld [vmem:[%s6603_s14 + $0x34] sm:$0xf] }
   0x8   :  { %v92_v11 = vld [vmem:[%s6603_s14 + $0x28] sm:$0xf]  ;;  %89 = vst [vmem:[#allocation2 + $0x28] sm:$0xf] %v88_v9  ;;  %91 = vst [vmem:[#allocation2 + $0x2c] sm:$0xf] %v90_v10 }
   0x9   :  { %93 = vst [vmem:[#allocation2 + $0x30] sm:$0xf] %v92_v11  ;;  %v94_v12 = vld [vmem:[%s6603_s14 + $0x38] sm:$0xf]  ;;  %v96_v13 = vld [vmem:[%s6603_s14 + $0x2c] sm:$0xf] }
   0xa   :  { %95 = vst [vmem:[#allocation2 + $0x34] sm:$0xf] %v94_v12  ;;  %97 = vst [vmem:[#allocation2 + $0x38] sm:$0xf] %v96_v13  ;;  %v102_v15 = vld [vmem:[%s6603_s14 + $0x50] sm:$0xf] }
   0xb   :  { %99 = vst [vmem:[#allocation2 + $0x3c] sm:$0xff] %v98_v14   ;;  %v104_v16 = vld [vmem:[%s6603_s14 + $0x44] sm:$0xf]  ;;  %v106_v17 = vld [vmem:[%s6603_s14 + $0x54] sm:$0xf]  ;;  %v114_v21 = vld [vmem:[%s6603_s14 + $0x5c] sm:$0xff]  }
   0xc   :  { %103 = vst [vmem:[#allocation2 + $0x44] sm:$0xf] %v102_v15  ;;  %105 = vst [vmem:[#allocation2 + $0x48] sm:$0xf] %v104_v16  ;;  %v108_v18 = vld [vmem:[%s6603_s14 + $0x48] sm:$0xf] }
   0xd   :  { %107 = vst [vmem:[#allocation2 + $0x4c] sm:$0xf] %v106_v17  ;;  %v110_v19 = vld [vmem:[%s6603_s14 + $0x58] sm:$0xf]  ;;  %v112_v20 = vld [vmem:[%s6603_s14 + $0x4c] sm:$0xf] }
   0xe   :  { %109 = vst [vmem:[#allocation2 + $0x50] sm:$0xf] %v108_v18  ;;  %111 = vst [vmem:[#allocation2 + $0x54] sm:$0xf] %v110_v19  ;;  %v118_v22 = vld [vmem:[%s6603_s14 + $0x70] sm:$0xf] }
   0xf   :  { %113 = vst [vmem:[#allocation2 + $0x58] sm:$0xf] %v112_v20  ;;  %v120_v23 = vld [vmem:[%s6603_s14 + $0x64] sm:$0xf]  ;;  %115 = vst [vmem:[#allocation2 + $0x5c] sm:$0xff] %v114_v21   ;;  %v130_v28 = vld [vmem:[%s6603_s14 + $0x7c] sm:$0xff]  }
  0x10   :  { %119 = vst [vmem:[#allocation2 + $0x64] sm:$0xf] %v118_v22  ;;  %121 = vst [vmem:[#allocation2 + $0x68] sm:$0xf] %v120_v23  ;;  %v122_v24 = vld [vmem:[%s6603_s14 + $0x74] sm:$0xf] }
  0x11   :  { %v124_v25 = vld [vmem:[%s6603_s14 + $0x68] sm:$0xf]  ;;  %v126_v26 = vld [vmem:[%s6603_s14 + $0x78] sm:$0xf]  ;;  %123 = vst [vmem:[#allocation2 + $0x6c] sm:$0xf] %v122_v24 }
  0x12   :  { %125 = vst [vmem:[#allocation2 + $0x70] sm:$0xf] %v124_v25  ;;  %127 = vst [vmem:[#allocation2 + $0x74] sm:$0xf] %v126_v26  ;;  %v128_v27 = vld [vmem:[%s6603_s14 + $0x6c] sm:$0xf] }
  0x13   :  { %v134_v29 = vld [vmem:[%s6603_s14 + $0x90] sm:$0xf]  ;;  %129 = vst [vmem:[#allocation2 + $0x78] sm:$0xf] %v128_v27  ;;  %131 = vst [vmem:[#allocation2 + $0x7c] sm:$0xff] %v130_v28   ;;  %v146_v35 = vld [vmem:[%s6603_s14 + $0x9c] sm:$0xff]  }
  0x14   :  { %135 = vst [vmem:[#allocation2 + $0x84] sm:$0xf] %v134_v29  ;;  %v136_v30 = vld [vmem:[%s6603_s14 + $0x84] sm:$0xf]  ;;  %v138_v31 = vld [vmem:[%s6603_s14 + $0x94] sm:$0xf] }
  0x15   :  { %v140_v32 = vld [vmem:[%s6603_s14 + $0x88] sm:$0xf]  ;;  %137 = vst [vmem:[#allocation2 + $0x88] sm:$0xf] %v136_v30  ;;  %139 = vst [vmem:[#allocation2 + $0x8c] sm:$0xf] %v138_v31 }
  0x16   :  { %141 = vst [vmem:[#allocation2 + $0x90] sm:$0xf] %v140_v32  ;;  %v142_v33 = vld [vmem:[%s6603_s14 + $0x98] sm:$0xf]  ;;  %v144_v34 = vld [vmem:[%s6603_s14 + $0x8c] sm:$0xf] }
  0x17   :  { %143 = vst [vmem:[#allocation2 + $0x94] sm:$0xf] %v142_v33  ;;  %145 = vst [vmem:[#allocation2 + $0x98] sm:$0xf] %v144_v34  ;;  %v150_v36 = vld [vmem:[%s6603_s14 + $0xb0] sm:$0xf] }
  0x18   :  { %147 = vst [vmem:[#allocation2 + $0x9c] sm:$0xff] %v146_v35   ;;  %v152_v37 = vld [vmem:[%s6603_s14 + $0xa4] sm:$0xf]  ;;  %v154_v38 = vld [vmem:[%s6603_s14 + $0xb4] sm:$0xf]  ;;  %v162_v42 = vld [vmem:[%s6603_s14 + $0xbc] sm:$0xff]  }
  0x19   :  { %151 = vst [vmem:[#allocation2 + $0xa4] sm:$0xf] %v150_v36  ;;  %153 = vst [vmem:[#allocation2 + $0xa8] sm:$0xf] %v152_v37  ;;  %v156_v39 = vld [vmem:[%s6603_s14 + $0xa8] sm:$0xf] }
  0x1a   :  { %155 = vst [vmem:[#allocation2 + $0xac] sm:$0xf] %v154_v38  ;;  %v158_v40 = vld [vmem:[%s6603_s14 + $0xb8] sm:$0xf]  ;;  %v160_v41 = vld [vmem:[%s6603_s14 + $0xac] sm:$0xf] }
  0x1b   :  { %157 = vst [vmem:[#allocation2 + $0xb0] sm:$0xf] %v156_v39  ;;  %159 = vst [vmem:[#allocation2 + $0xb4] sm:$0xf] %v158_v40  ;;  %v166_v43 = vld [vmem:[%s6603_s14 + $0xd0] sm:$0xf] }
  0x1c   :  { %161 = vst [vmem:[#allocation2 + $0xb8] sm:$0xf] %v160_v41  ;;  %v168_v44 = vld [vmem:[%s6603_s14 + $0xc4] sm:$0xf]  ;;  %163 = vst [vmem:[#allocation2 + $0xbc] sm:$0xff] %v162_v42   ;;  %v178_v49 = vld [vmem:[%s6603_s14 + $0xdc] sm:$0xff]  }
  0x1d   :  { %167 = vst [vmem:[#allocation2 + $0xc4] sm:$0xf] %v166_v43  ;;  %169 = vst [vmem:[#allocation2 + $0xc8] sm:$0xf] %v168_v44  ;;  %v170_v45 = vld [vmem:[%s6603_s14 + $0xd4] sm:$0xf] }
  0x1e   :  { %v172_v46 = vld [vmem:[%s6603_s14 + $0xc8] sm:$0xf]  ;;  %v174_v47 = vld [vmem:[%s6603_s14 + $0xd8] sm:$0xf]  ;;  %171 = vst [vmem:[#allocation2 + $0xcc] sm:$0xf] %v170_v45 }
  0x1f   :  { %173 = vst [vmem:[#allocation2 + $0xd0] sm:$0xf] %v172_v46  ;;  %175 = vst [vmem:[#allocation2 + $0xd4] sm:$0xf] %v174_v47  ;;  %v176_v48 = vld [vmem:[%s6603_s14 + $0xcc] sm:$0xf] }
  0x20   :  { %v182_v50 = vld [vmem:[%s6603_s14 + $0xf0] sm:$0xf]  ;;  %177 = vst [vmem:[#allocation2 + $0xd8] sm:$0xf] %v176_v48  ;;  %179 = vst [vmem:[#allocation2 + $0xdc] sm:$0xff] %v178_v49   ;;  %v194_v56 = vld [vmem:[%s6603_s14 + $0xfc] sm:$0xff]  }
  0x21   :  { %183 = vst [vmem:[#allocation2 + $0xe4] sm:$0xf] %v182_v50  ;;  %v184_v51 = vld [vmem:[%s6603_s14 + $0xe4] sm:$0xf]  ;;  %v186_v52 = vld [vmem:[%s6603_s14 + $0xf4] sm:$0xf] }
  0x22   :  { %v188_v53 = vld [vmem:[%s6603_s14 + $0xe8] sm:$0xf]  ;;  %185 = vst [vmem:[#allocation2 + $0xe8] sm:$0xf] %v184_v51  ;;  %187 = vst [vmem:[#allocation2 + $0xec] sm:$0xf] %v186_v52 }
  0x23   :  { %189 = vst [vmem:[#allocation2 + $0xf0] sm:$0xf] %v188_v53  ;;  %v190_v54 = vld [vmem:[%s6603_s14 + $0xf8] sm:$0xf]  ;;  %v192_v55 = vld [vmem:[%s6603_s14 + $0xec] sm:$0xf] }
  0x24   :  { %191 = vst [vmem:[#allocation2 + $0xf4] sm:$0xf] %v190_v54  ;;  %193 = vst [vmem:[#allocation2 + $0xf8] sm:$0xf] %v192_v55  ;;  %v198_v57 = vld [vmem:[%s6603_s14 + $0x110] sm:$0xf] }
  0x25   :  { %195 = vst [vmem:[#allocation2 + $0xfc] sm:$0xff] %v194_v56   ;;  %v200_v58 = vld [vmem:[%s6603_s14 + $0x104] sm:$0xf]  ;;  %v202_v59 = vld [vmem:[%s6603_s14 + $0x114] sm:$0xf]  ;;  %v210_v63 = vld [vmem:[%s6603_s14 + $0x11c] sm:$0xff]  }
  0x26   :  { %199 = vst [vmem:[#allocation2 + $0x104] sm:$0xf] %v198_v57  ;;  %201 = vst [vmem:[#allocation2 + $0x108] sm:$0xf] %v200_v58  ;;  %v204_v60 = vld [vmem:[%s6603_s14 + $0x108] sm:$0xf] }
  0x27   :  { %203 = vst [vmem:[#allocation2 + $0x10c] sm:$0xf] %v202_v59  ;;  %v206_v61 = vld [vmem:[%s6603_s14 + $0x118] sm:$0xf]  ;;  %v208_v62 = vld [vmem:[%s6603_s14 + $0x10c] sm:$0xf] }
  0x28   :  { %205 = vst [vmem:[#allocation2 + $0x110] sm:$0xf] %v204_v60  ;;  %207 = vst [vmem:[#allocation2 + $0x114] sm:$0xf] %v206_v61  ;;  %v214_v0 = vld [vmem:[%s6603_s14 + $0x130] sm:$0xf] }
  0x29   :  { %209 = vst [vmem:[#allocation2 + $0x118] sm:$0xf] %v208_v62  ;;  %v216_v1 = vld [vmem:[%s6603_s14 + $0x124] sm:$0xf]  ;;  %211 = vst [vmem:[#allocation2 + $0x11c] sm:$0xff] %v210_v63   ;;  %v226_v6 = vld [vmem:[%s6603_s14 + $0x13c] sm:$0xff]  }
  0x2a   :  { %215 = vst [vmem:[#allocation2 + $0x124] sm:$0xf] %v214_v0  ;;  %217 = vst [vmem:[#allocation2 + $0x128] sm:$0xf] %v216_v1  ;;  %v218_v2 = vld [vmem:[%s6603_s14 + $0x134] sm:$0xf] }
  0x2b   :  { %v220_v3 = vld [vmem:[%s6603_s14 + $0x128] sm:$0xf]  ;;  %v222_v4 = vld [vmem:[%s6603_s14 + $0x138] sm:$0xf]  ;;  %219 = vst [vmem:[#allocation2 + $0x12c] sm:$0xf] %v218_v2 }
  0x2c   :  { %221 = vst [vmem:[#allocation2 + $0x130] sm:$0xf] %v220_v3  ;;  %223 = vst [vmem:[#allocation2 + $0x134] sm:$0xf] %v222_v4  ;;  %v224_v5 = vld [vmem:[%s6603_s14 + $0x12c] sm:$0xf] }
  0x2d   :  { %v230_v7 = vld [vmem:[%s6603_s14 + $0x150] sm:$0xf]  ;;  %225 = vst [vmem:[#allocation2 + $0x138] sm:$0xf] %v224_v5  ;;  %227 = vst [vmem:[#allocation2 + $0x13c] sm:$0xff] %v226_v6   ;;  %v242_v13 = vld [vmem:[%s6603_s14 + $0x15c] sm:$0xff]  }
  0x2e   :  { %231 = vst [vmem:[#allocation2 + $0x144] sm:$0xf] %v230_v7  ;;  %v232_v8 = vld [vmem:[%s6603_s14 + $0x144] sm:$0xf]  ;;  %v234_v9 = vld [vmem:[%s6603_s14 + $0x154] sm:$0xf] }
  0x2f   :  { %v236_v10 = vld [vmem:[%s6603_s14 + $0x148] sm:$0xf]  ;;  %233 = vst [vmem:[#allocation2 + $0x148] sm:$0xf] %v232_v8  ;;  %235 = vst [vmem:[#allocation2 + $0x14c] sm:$0xf] %v234_v9 }
  0x30   :  { %237 = vst [vmem:[#allocation2 + $0x150] sm:$0xf] %v236_v10  ;;  %v238_v11 = vld [vmem:[%s6603_s14 + $0x158] sm:$0xf]  ;;  %v240_v12 = vld [vmem:[%s6603_s14 + $0x14c] sm:$0xf] }
  0x31   :  { %239 = vst [vmem:[#allocation2 + $0x154] sm:$0xf] %v238_v11  ;;  %241 = vst [vmem:[#allocation2 + $0x158] sm:$0xf] %v240_v12  ;;  %v246_v14 = vld [vmem:[%s6603_s14 + $0x170] sm:$0xf] }
  0x32   :  { %243 = vst [vmem:[#allocation2 + $0x15c] sm:$0xff] %v242_v13   ;;  %v248_v15 = vld [vmem:[%s6603_s14 + $0x164] sm:$0xf]  ;;  %v250_v16 = vld [vmem:[%s6603_s14 + $0x174] sm:$0xf]  ;;  %v258_v20 = vld [vmem:[%s6603_s14 + $0x17c] sm:$0xff]  }
  0x33   :  { %247 = vst [vmem:[#allocation2 + $0x164] sm:$0xf] %v246_v14  ;;  %249 = vst [vmem:[#allocation2 + $0x168] sm:$0xf] %v248_v15  ;;  %v252_v17 = vld [vmem:[%s6603_s14 + $0x168] sm:$0xf] }
  0x34   :  { %251 = vst [vmem:[#allocation2 + $0x16c] sm:$0xf] %v250_v16  ;;  %v254_v18 = vld [vmem:[%s6603_s14 + $0x178] sm:$0xf]  ;;  %v256_v19 = vld [vmem:[%s6603_s14 + $0x16c] sm:$0xf] }
  0x35   :  { %253 = vst [vmem:[#allocation2 + $0x170] sm:$0xf] %v252_v17  ;;  %255 = vst [vmem:[#allocation2 + $0x174] sm:$0xf] %v254_v18  ;;  %v262_v21 = vld [vmem:[%s6603_s14 + $0x190] sm:$0xf] }
  0x36   :  { %257 = vst [vmem:[#allocation2 + $0x178] sm:$0xf] %v256_v19  ;;  %v264_v22 = vld [vmem:[%s6603_s14 + $0x184] sm:$0xf]  ;;  %259 = vst [vmem:[#allocation2 + $0x17c] sm:$0xff] %v258_v20   ;;  %v274_v27 = vld [vmem:[%s6603_s14 + $0x19c] sm:$0xff]  }
  0x37   :  { %263 = vst [vmem:[#allocation2 + $0x184] sm:$0xf] %v262_v21  ;;  %265 = vst [vmem:[#allocation2 + $0x188] sm:$0xf] %v264_v22  ;;  %v266_v23 = vld [vmem:[%s6603_s14 + $0x194] sm:$0xf] }
  0x38   :  { %v268_v24 = vld [vmem:[%s6603_s14 + $0x188] sm:$0xf]  ;;  %v270_v25 = vld [vmem:[%s6603_s14 + $0x198] sm:$0xf]  ;;  %267 = vst [vmem:[#allocation2 + $0x18c] sm:$0xf] %v266_v23 }
  0x39   :  { %269 = vst [vmem:[#allocation2 + $0x190] sm:$0xf] %v268_v24  ;;  %271 = vst [vmem:[#allocation2 + $0x194] sm:$0xf] %v270_v25  ;;  %v272_v26 = vld [vmem:[%s6603_s14 + $0x18c] sm:$0xf] }
  0x3a   :  { %v278_v28 = vld [vmem:[%s6603_s14 + $0x1b0] sm:$0xf]  ;;  %273 = vst [vmem:[#allocation2 + $0x198] sm:$0xf] %v272_v26  ;;  %275 = vst [vmem:[#allocation2 + $0x19c] sm:$0xff] %v274_v27   ;;  %v290_v34 = vld [vmem:[%s6603_s14 + $0x1bc] sm:$0xff]  }
  0x3b   :  { %279 = vst [vmem:[#allocation2 + $0x1a4] sm:$0xf] %v278_v28  ;;  %v280_v29 = vld [vmem:[%s6603_s14 + $0x1a4] sm:$0xf]  ;;  %v282_v30 = vld [vmem:[%s6603_s14 + $0x1b4] sm:$0xf] }
  0x3c   :  { %v284_v31 = vld [vmem:[%s6603_s14 + $0x1a8] sm:$0xf]  ;;  %281 = vst [vmem:[#allocation2 + $0x1a8] sm:$0xf] %v280_v29  ;;  %283 = vst [vmem:[#allocation2 + $0x1ac] sm:$0xf] %v282_v30 }
  0x3d   :  { %285 = vst [vmem:[#allocation2 + $0x1b0] sm:$0xf] %v284_v31  ;;  %v286_v32 = vld [vmem:[%s6603_s14 + $0x1b8] sm:$0xf]  ;;  %v288_v33 = vld [vmem:[%s6603_s14 + $0x1ac] sm:$0xf] }
  0x3e   :  { %287 = vst [vmem:[#allocation2 + $0x1b4] sm:$0xf] %v286_v32  ;;  %289 = vst [vmem:[#allocation2 + $0x1b8] sm:$0xf] %v288_v33  ;;  %v294_v35 = vld [vmem:[%s6603_s14 + $0x1d0] sm:$0xf] }
  0x3f   :  { %291 = vst [vmem:[#allocation2 + $0x1bc] sm:$0xff] %v290_v34   ;;  %v296_v36 = vld [vmem:[%s6603_s14 + $0x1c4] sm:$0xf]  ;;  %v298_v37 = vld [vmem:[%s6603_s14 + $0x1d4] sm:$0xf]  ;;  %v306_v41 = vld [vmem:[%s6603_s14 + $0x1dc] sm:$0xff]  }
  0x40   :  { %295 = vst [vmem:[#allocation2 + $0x1c4] sm:$0xf] %v294_v35  ;;  %297 = vst [vmem:[#allocation2 + $0x1c8] sm:$0xf] %v296_v36  ;;  %v300_v38 = vld [vmem:[%s6603_s14 + $0x1c8] sm:$0xf] }
  0x41   :  { %299 = vst [vmem:[#allocation2 + $0x1cc] sm:$0xf] %v298_v37  ;;  %v302_v39 = vld [vmem:[%s6603_s14 + $0x1d8] sm:$0xf]  ;;  %v304_v40 = vld [vmem:[%s6603_s14 + $0x1cc] sm:$0xf] }
  0x42   :  { %301 = vst [vmem:[#allocation2 + $0x1d0] sm:$0xf] %v300_v38  ;;  %303 = vst [vmem:[#allocation2 + $0x1d4] sm:$0xf] %v302_v39  ;;  %v310_v42 = vld [vmem:[%s6603_s14 + $0x1f0] sm:$0xf] }
  0x43   :  { %305 = vst [vmem:[#allocation2 + $0x1d8] sm:$0xf] %v304_v40  ;;  %v312_v43 = vld [vmem:[%s6603_s14 + $0x1e4] sm:$0xf]  ;;  %307 = vst [vmem:[#allocation2 + $0x1dc] sm:$0xff] %v306_v41  }
  0x44   :  { %311 = vst [vmem:[#allocation2 + $0x1e4] sm:$0xf] %v310_v42  ;;  %313 = vst [vmem:[#allocation2 + $0x1e8] sm:$0xf] %v312_v43  ;;  %v314_v44 = vld [vmem:[%s6603_s14 + $0x1f4] sm:$0xf] }
  0x45   :  { %v316_v45 = vld [vmem:[%s6603_s14 + $0x1e8] sm:$0xf]  ;;  %v318_v46 = vld [vmem:[%s6603_s14 + $0x1f8] sm:$0xf]  ;;  %315 = vst [vmem:[#allocation2 + $0x1ec] sm:$0xf] %v314_v44 }
  0x46   :  { %317 = vst [vmem:[#allocation2 + $0x1f0] sm:$0xf] %v316_v45  ;;  %319 = vst [vmem:[#allocation2 + $0x1f4] sm:$0xf] %v318_v46  ;;  %v320_v47 = vld [vmem:[%s6603_s14 + $0x1ec] sm:$0xf] }
  0x47   :  { %v322_v48 = vld [vmem:[%s6603_s14 + $0x1fc] sm:$0xf]  ;;  %321 = vst [vmem:[#allocation2 + $0x1f8] sm:$0xf] %v320_v47 }
  0x48   :  { %323 = vst [vmem:[#allocation2 + $0x1fc] sm:$0xf] %v322_v48 }
  0x49   :  { %610 = vsyncadd [#allocation5], 8192  ;;  %v629_v49 = vld [vmem:[%s6604_s15] sm:$0xf]  ;;  %v631_v50 = vld [vmem:[%s6604_s15 + $0x8] sm:$0xf] }
  0x4a   :  { %630 = vst [vmem:[#allocation3] sm:$0xf] %v629_v49  ;;  %632 = vst [vmem:[#allocation3 + $0x4] sm:$0xf] %v631_v50  ;;  %v633_v51 = vld [vmem:[%s6604_s15 + $0x4] sm:$0xf] }
  0x4b   :  { %v635_v52 = vld [vmem:[%s6604_s15 + $0xc] sm:$0xff]   ;;  %v639_v53 = vld [vmem:[%s6604_s15 + $0x18] sm:$0xf]  ;;  %634 = vst [vmem:[#allocation3 + $0x8] sm:$0xf] %v633_v51  ;;  %v643_v55 = vld [vmem:[%s6604_s15 + $0x1c] sm:$0xff]  }
  0x4c   :  { %636 = vst [vmem:[#allocation3 + $0xc] sm:$0xff] %v635_v52   ;;  %640 = vst [vmem:[#allocation3 + $0x14] sm:$0xf] %v639_v53  ;;  %v641_v54 = vld [vmem:[%s6604_s15 + $0x14] sm:$0xf]  ;;  %v651_v58 = vld [vmem:[%s6604_s15 + $0x2c] sm:$0xff]  }
  0x4d   :  { %v647_v56 = vld [vmem:[%s6604_s15 + $0x28] sm:$0xf]  ;;  %642 = vst [vmem:[#allocation3 + $0x18] sm:$0xf] %v641_v54  ;;  %644 = vst [vmem:[#allocation3 + $0x1c] sm:$0xff] %v643_v55   ;;  %v659_v61 = vld [vmem:[%s6604_s15 + $0x3c] sm:$0xff]  }
  0x4e   :  { %648 = vst [vmem:[#allocation3 + $0x24] sm:$0xf] %v647_v56  ;;  %v649_v57 = vld [vmem:[%s6604_s15 + $0x24] sm:$0xf]  ;;  %v655_v59 = vld [vmem:[%s6604_s15 + $0x38] sm:$0xf] }
  0x4f   :  { %650 = vst [vmem:[#allocation3 + $0x28] sm:$0xf] %v649_v57  ;;  %652 = vst [vmem:[#allocation3 + $0x2c] sm:$0xff] %v651_v58   ;;  %v657_v60 = vld [vmem:[%s6604_s15 + $0x34] sm:$0xf]  ;;  %v667_v0 = vld [vmem:[%s6604_s15 + $0x4c] sm:$0xff]  }
  0x50   :  { %656 = vst [vmem:[#allocation3 + $0x34] sm:$0xf] %v655_v59  ;;  %v663_v62 = vld [vmem:[%s6604_s15 + $0x48] sm:$0xf]  ;;  %658 = vst [vmem:[#allocation3 + $0x38] sm:$0xf] %v657_v60 }
  0x51   :  { %660 = vst [vmem:[#allocation3 + $0x3c] sm:$0xff] %v659_v61   ;;  %664 = vst [vmem:[#allocation3 + $0x44] sm:$0xf] %v663_v62  ;;  %v665_v63 = vld [vmem:[%s6604_s15 + $0x44] sm:$0xf]  ;;  %v675_v3 = vld [vmem:[%s6604_s15 + $0x5c] sm:$0xff]  }
  0x52   :  { %v671_v1 = vld [vmem:[%s6604_s15 + $0x58] sm:$0xf]  ;;  %666 = vst [vmem:[#allocation3 + $0x48] sm:$0xf] %v665_v63  ;;  %668 = vst [vmem:[#allocation3 + $0x4c] sm:$0xff] %v667_v0   ;;  %v683_v6 = vld [vmem:[%s6604_s15 + $0x6c] sm:$0xff]  }
  0x53   :  { %672 = vst [vmem:[#allocation3 + $0x54] sm:$0xf] %v671_v1  ;;  %v673_v2 = vld [vmem:[%s6604_s15 + $0x54] sm:$0xf]  ;;  %v679_v4 = vld [vmem:[%s6604_s15 + $0x68] sm:$0xf] }
  0x54   :  { %674 = vst [vmem:[#allocation3 + $0x58] sm:$0xf] %v673_v2  ;;  %676 = vst [vmem:[#allocation3 + $0x5c] sm:$0xff] %v675_v3   ;;  %v681_v5 = vld [vmem:[%s6604_s15 + $0x64] sm:$0xf]  ;;  %v691_v9 = vld [vmem:[%s6604_s15 + $0x7c] sm:$0xff]  }
  0x55   :  { %680 = vst [vmem:[#allocation3 + $0x64] sm:$0xf] %v679_v4  ;;  %v687_v7 = vld [vmem:[%s6604_s15 + $0x78] sm:$0xf]  ;;  %682 = vst [vmem:[#allocation3 + $0x68] sm:$0xf] %v681_v5 }
  0x56   :  { %684 = vst [vmem:[#allocation3 + $0x6c] sm:$0xff] %v683_v6   ;;  %688 = vst [vmem:[#allocation3 + $0x74] sm:$0xf] %v687_v7  ;;  %v689_v8 = vld [vmem:[%s6604_s15 + $0x74] sm:$0xf]  ;;  %v699_v12 = vld [vmem:[%s6604_s15 + $0x8c] sm:$0xff]  }
  0x57   :  { %v695_v10 = vld [vmem:[%s6604_s15 + $0x88] sm:$0xf]  ;;  %690 = vst [vmem:[#allocation3 + $0x78] sm:$0xf] %v689_v8  ;;  %692 = vst [vmem:[#allocation3 + $0x7c] sm:$0xff] %v691_v9   ;;  %v707_v15 = vld [vmem:[%s6604_s15 + $0x9c] sm:$0xff]  }
  0x58   :  { %696 = vst [vmem:[#allocation3 + $0x84] sm:$0xf] %v695_v10  ;;  %v697_v11 = vld [vmem:[%s6604_s15 + $0x84] sm:$0xf]  ;;  %v703_v13 = vld [vmem:[%s6604_s15 + $0x98] sm:$0xf] }
  0x59   :  { %698 = vst [vmem:[#allocation3 + $0x88] sm:$0xf] %v697_v11  ;;  %700 = vst [vmem:[#allocation3 + $0x8c] sm:$0xff] %v699_v12   ;;  %v705_v14 = vld [vmem:[%s6604_s15 + $0x94] sm:$0xf]  ;;  %v715_v18 = vld [vmem:[%s6604_s15 + $0xac] sm:$0xff]  }
  0x5a   :  { %704 = vst [vmem:[#allocation3 + $0x94] sm:$0xf] %v703_v13  ;;  %v711_v16 = vld [vmem:[%s6604_s15 + $0xa8] sm:$0xf]  ;;  %706 = vst [vmem:[#allocation3 + $0x98] sm:$0xf] %v705_v14 }
  0x5b   :  { %708 = vst [vmem:[#allocation3 + $0x9c] sm:$0xff] %v707_v15   ;;  %712 = vst [vmem:[#allocation3 + $0xa4] sm:$0xf] %v711_v16  ;;  %v713_v17 = vld [vmem:[%s6604_s15 + $0xa4] sm:$0xf]  ;;  %v723_v21 = vld [vmem:[%s6604_s15 + $0xbc] sm:$0xff]  }
  0x5c   :  { %v719_v19 = vld [vmem:[%s6604_s15 + $0xb8] sm:$0xf]  ;;  %714 = vst [vmem:[#allocation3 + $0xa8] sm:$0xf] %v713_v17  ;;  %716 = vst [vmem:[#allocation3 + $0xac] sm:$0xff] %v715_v18   ;;  %v731_v24 = vld [vmem:[%s6604_s15 + $0xcc] sm:$0xff]  }
  0x5d   :  { %720 = vst [vmem:[#allocation3 + $0xb4] sm:$0xf] %v719_v19  ;;  %v721_v20 = vld [vmem:[%s6604_s15 + $0xb4] sm:$0xf]  ;;  %v727_v22 = vld [vmem:[%s6604_s15 + $0xc8] sm:$0xf] }
  0x5e   :  { %722 = vst [vmem:[#allocation3 + $0xb8] sm:$0xf] %v721_v20  ;;  %724 = vst [vmem:[#allocation3 + $0xbc] sm:$0xff] %v723_v21   ;;  %v729_v23 = vld [vmem:[%s6604_s15 + $0xc4] sm:$0xf]  ;;  %v739_v27 = vld [vmem:[%s6604_s15 + $0xdc] sm:$0xff]  }
  0x5f   :  { %728 = vst [vmem:[#allocation3 + $0xc4] sm:$0xf] %v727_v22  ;;  %v735_v25 = vld [vmem:[%s6604_s15 + $0xd8] sm:$0xf]  ;;  %730 = vst [vmem:[#allocation3 + $0xc8] sm:$0xf] %v729_v23 }
  0x60   :  { %732 = vst [vmem:[#allocation3 + $0xcc] sm:$0xff] %v731_v24   ;;  %736 = vst [vmem:[#allocation3 + $0xd4] sm:$0xf] %v735_v25  ;;  %v737_v26 = vld [vmem:[%s6604_s15 + $0xd4] sm:$0xf]  ;;  %v747_v30 = vld [vmem:[%s6604_s15 + $0xec] sm:$0xff]  }
  0x61   :  { %v743_v28 = vld [vmem:[%s6604_s15 + $0xe8] sm:$0xf]  ;;  %738 = vst [vmem:[#allocation3 + $0xd8] sm:$0xf] %v737_v26  ;;  %740 = vst [vmem:[#allocation3 + $0xdc] sm:$0xff] %v739_v27   ;;  %v755_v33 = vld [vmem:[%s6604_s15 + $0xfc] sm:$0xff]  }
  0x62   :  { %744 = vst [vmem:[#allocation3 + $0xe4] sm:$0xf] %v743_v28  ;;  %v745_v29 = vld [vmem:[%s6604_s15 + $0xe4] sm:$0xf]  ;;  %v751_v31 = vld [vmem:[%s6604_s15 + $0xf8] sm:$0xf] }
  0x63   :  { %746 = vst [vmem:[#allocation3 + $0xe8] sm:$0xf] %v745_v29  ;;  %748 = vst [vmem:[#allocation3 + $0xec] sm:$0xff] %v747_v30   ;;  %v753_v32 = vld [vmem:[%s6604_s15 + $0xf4] sm:$0xf]  ;;  %v763_v36 = vld [vmem:[%s6604_s15 + $0x10c] sm:$0xff]  }
  0x64   :  { %752 = vst [vmem:[#allocation3 + $0xf4] sm:$0xf] %v751_v31  ;;  %v759_v34 = vld [vmem:[%s6604_s15 + $0x108] sm:$0xf]  ;;  %754 = vst [vmem:[#allocation3 + $0xf8] sm:$0xf] %v753_v32 }
  0x65   :  { %756 = vst [vmem:[#allocation3 + $0xfc] sm:$0xff] %v755_v33   ;;  %760 = vst [vmem:[#allocation3 + $0x104] sm:$0xf] %v759_v34  ;;  %v761_v35 = vld [vmem:[%s6604_s15 + $0x104] sm:$0xf]  ;;  %v771_v39 = vld [vmem:[%s6604_s15 + $0x11c] sm:$0xff]  }
  0x66   :  { %v767_v37 = vld [vmem:[%s6604_s15 + $0x118] sm:$0xf]  ;;  %762 = vst [vmem:[#allocation3 + $0x108] sm:$0xf] %v761_v35  ;;  %764 = vst [vmem:[#allocation3 + $0x10c] sm:$0xff] %v763_v36   ;;  %v779_v42 = vld [vmem:[%s6604_s15 + $0x12c] sm:$0xff]  }
  0x67   :  { %768 = vst [vmem:[#allocation3 + $0x114] sm:$0xf] %v767_v37  ;;  %v769_v38 = vld [vmem:[%s6604_s15 + $0x114] sm:$0xf]  ;;  %v775_v40 = vld [vmem:[%s6604_s15 + $0x128] sm:$0xf] }
  0x68   :  { %770 = vst [vmem:[#allocation3 + $0x118] sm:$0xf] %v769_v38  ;;  %772 = vst [vmem:[#allocation3 + $0x11c] sm:$0xff] %v771_v39   ;;  %v777_v41 = vld [vmem:[%s6604_s15 + $0x124] sm:$0xf]  ;;  %v787_v45 = vld [vmem:[%s6604_s15 + $0x13c] sm:$0xff]  }
  0x69   :  { %776 = vst [vmem:[#allocation3 + $0x124] sm:$0xf] %v775_v40  ;;  %v783_v43 = vld [vmem:[%s6604_s15 + $0x138] sm:$0xf]  ;;  %778 = vst [vmem:[#allocation3 + $0x128] sm:$0xf] %v777_v41 }
  0x6a   :  { %780 = vst [vmem:[#allocation3 + $0x12c] sm:$0xff] %v779_v42   ;;  %784 = vst [vmem:[#allocation3 + $0x134] sm:$0xf] %v783_v43  ;;  %v785_v44 = vld [vmem:[%s6604_s15 + $0x134] sm:$0xf]  ;;  %v795_v48 = vld [vmem:[%s6604_s15 + $0x14c] sm:$0xff]  }
  0x6b   :  { %v791_v46 = vld [vmem:[%s6604_s15 + $0x148] sm:$0xf]  ;;  %786 = vst [vmem:[#allocation3 + $0x138] sm:$0xf] %v785_v44  ;;  %788 = vst [vmem:[#allocation3 + $0x13c] sm:$0xff] %v787_v45   ;;  %v803_v51 = vld [vmem:[%s6604_s15 + $0x15c] sm:$0xff]  }
  0x6c   :  { %792 = vst [vmem:[#allocation3 + $0x144] sm:$0xf] %v791_v46  ;;  %v793_v47 = vld [vmem:[%s6604_s15 + $0x144] sm:$0xf]  ;;  %v799_v49 = vld [vmem:[%s6604_s15 + $0x158] sm:$0xf] }
  0x6d   :  { %794 = vst [vmem:[#allocation3 + $0x148] sm:$0xf] %v793_v47  ;;  %796 = vst [vmem:[#allocation3 + $0x14c] sm:$0xff] %v795_v48   ;;  %v801_v50 = vld [vmem:[%s6604_s15 + $0x154] sm:$0xf]  ;;  %v811_v54 = vld [vmem:[%s6604_s15 + $0x16c] sm:$0xff]  }
  0x6e   :  { %800 = vst [vmem:[#allocation3 + $0x154] sm:$0xf] %v799_v49  ;;  %v807_v52 = vld [vmem:[%s6604_s15 + $0x168] sm:$0xf]  ;;  %802 = vst [vmem:[#allocation3 + $0x158] sm:$0xf] %v801_v50 }
  0x6f   :  { %804 = vst [vmem:[#allocation3 + $0x15c] sm:$0xff] %v803_v51   ;;  %808 = vst [vmem:[#allocation3 + $0x164] sm:$0xf] %v807_v52  ;;  %v809_v53 = vld [vmem:[%s6604_s15 + $0x164] sm:$0xf]  ;;  %v819_v57 = vld [vmem:[%s6604_s15 + $0x17c] sm:$0xff]  }
  0x70   :  { %v815_v55 = vld [vmem:[%s6604_s15 + $0x178] sm:$0xf]  ;;  %810 = vst [vmem:[#allocation3 + $0x168] sm:$0xf] %v809_v53  ;;  %812 = vst [vmem:[#allocation3 + $0x16c] sm:$0xff] %v811_v54   ;;  %v827_v60 = vld [vmem:[%s6604_s15 + $0x18c] sm:$0xff]  }
  0x71   :  { %816 = vst [vmem:[#allocation3 + $0x174] sm:$0xf] %v815_v55  ;;  %v817_v56 = vld [vmem:[%s6604_s15 + $0x174] sm:$0xf]  ;;  %v823_v58 = vld [vmem:[%s6604_s15 + $0x188] sm:$0xf] }
  0x72   :  { %818 = vst [vmem:[#allocation3 + $0x178] sm:$0xf] %v817_v56  ;;  %820 = vst [vmem:[#allocation3 + $0x17c] sm:$0xff] %v819_v57   ;;  %v825_v59 = vld [vmem:[%s6604_s15 + $0x184] sm:$0xf]  ;;  %v835_v63 = vld [vmem:[%s6604_s15 + $0x19c] sm:$0xff]  }
  0x73   :  { %824 = vst [vmem:[#allocation3 + $0x184] sm:$0xf] %v823_v58  ;;  %v831_v61 = vld [vmem:[%s6604_s15 + $0x198] sm:$0xf]  ;;  %826 = vst [vmem:[#allocation3 + $0x188] sm:$0xf] %v825_v59 }
  0x74   :  { %828 = vst [vmem:[#allocation3 + $0x18c] sm:$0xff] %v827_v60   ;;  %832 = vst [vmem:[#allocation3 + $0x194] sm:$0xf] %v831_v61  ;;  %v833_v62 = vld [vmem:[%s6604_s15 + $0x194] sm:$0xf]  ;;  %v843_v2 = vld [vmem:[%s6604_s15 + $0x1ac] sm:$0xff]  }
  0x75   :  { %v839_v0 = vld [vmem:[%s6604_s15 + $0x1a8] sm:$0xf]  ;;  %834 = vst [vmem:[#allocation3 + $0x198] sm:$0xf] %v833_v62  ;;  %836 = vst [vmem:[#allocation3 + $0x19c] sm:$0xff] %v835_v63   ;;  %v851_v5 = vld [vmem:[%s6604_s15 + $0x1bc] sm:$0xff]  }
  0x76   :  { %840 = vst [vmem:[#allocation3 + $0x1a4] sm:$0xf] %v839_v0  ;;  %v841_v1 = vld [vmem:[%s6604_s15 + $0x1a4] sm:$0xf]  ;;  %v847_v3 = vld [vmem:[%s6604_s15 + $0x1b8] sm:$0xf] }
  0x77   :  { %842 = vst [vmem:[#allocation3 + $0x1a8] sm:$0xf] %v841_v1  ;;  %844 = vst [vmem:[#allocation3 + $0x1ac] sm:$0xff] %v843_v2   ;;  %v849_v4 = vld [vmem:[%s6604_s15 + $0x1b4] sm:$0xf]  ;;  %v859_v8 = vld [vmem:[%s6604_s15 + $0x1cc] sm:$0xff]  }
  0x78   :  { %848 = vst [vmem:[#allocation3 + $0x1b4] sm:$0xf] %v847_v3  ;;  %v855_v6 = vld [vmem:[%s6604_s15 + $0x1c8] sm:$0xf]  ;;  %850 = vst [vmem:[#allocation3 + $0x1b8] sm:$0xf] %v849_v4 }
  0x79   :  { %852 = vst [vmem:[#allocation3 + $0x1bc] sm:$0xff] %v851_v5   ;;  %856 = vst [vmem:[#allocation3 + $0x1c4] sm:$0xf] %v855_v6  ;;  %v857_v7 = vld [vmem:[%s6604_s15 + $0x1c4] sm:$0xf]  ;;  %v867_v11 = vld [vmem:[%s6604_s15 + $0x1dc] sm:$0xff]  }
  0x7a   :  { %v863_v9 = vld [vmem:[%s6604_s15 + $0x1d8] sm:$0xf]  ;;  %858 = vst [vmem:[#allocation3 + $0x1c8] sm:$0xf] %v857_v7  ;;  %860 = vst [vmem:[#allocation3 + $0x1cc] sm:$0xff] %v859_v8   ;;  %v875_v14 = vld [vmem:[%s6604_s15 + $0x1ec] sm:$0xff]  }
  0x7b   :  { %864 = vst [vmem:[#allocation3 + $0x1d4] sm:$0xf] %v863_v9  ;;  %v865_v10 = vld [vmem:[%s6604_s15 + $0x1d4] sm:$0xf]  ;;  %v871_v12 = vld [vmem:[%s6604_s15 + $0x1e8] sm:$0xf] }
  0x7c   :  { %866 = vst [vmem:[#allocation3 + $0x1d8] sm:$0xf] %v865_v10  ;;  %868 = vst [vmem:[#allocation3 + $0x1dc] sm:$0xff] %v867_v11   ;;  %v873_v13 = vld [vmem:[%s6604_s15 + $0x1e4] sm:$0xf] }
  0x7d   :  { %872 = vst [vmem:[#allocation3 + $0x1e4] sm:$0xf] %v871_v12  ;;  %v879_v15 = vld [vmem:[%s6604_s15 + $0x1f8] sm:$0xf]  ;;  %874 = vst [vmem:[#allocation3 + $0x1e8] sm:$0xf] %v873_v13 }
  0x7e   :  { %876 = vst [vmem:[#allocation3 + $0x1ec] sm:$0xff] %v875_v14   ;;  %880 = vst [vmem:[#allocation3 + $0x1f4] sm:$0xf] %v879_v15  ;;  %v881_v16 = vld [vmem:[%s6604_s15 + $0x1f4] sm:$0xf] }
  0x7f   :  { %v883_v17 = vld [vmem:[%s6604_s15 + $0x1fc] sm:$0xf]  ;;  %882 = vst [vmem:[#allocation3 + $0x1f8] sm:$0xf] %v881_v16 }
  0x80   :  { %884 = vst [vmem:[#allocation3 + $0x1fc] sm:$0xf] %v883_v17 }
  0x81   :  { %1171 = vsyncadd [#allocation5 + $0x1], 8192  ;;  %v5925_v18 = vld [vmem:[%s6605_s16] sm:$0xff]  ;;  %v5930_v19 = vld [vmem:[%s6605_s16 + $0x8] sm:$0xff]  ;;  %s6610_s27 = sld [smem:[#allocation13_spill]]  ;;  %s6611_s0 = sld [smem:[#allocation12_spill]] }
  0x82   :  { %v5935_v20 = vld [vmem:[%s6605_s16 + $0x10] sm:$0xff]  ;;  %v5940_v21 = vld [vmem:[%s6605_s16 + $0x18] sm:$0xff]  ;;  %v5945_v22 = vld [vmem:[%s6605_s16 + $0x20] sm:$0xff]  ;;  %vm1264_vm0 = vcmask 64512  }
  0x83   :  { %v5950_v23 = vld [vmem:[%s6605_s16 + $0x28] sm:$0xff]  ;;  %v5955_v24 = vld [vmem:[%s6605_s16 + $0x30] sm:$0xff]  ;;  %v5960_v25 = vld [vmem:[%s6605_s16 + $0x38] sm:$0xff] }
  0x84   :  { %v5965_v26 = vld [vmem:[%s6605_s16 + $0x40] sm:$0xff]  ;;  %v5970_v27 = vld [vmem:[%s6605_s16 + $0x48] sm:$0xff]  ;;  %v5975_v28 = vld [vmem:[%s6605_s16 + $0x50] sm:$0xff] }
  0x85   :  { %v5980_v29 = vld [vmem:[%s6605_s16 + $0x58] sm:$0xff]  ;;  %v5985_v30 = vld [vmem:[%s6605_s16 + $0x60] sm:$0xff]  ;;  %v5990_v31 = vld [vmem:[%s6605_s16 + $0x68] sm:$0xff] }
  0x86   :  { %v5995_v32 = vld [vmem:[%s6605_s16 + $0x70] sm:$0xff]  ;;  %v6000_v33 = vld [vmem:[%s6605_s16 + $0x78] sm:$0xff]  ;;  %v1394_v37 = vld [vmem:[%s6591_s2] sm:$0xff] }
  0x87   :  { %v1248_v34 = vld [vmem:[%s6610_s27] sm:$0xff]  ;;  %v1255_v36 = vld [vmem:[%s6611_s0 + $0x28] sm:$0xff] }
  0x88   :  { %v1254_v35 = vld [vmem:[%s6611_s0 + $0x20] sm:$0xff]  ;;  %5014 = vmatprep.subr.mxu1 %v1248_v34  ;;  %v1395_v38 = vld [vmem:[%s6591_s2 + $0x8] sm:$0xff] }
  0x89   :  { %4510 = vmatprep.mubr.msk.f32.mxu1 %vm1264_vm0, %v1254_v35 }
  0x8a   :  { %1244 = vsyncadd [#allocation5 + $0x2], 2048  ;;  %5015 = vmatpush3.msra.mxu1 %v1248_v34  ;;  %v6018_v39 = vpack.c.bf16 %v1395_v38, %v1394_v37  ;;  %4502 = vmatprep.subr.mxu0 %v1248_v34  ;;  %v1256_v40 = vld [vmem:[%s6611_s0 + $0x30] sm:$0xff]  ;;  %v1250_v41 = vld [vmem:[%s6611_s0] sm:$0xff]  ;;  %v5196_v42 = vmov 0.0|0.0   ;;  %vm5197_vm1 = vmmov 0   ;;  %v1245_v63 = vlaneseq }
  0x8b   :  { %4511 = vmatmul.mubr.msk.f32.vlgmr.msra.gmra.mrb[0].mxu1 %vm1264_vm0, %v1255_v36  ;;  %4834 = vmatprep.subr.bf16.mxu1 %v5196_v42  ;;  %v1251_v43 = vld [vmem:[%s6611_s0 + $0x8] sm:$0xff]  ;;  %v1396_v44 = vld [vmem:[%s6591_s2 + $0x10] sm:$0xff]  ;;  %v1397_v45 = vld [vmem:[%s6591_s2 + $0x18] sm:$0xff]  ;;  %v5198_v48 = vmov 0.0   ;;  %vm1403_vm3 = vcmask 261120   ;;  %vm3604_vm4 = vcmask 523264  }
  0x8c   :  { %4836 = vmatpush3.bf16.msra.mxu1 %v6018_v39  ;;  %4513 = vmatprep.mubr.msk.f32.mxu1 %vm1264_vm0, %v1256_v40  ;;  %v1257_v46 = vld [vmem:[%s6611_s0 + $0x38] sm:$0xff]  ;;  %v6042_v47 = vpack.c.bf16 %v1397_v45, %v1396_v44  ;;  %v6069_v52 = vld [vmem:[%s6592_s3] ss:$0 sm:$0xff]  ;;  %v6077_v0 = vand.u32 127, %v1245_v63  ;;  %s5199_s3 = smov 32   ;;  %v1399_v10 = vld [vmem:[%s6593_s4 + $0x8] sm:$0xff] }
  0x8d   :  { %4503 = vmatpush3.msra.mxu0 %v1248_v34  ;;  %4504 = vmatprep.mubr.msk.f32.mxu0 %vm1264_vm0, %v1250_v41  ;;  %v1398_v9 = vld [vmem:[%s6593_s4] sm:$0xff]  ;;  %v1252_v11 = vld [vmem:[%s6611_s0 + $0x10] sm:$0xff]  ;;  %v1253_v13 = vld [vmem:[%s6611_s0 + $0x18] sm:$0xff]  ;;  %vm3606_vm5 = vcmask 785408  }
  0x8e   :  { %4837 = vmatprep.subr.bf16.mxu1 %v5196_v42  ;;  %4505 = vmatmul.mubr.msk.f32.vlgmr.msra.gmra.mrb[0].mxu0 %vm1264_vm0, %v1251_v43  ;;  %vm1247_vm2 = vcmp.lt.s32.totalorder %v6077_v0, 96  ;;  %v6093_v12 = vpack.c.bf16 %v1399_v10, %v1398_v9  ;;  %v1400_v14 = vld [vmem:[%s6593_s4 + $0x10] sm:$0xff]  ;;  %v1401_v15 = vld [vmem:[%s6593_s4 + $0x18] sm:$0xff]  ;;  %s5200_s4 = smov 64  }
  0x8f   :  { %4514 = vmatmul.mubr.msk.f32.gmra.mrb[2].mxu1 %vm1264_vm0, %v1257_v46  ;;  %4846 = vmatprep.subr.bf16.mxu0 %v5196_v42  ;;  %v6107_v16 = vpack.c.bf16 %v1401_v15, %v1400_v14 }
  0x90   :  { %4839 = vmatpush3.bf16.msra.mxu1 %v6042_v47  ;;  %4524 = vmatprep.mubr.msk.f32.mxu1 %vm5197_vm1, %v5198_v48 }
  0x91   :  { %4840 = vmatprep.subr.bf16.mxu1 %v5196_v42  ;;  %4848 = vmatpush3.bf16.msra.mxu0 %v6018_v39 }
  0x92   :  { %4849 = vmatprep.subr.bf16.mxu0 %v5196_v42  ;;  %4507 = vmatprep.mubr.msk.f32.mxu0 %vm1264_vm0, %v1252_v11 }
  0x93   :  { %4525 = vmatmul.mubr.f32.vlgmr.msra.gmra.mrb[4].mxu1 %v5198_v48  ;;  %4508 = vmatmul.mubr.msk.f32.gmra.mrb[2].mxu0 %vm1264_vm0, %v1253_v13 }
  0x94   :  { %4535 = vmatprep.mubr.msk.f32.mxu1 %vm5197_vm1, %v5198_v48  ;;  %4842 = vmatpush3.bf16.msra.mxu1 %v6093_v12 }
  0x95   :  { %4851 = vmatpush3.bf16.msra.mxu0 %v6042_v47  ;;  %4546 = vmatprep.mubr.msk.f32.mxu0 %vm5197_vm1, %v5198_v48 }
  0x96   :  { %4858 = vmatprep.subr.bf16.mxu0 %v5196_v42  ;;  %4843 = vmatprep.subr.bf16.mxu1 %v5196_v42 }
  0x98   :  { %4845 = vmatpush3.bf16.msra.mxu1 %v6107_v16 }
  0x99   :  { %4852 = vmatprep.subr.bf16.mxu1 %v5196_v42 }
 0x15e   :  { %v6060_v49 = vpop.f32.mrb[0].mxu1 }
 0x15f   :  { %v6062_v50 = vpop.f32.mrb[1].mxu1 }
 0x161   :  { %v6064_v51 = vpop.f32.mrb[0].mxu0 }
 0x162   :  { %v6071_v53 = vpop.f32.mrb[2].mxu1  ;;  %v1355_v54 = vpop.f32.mrb[1].mxu0  ;;  %v1361_v40 = vadd.f32 %v6064_v51, %v6069_v52 }
 0x163   :  { %v6073_v55 = vpop.f32.mrb[3].mxu1  ;;  %v1356_v56 = vadd.f32 %v6069_v52, %v1355_v54 }
 0x166   :  { %v1473_v57 = vpop.f32.mrb[4].mxu1  ;;  %v6116_v36 = vpop.f32.mrb[2].mxu0 }
 0x167   :  { %v1477_v58 = vadd.f32 %v1473_v57, %v1356_v56  ;;  %v4526_v59 = vpop.f32.mrb[5].mxu1  ;;  %v1365_v37 = vpop.f32.mrb[3].mxu0 }
 0x169   :  { %v4279_v60 = vmul.f32 -1.442695, %v1477_v58 }
 0x16b   :  { %5062 = vpow2.f32 %v4279_v60 }
 0x16c   :  { %5064 = vtanh.f32 %v1477_v58 }
 0x175   :  { %v5063_v61 = vpop.eup %5062 }
 0x176   :  { %v1481_v62 = vadd.f32 1.0, %v5063_v61  ;;  %v5065_v1 = vpop.eup %5064 }
 0x178   :  { %5066 = vrcp.f32 %v1481_v62 }
 0x182   :  { %v5067_v2 = vpop.eup %5066 }
 0x183   :  { %v1485_v3 = vsel %vm1247_vm2, %v5067_v2, %v5065_v1 }
 0x184   :  { %1488 = vrot.lane.b32.xlu0 %v1485_v3, %s5199_s3  ;;  %v1486_v6 = vmul.f32 0.0, %v1485_v3 }
 0x1f6   :  { %v1489_v4 = vpop.permute.xlu0 %1488 }
 0x1f7   :  { %v1491_v5 = vmul.f32 %v1489_v4, %v1485_v3 }
 0x1f9   :  { %1493 = vrot.lane.b32.xlu0 %v1491_v5, %s5199_s3  ;;  %v1366_v5 = vadd.f32 %v6069_v52, %v1365_v37 }
 0x26b   :  { %v1494_v7 = vpop.permute.xlu0 %1493 }
 0x26c   :  { %v1496_v8 = vadd.f32 %v1494_v7, %v1486_v6 }
 0x26e   :  { %5068 = vtanh.f32 %v1496_v8 }
 0x278   :  { %v5069_v17 = vpop.eup %5068 }
 0x279   :  { %1499 = vrot.lane.b32.xlu1 %v5069_v17, %s5199_s3 }
 0x2eb   :  { %v1500_v34 = vpop.permute.xlu1 %1499 }
 0x2ec   :  { %v1502_v35 = vmul.f32 %v1500_v34, %v1485_v3 }
 0x2ee   :  { %1510 = vrot.lane.b32.xlu1 %v1502_v35, %s5200_s4 }
 0x360   :  { %v1511_v38 = vpop.permute.xlu1 %1510 }
 0x361   :  { %4536 = vmatmul.mubr.msk.f32.vlgmr.msra.gmra.mrb[6].mxu1 %vm1403_vm3, %v1511_v38  ;;  %4547 = vmatmul.mubr.msk.f32.vlgmr.msra.gmra.mrb[4].mxu0 %vm1403_vm3, %v1511_v38 }
 0x362   :  { %4854 = vmatpush3.bf16.msra.mxu1 %v6093_v12  ;;  %4860 = vmatpush3.bf16.msra.mxu0 %v6018_v39 }
 0x363   :  { %4855 = vmatprep.subr.bf16.mxu1 %v5196_v42  ;;  %4861 = vmatprep.subr.bf16.mxu0 %v5196_v42 }
 0x364   :  { %4568 = vmatprep.mubr.msk.f32.mxu0 %vm5197_vm1, %v5198_v48  ;;  %4557 = vmatprep.mubr.msk.f32.mxu1 %vm5197_vm1, %v5198_v48 }
 0x366   :  { %4857 = vmatpush3.bf16.msra.mxu1 %v6107_v16  ;;  %4863 = vmatpush3.bf16.msra.mxu0 %v6042_v47 }
 0x367   :  { %4864 = vmatprep.subr.bf16.mxu1 %v5196_v42  ;;  %4870 = vmatprep.subr.bf16.mxu0 %v5196_v42 }
 0x434   :  { %v1650_v41 = vpop.f32.mrb[4].mxu0 }
 0x435   :  { %v1654_v43 = vadd.f32 %v1650_v41, %v1361_v40  ;;  %v4548_v44 = vpop.f32.mrb[5].mxu0 }
 0x437   :  { %v4283_v45 = vmul.f32 -1.442695, %v1654_v43 }
 0x439   :  { %5070 = vpow2.f32 %v4283_v45  ;;  %v1371_v45 = vadd.f32 %v6116_v36, %v6069_v52 }
 0x43a   :  { %5072 = vtanh.f32 %v1654_v43 }
 0x443   :  { %v5071_v46 = vpop.eup %5070 }
 0x444   :  { %v1658_v54 = vadd.f32 1.0, %v5071_v46  ;;  %v5073_v56 = vpop.eup %5072 }
 0x446   :  { %5074 = vrcp.f32 %v1658_v54 }
 0x450   :  { %v5075_v57 = vpop.eup %5074 }
 0x451   :  { %v1662_v58 = vsel %vm1247_vm2, %v5075_v57, %v5073_v56 }
 0x452   :  { %1665 = vrot.lane.b32.xlu0 %v1662_v58, %s5199_s3  ;;  %v1663_v51 = vmul.f32 %v1662_v58, %v1496_v8 }
 0x4c4   :  { %v1666_v59 = vpop.permute.xlu0 %1665 }
 0x4c5   :  { %v1668_v60 = vmul.f32 %v1666_v59, %v1662_v58 }
 0x4c7   :  { %1670 = vrot.lane.b32.xlu1 %v1668_v60, %s5199_s3 }
 0x539   :  { %v1671_v61 = vpop.permute.xlu1 %1670 }
 0x53a   :  { %v1673_v62 = vadd.f32 %v1671_v61, %v1663_v51 }
 0x53c   :  { %5076 = vtanh.f32 %v1673_v62 }
 0x546   :  { %v5077_v1 = vpop.eup %5076 }
 0x547   :  { %1676 = vrot.lane.b32.xlu0 %v5077_v1, %s5199_s3 }
 0x5b9   :  { %v1677_v2 = vpop.permute.xlu0 %1676 }
 0x5ba   :  { %v1679_v3 = vmul.f32 %v1677_v2, %v1662_v58 }
 0x5bc   :  { %1681 = vrot.lane.b32.xlu1 %v1679_v3, %s5200_s4 }
 0x62e   :  { %v1682_v4 = vpop.permute.xlu1 %1681 }
 0x62f   :  { %4558 = vmatmul.mubr.msk.f32.vlgmr.msra.gmra.mrb[8].mxu1 %vm1403_vm3, %v1682_v4  ;;  %4569 = vmatmul.mubr.msk.f32.vlgmr.msra.gmra.mrb[6].mxu0 %vm1403_vm3, %v1682_v4 }
 0x630   :  { %4866 = vmatpush3.bf16.msra.mxu1 %v6093_v12  ;;  %4872 = vmatpush3.bf16.msra.mxu0 %v6018_v39 }
 0x631   :  { %4867 = vmatprep.subr.bf16.mxu1 %v5196_v42  ;;  %4873 = vmatprep.subr.bf16.mxu0 %v5196_v42 }
 0x632   :  { %4590 = vmatprep.mubr.msk.f32.mxu0 %vm5197_vm1, %v5198_v48  ;;  %4579 = vmatprep.mubr.msk.f32.mxu1 %vm5197_vm1, %v5198_v48 }
 0x634   :  { %4869 = vmatpush3.bf16.msra.mxu1 %v6107_v16  ;;  %4875 = vmatpush3.bf16.msra.mxu0 %v6042_v47 }
 0x635   :  { %4876 = vmatprep.subr.bf16.mxu1 %v5196_v42  ;;  %4882 = vmatprep.subr.bf16.mxu0 %v5196_v42 }
 0x702   :  { %v1821_v6 = vpop.f32.mrb[6].mxu0 }
 0x703   :  { %v1825_v7 = vadd.f32 %v1821_v6, %v1366_v5  ;;  %v4570_v8 = vpop.f32.mrb[7].mxu0 }
 0x704   :  { %v1376_v8 = vadd.f32 %v6069_v52, %v6062_v50 }
 0x705   :  { %v4286_v9 = vmul.f32 -1.442695, %v1825_v7 }
 0x707   :  { %5078 = vpow2.f32 %v4286_v9 }
 0x708   :  { %5080 = vtanh.f32 %v1825_v7 }
 0x711   :  { %v5079_v10 = vpop.eup %5078 }
 0x712   :  { %v1829_v11 = vadd.f32 1.0, %v5079_v10  ;;  %v5081_v13 = vpop.eup %5080 }
 0x714   :  { %5082 = vrcp.f32 %v1829_v11 }
 0x71e   :  { %v5083_v14 = vpop.eup %5082 }
 0x71f   :  { %v1833_v15 = vsel %vm1247_vm2, %v5083_v14, %v5081_v13 }
 0x720   :  { %1836 = vrot.lane.b32.xlu0 %v1833_v15, %s5199_s3  ;;  %v1834_v35 = vmul.f32 %v1833_v15, %v1673_v62 }
 0x792   :  { %v1837_v17 = vpop.permute.xlu0 %1836 }
 0x793   :  { %v1839_v34 = vmul.f32 %v1837_v17, %v1833_v15 }
 0x795   :  { %1841 = vrot.lane.b32.xlu1 %v1839_v34, %s5199_s3 }
 0x807   :  { %v1842_v37 = vpop.permute.xlu1 %1841 }
 0x808   :  { %v1844_v38 = vadd.f32 %v1842_v37, %v1834_v35 }
 0x80a   :  { %5084 = vtanh.f32 %v1844_v38 }
 0x814   :  { %v5085_v40 = vpop.eup %5084 }
 0x815   :  { %1847 = vrot.lane.b32.xlu0 %v5085_v40, %s5199_s3 }
 0x887   :  { %v1848_v41 = vpop.permute.xlu0 %1847 }
 0x888   :  { %v1850_v43 = vmul.f32 %v1848_v41, %v1833_v15 }
 0x88a   :  { %1852 = vrot.lane.b32.xlu1 %v1850_v43, %s5200_s4 }
 0x8fc   :  { %v1853_v44 = vpop.permute.xlu1 %1852 }
 0x8fd   :  { %4580 = vmatmul.mubr.msk.f32.vlgmr.msra.gmra.mrb[10].mxu1 %vm1403_vm3, %v1853_v44  ;;  %4591 = vmatmul.mubr.msk.f32.vlgmr.msra.gmra.mrb[8].mxu0 %vm1403_vm3, %v1853_v44 }
 0x8fe   :  { %4878 = vmatpush3.bf16.msra.mxu1 %v6093_v12  ;;  %4884 = vmatpush3.bf16.msra.mxu0 %v6018_v39 }
 0x8ff   :  { %4879 = vmatprep.subr.bf16.mxu1 %v5196_v42  ;;  %4885 = vmatprep.subr.bf16.mxu0 %v5196_v42 }
 0x900   :  { %4612 = vmatprep.mubr.msk.f32.mxu0 %vm5197_vm1, %v5198_v48  ;;  %4601 = vmatprep.mubr.msk.f32.mxu1 %vm5197_vm1, %v5198_v48 }
 0x902   :  { %4881 = vmatpush3.bf16.msra.mxu1 %v6107_v16  ;;  %4887 = vmatpush3.bf16.msra.mxu0 %v6042_v47 }
 0x903   :  { %4888 = vmatprep.subr.bf16.mxu1 %v5196_v42  ;;  %4894 = vmatprep.subr.bf16.mxu0 %v5196_v42 }
 0x9d0   :  { %v1992_v46 = vpop.f32.mrb[8].mxu0 }
 0x9d1   :  { %v1996_v54 = vadd.f32 %v1992_v46, %v1371_v45  ;;  %v4592_v56 = vpop.f32.mrb[9].mxu0 }
 0x9d3   :  { %v4289_v57 = vmul.f32 -1.442695, %v1996_v54 }
 0x9d5   :  { %5086 = vpow2.f32 %v4289_v57 }
 0x9d6   :  { %5088 = vtanh.f32 %v1996_v54  ;;  %v1381_v54 = vadd.f32 %v6060_v49, %v6069_v52 }
 0x9df   :  { %v5087_v58 = vpop.eup %5086 }
 0x9e0   :  { %v2000_v59 = vadd.f32 1.0, %v5087_v58  ;;  %v5089_v60 = vpop.eup %5088 }
 0x9e2   :  { %5090 = vrcp.f32 %v2000_v59 }
 0x9ec   :  { %v5091_v51 = vpop.eup %5090 }
 0x9ed   :  { %v2004_v61 = vsel %vm1247_vm2, %v5091_v51, %v5089_v60 }
 0x9ee   :  { %2007 = vrot.lane.b32.xlu0 %v2004_v61, %s5199_s3  ;;  %v2005_v36 = vmul.f32 %v2004_v61, %v1844_v38 }
 0xa60   :  { %v2008_v62 = vpop.permute.xlu0 %2007 }
 0xa61   :  { %v2010_v1 = vmul.f32 %v2008_v62, %v2004_v61 }
 0xa63   :  { %2012 = vrot.lane.b32.xlu1 %v2010_v1, %s5199_s3 }
 0xad5   :  { %v2013_v2 = vpop.permute.xlu1 %2012 }
 0xad6   :  { %v2015_v3 = vadd.f32 %v2013_v2, %v2005_v36 }
 0xad8   :  { %5092 = vtanh.f32 %v2015_v3 }
 0xae2   :  { %v5093_v4 = vpop.eup %5092 }
 0xae3   :  { %2018 = vrot.lane.b32.xlu0 %v5093_v4, %s5199_s3 }
 0xb55   :  { %v2019_v5 = vpop.permute.xlu0 %2018 }
 0xb56   :  { %v2021_v6 = vmul.f32 %v2019_v5, %v2004_v61 }
 0xb58   :  { %2023 = vrot.lane.b32.xlu1 %v2021_v6, %s5200_s4 }
 0xbca   :  { %v2024_v7 = vpop.permute.xlu1 %2023 }
 0xbcb   :  { %4602 = vmatmul.mubr.msk.f32.vlgmr.msra.gmra.mrb[12].mxu1 %vm1403_vm3, %v2024_v7  ;;  %4613 = vmatmul.mubr.msk.f32.vlgmr.msra.gmra.mrb[10].mxu0 %vm1403_vm3, %v2024_v7 }
 0xbcc   :  { %4890 = vmatpush3.bf16.msra.mxu1 %v6093_v12  ;;  %4896 = vmatpush3.bf16.msra.mxu0 %v6018_v39 }
 0xbcd   :  { %4891 = vmatprep.subr.bf16.mxu1 %v5196_v42  ;;  %4897 = vmatprep.subr.bf16.mxu0 %v5196_v42 }
 0xbce   :  { %4634 = vmatprep.mubr.msk.f32.mxu0 %vm5197_vm1, %v5198_v48  ;;  %4623 = vmatprep.mubr.msk.f32.mxu1 %vm5197_vm1, %v5198_v48 }
 0xbd0   :  { %4893 = vmatpush3.bf16.msra.mxu1 %v6107_v16  ;;  %4899 = vmatpush3.bf16.msra.mxu0 %v6042_v47 }
 0xbd1   :  { %4900 = vmatprep.subr.bf16.mxu1 %v5196_v42  ;;  %4906 = vmatprep.subr.bf16.mxu0 %v5196_v42 }
 0xc9e   :  { %v2163_v9 = vpop.f32.mrb[10].mxu0 }
 0xc9f   :  { %v2167_v10 = vadd.f32 %v2163_v9, %v1376_v8  ;;  %v4614_v11 = vpop.f32.mrb[11].mxu0  ;;  %v1386_v9 = vadd.f32 %v6069_v52, %v6073_v55 }
 0xca1   :  { %v4292_v13 = vmul.f32 -1.442695, %v2167_v10 }
 0xca3   :  { %5094 = vpow2.f32 %v4292_v13 }
 0xca4   :  { %5096 = vtanh.f32 %v2167_v10 }
 0xcad   :  { %v5095_v14 = vpop.eup %5094 }
 0xcae   :  { %v2171_v15 = vadd.f32 1.0, %v5095_v14  ;;  %v5097_v17 = vpop.eup %5096 }
 0xcb0   :  { %5098 = vrcp.f32 %v2171_v15 }
 0xcba   :  { %v5099_v34 = vpop.eup %5098 }
 0xcbb   :  { %v2175_v35 = vsel %vm1247_vm2, %v5099_v34, %v5097_v17 }
 0xcbc   :  { %2178 = vrot.lane.b32.xlu0 %v2175_v35, %s5199_s3  ;;  %v2176_v50 = vmul.f32 %v2175_v35, %v2015_v3 }
 0xd2e   :  { %v2179_v37 = vpop.permute.xlu0 %2178 }
 0xd2f   :  { %v2181_v38 = vmul.f32 %v2179_v37, %v2175_v35 }
 0xd31   :  { %2183 = vrot.lane.b32.xlu1 %v2181_v38, %s5199_s3 }
 0xda3   :  { %v2184_v40 = vpop.permute.xlu1 %2183 }
 0xda4   :  { %v2186_v41 = vadd.f32 %v2184_v40, %v2176_v50 }
 0xda6   :  { %5100 = vtanh.f32 %v2186_v41 }
 0xdb0   :  { %v5101_v43 = vpop.eup %5100 }
 0xdb1   :  { %2189 = vrot.lane.b32.xlu0 %v5101_v43, %s5199_s3 }
 0xe23   :  { %v2190_v44 = vpop.permute.xlu0 %2189 }
 0xe24   :  { %v2192_v45 = vmul.f32 %v2190_v44, %v2175_v35 }
 0xe26   :  { %2194 = vrot.lane.b32.xlu1 %v2192_v45, %s5200_s4  ;;  %v1391_v45 = vadd.f32 %v6071_v53, %v6069_v52 }
 0xe98   :  { %v2195_v46 = vpop.permute.xlu1 %2194 }
 0xe99   :  { %4624 = vmatmul.mubr.msk.f32.vlgmr.msra.gmra.mrb[14].mxu1 %vm1403_vm3, %v2195_v46  ;;  %4635 = vmatmul.mubr.msk.f32.vlgmr.msra.gmra.mrb[12].mxu0 %vm1403_vm3, %v2195_v46 }
 0xe9a   :  { %4902 = vmatpush3.bf16.msra.mxu1 %v6093_v12  ;;  %4908 = vmatpush3.bf16.msra.mxu0 %v6018_v39 }
 0xe9b   :  { %4903 = vmatprep.subr.bf16.mxu1 %v5196_v42  ;;  %4909 = vmatprep.subr.bf16.mxu0 %v5196_v42 }
 0xe9c   :  { %4656 = vmatprep.mubr.msk.f32.mxu0 %vm5197_vm1, %v5198_v48  ;;  %4645 = vmatprep.mubr.msk.f32.mxu1 %vm5197_vm1, %v5198_v48 }
 0xe9e   :  { %4905 = vmatpush3.bf16.msra.mxu1 %v6107_v16  ;;  %4911 = vmatpush3.bf16.msra.mxu0 %v6042_v47 }
 0xe9f   :  { %4912 = vmatprep.subr.bf16.mxu1 %v5196_v42  ;;  %4918 = vmatprep.subr.bf16.mxu0 %v5196_v42 }
 0xf6c   :  { %v2334_v56 = vpop.f32.mrb[12].mxu0 }
 0xf6d   :  { %v2338_v57 = vadd.f32 %v2334_v56, %v1381_v54  ;;  %v4636_v58 = vpop.f32.mrb[13].mxu0 }
 0xf6f   :  { %v4295_v59 = vmul.f32 -1.442695, %v2338_v57 }
 0xf71   :  { %5102 = vpow2.f32 %v4295_v59 }
 0xf72   :  { %5104 = vtanh.f32 %v2338_v57 }
 0xf7b   :  { %v5103_v60 = vpop.eup %5102 }
 0xf7c   :  { %v2342_v51 = vadd.f32 1.0, %v5103_v60  ;;  %v5105_v61 = vpop.eup %5104 }
 0xf7e   :  { %5106 = vrcp.f32 %v2342_v51 }
 0xf88   :  { %v5107_v62 = vpop.eup %5106 }
 0xf89   :  { %v2346_v1 = vsel %vm1247_vm2, %v5107_v62, %v5105_v61 }
 0xf8a   :  { %2349 = vrot.lane.b32.xlu0 %v2346_v1, %s5199_s3  ;;  %v2347_v49 = vmul.f32 %v2346_v1, %v2186_v41 }
 0xffc   :  { %v2350_v36 = vpop.permute.xlu0 %2349 }
 0xffd   :  { %v2352_v2 = vmul.f32 %v2350_v36, %v2346_v1 }
 0xfff   :  { %2354 = vrot.lane.b32.xlu1 %v2352_v2, %s5199_s3 }
0x1071   :  { %v2355_v3 = vpop.permute.xlu1 %2354 }
0x1072   :  { %v2357_v4 = vadd.f32 %v2355_v3, %v2347_v49  ;;  %v2781_v49 = vld [vmem:[%s6594_s5] sm:$0xff]  ;;  %v2782_v3 = vld [vmem:[%s6594_s5 + $0x8] sm:$0xff] }
0x1074   :  { %5108 = vtanh.f32 %v2357_v4 }
0x107e   :  { %v5109_v5 = vpop.eup %5108 }
0x107f   :  { %2360 = vrot.lane.b32.xlu0 %v5109_v5, %s5199_s3  ;;  %v2783_v5 = vld [vmem:[%s6594_s5 + $0x10] sm:$0xff] }
0x10f1   :  { %v2361_v6 = vpop.permute.xlu0 %2360 }
0x10f2   :  { %v2363_v7 = vmul.f32 %v2361_v6, %v2346_v1  ;;  %v2784_v6 = vld [vmem:[%s6594_s5 + $0x18] sm:$0xff] }
0x10f4   :  { %2365 = vrot.lane.b32.xlu1 %v2363_v7, %s5200_s4 }
0x1166   :  { %v2366_v8 = vpop.permute.xlu1 %2365 }
0x1167   :  { %4646 = vmatmul.mubr.msk.f32.vlgmr.msra.gmra.mrb[16].mxu1 %vm1403_vm3, %v2366_v8  ;;  %4657 = vmatmul.mubr.msk.f32.vlgmr.msra.gmra.mrb[14].mxu0 %vm1403_vm3, %v2366_v8  ;;  %v6280_v8 = vpack.c.bf16 %v2784_v6, %v2783_v5 }
0x1168   :  { %4914 = vmatpush3.bf16.msra.mxu1 %v6093_v12  ;;  %4920 = vmatpush3.bf16.msra.mxu0 %v6018_v39 }
0x1169   :  { %4915 = vmatprep.subr.bf16.mxu1 %v5196_v42  ;;  %4921 = vmatprep.subr.bf16.mxu0 %v5196_v42 }
0x116a   :  { %4678 = vmatprep.mubr.msk.f32.mxu0 %vm5197_vm1, %v5198_v48  ;;  %4667 = vmatprep.mubr.msk.f32.mxu1 %vm5197_vm1, %v5198_v48 }
0x116c   :  { %4917 = vmatpush3.bf16.msra.mxu1 %v6107_v16  ;;  %4923 = vmatpush3.bf16.msra.mxu0 %v6042_v47 }
0x116d   :  { %4924 = vmatprep.subr.bf16.mxu1 %v5196_v42 }
0x123a   :  { %v2505_v39 = vpop.f32.mrb[14].mxu0 }
0x123b   :  { %v2509_v10 = vadd.f32 %v2505_v39, %v1386_v9  ;;  %v4658_v11 = vpop.f32.mrb[15].mxu0  ;;  %v6297_v9 = vld [vmem:[%s6595_s6] ss:$0 sm:$0xff]  ;;  %s5201_s6 = smov 96  }
0x123d   :  { %v4298_v13 = vmul.f32 -1.442695, %v2509_v10 }
0x123f   :  { %5110 = vpow2.f32 %v4298_v13 }
0x1240   :  { %5112 = vtanh.f32 %v2509_v10 }
0x1249   :  { %v5111_v14 = vpop.eup %5110 }
0x124a   :  { %v2513_v15 = vadd.f32 1.0, %v5111_v14  ;;  %v5113_v17 = vpop.eup %5112 }
0x124c   :  { %5114 = vrcp.f32 %v2513_v15 }
0x1256   :  { %v5115_v34 = vpop.eup %5114 }
0x1257   :  { %v2517_v35 = vsel %vm1247_vm2, %v5115_v34, %v5113_v17 }
0x1258   :  { %2520 = vrot.lane.b32.xlu0 %v2517_v35, %s5199_s3  ;;  %v2518_v55 = vmul.f32 %v2517_v35, %v2357_v4  ;;  %v6270_v4 = vpack.c.bf16 %v2782_v3, %v2781_v49 }
0x12ca   :  { %v2521_v47 = vpop.permute.xlu0 %2520 }
0x12cb   :  { %v2523_v37 = vmul.f32 %v2521_v47, %v2517_v35 }
0x12cd   :  { %2525 = vrot.lane.b32.xlu1 %v2523_v37, %s5199_s3 }
0x133f   :  { %v2526_v38 = vpop.permute.xlu1 %2525 }
0x1340   :  { %v2528_v50 = vadd.f32 %v2526_v38, %v2518_v55 }
0x1342   :  { %5116 = vtanh.f32 %v2528_v50 }
0x134c   :  { %v5117_v40 = vpop.eup %5116 }
0x134d   :  { %2531 = vrot.lane.b32.xlu0 %v5117_v40, %s5199_s3 }
0x13bf   :  { %v2532_v41 = vpop.permute.xlu0 %2531 }
0x13c0   :  { %v2534_v43 = vmul.f32 %v2532_v41, %v2517_v35 }
0x13c2   :  { %2536 = vrot.lane.b32.xlu1 %v2534_v43, %s5200_s4 }
0x1434   :  { %v2537_v44 = vpop.permute.xlu1 %2536 }
0x1435   :  { %4668 = vmatmul.mubr.msk.f32.vlgmr.msra.gmra.mrb[18].mxu1 %vm1403_vm3, %v2537_v44  ;;  %4679 = vmatmul.mubr.msk.f32.vlgmr.msra.gmra.mrb[16].mxu0 %vm1403_vm3, %v2537_v44 }
0x1436   :  { %4926 = vmatpush3.bf16.msra.mxu1 %v6093_v12  ;;  %4689 = vmatprep.mubr.msk.f32.mxu1 %vm5197_vm1, %v5198_v48 }
0x1437   :  { %4927 = vmatprep.subr.bf16.mxu1 %v5196_v42 }
0x143a   :  { %4929 = vmatpush3.bf16.msra.mxu1 %v6107_v16 }
0x143b   :  { %4930 = vmatprep.subr.bf16.mxu1 %v5196_v42 }
0x1508   :  { %v2676_v46 = vpop.f32.mrb[16].mxu0 }
0x1509   :  { %v2680_v54 = vadd.f32 %v2676_v46, %v1391_v45  ;;  %v4680_v56 = vpop.f32.mrb[17].mxu0 }
0x150b   :  { %v4301_v57 = vmul.f32 -1.442695, %v2680_v54 }
0x150d   :  { %5118 = vpow2.f32 %v4301_v57 }
0x150e   :  { %5120 = vtanh.f32 %v2680_v54 }
0x1517   :  { %v5119_v58 = vpop.eup %5118 }
0x1518   :  { %v2684_v59 = vadd.f32 1.0, %v5119_v58  ;;  %v5121_v12 = vpop.eup %5120 }
0x151a   :  { %5122 = vrcp.f32 %v2684_v59 }
0x1524   :  { %v5123_v60 = vpop.eup %5122 }
0x1525   :  { %v2688_v51 = vsel %vm1247_vm2, %v5123_v60, %v5121_v12 }
0x1526   :  { %2691 = vrot.lane.b32.xlu0 %v2688_v51, %s5199_s3  ;;  %v2689_v52 = vmul.f32 %v2688_v51, %v2528_v50 }
0x1598   :  { %v2692_v16 = vpop.permute.xlu0 %2691 }
0x1599   :  { %v2694_v61 = vmul.f32 %v2692_v16, %v2688_v51 }
0x159b   :  { %2696 = vrot.lane.b32.xlu1 %v2694_v61, %s5199_s3 }
0x160d   :  { %v2697_v53 = vpop.permute.xlu1 %2696 }
0x160e   :  { %v2699_v62 = vadd.f32 %v2697_v53, %v2689_v52 }
0x1610   :  { %5124 = vtanh.f32 %v2699_v62 }
0x161a   :  { %v5125_v1 = vpop.eup %5124 }
0x161b   :  { %2702 = vrot.lane.b32.xlu0 %v5125_v1, %s5199_s3 }
0x168d   :  { %v2703_v36 = vpop.permute.xlu0 %2702 }
0x168e   :  { %v2705_v2 = vmul.f32 %v2703_v36, %v2688_v51 }
0x1690   :  { %2707 = vrot.lane.b32.xlu1 %v2705_v2, %s5200_s4 }
0x1702   :  { %v2708_v7 = vpop.permute.xlu1 %2707 }
0x1703   :  { %4690 = vmatmul.mubr.msk.f32.vlgmr.msra.gmra.mrb[20].mxu1 %vm1403_vm3, %v2708_v7 }
0x1704   :  { %4932 = vmatpush3.bf16.msra.mxu1 %v6270_v4  ;;  %4700 = vmatprep.mubr.msk.f32.mxu1 %vm5197_vm1, %v5198_v48 }
0x1705   :  { %4933 = vmatprep.subr.bf16.mxu1 %v5196_v42 }
0x1708   :  { %4935 = vmatpush3.bf16.msra.mxu1 %v6280_v8 }
0x1709   :  { %4936 = vmatprep.subr.bf16.mxu1 %v5196_v42 }
0x170b   :  { %4701 = vmatmul.mubr.f32.vlgmr.msra.gmra.mrb[6].mxu1 %v5198_v48 }
0x170c   :  { %4938 = vmatpush3.bf16.msra.mxu1 %v6270_v4  ;;  %4711 = vmatprep.mubr.msk.f32.mxu1 %vm5197_vm1, %v5198_v48 }
0x170d   :  { %4939 = vmatprep.subr.bf16.mxu1 %v5196_v42 }
0x1710   :  { %4941 = vmatpush3.bf16.msra.mxu1 %v6280_v8 }
0x1711   :  { %4942 = vmatprep.subr.bf16.mxu1 %v5196_v42 }
0x17de   :  { %v2851_v39 = vpop.f32.mrb[6].mxu1 }
0x17df   :  { %v5016_v10 = vadd.f32 %v6297_v9, %v2851_v39  ;;  %v4702_v11 = vpop.f32.mrb[7].mxu1 }
0x17e1   :  { %v4303_v13 = vmul.f32 -1.442695, %v5016_v10 }
0x17e3   :  { %5126 = vpow2.f32 %v4303_v13 }
0x17e4   :  { %5128 = vtanh.f32 %v5016_v10 }
0x17ed   :  { %v5127_v14 = vpop.eup %5126 }
0x17ee   :  { %v2859_v15 = vadd.f32 1.0, %v5127_v14  ;;  %v5129_v17 = vpop.eup %5128 }
0x17f0   :  { %5130 = vrcp.f32 %v2859_v15 }
0x17fa   :  { %v5131_v34 = vpop.eup %5130 }
0x17fb   :  { %v2863_v35 = vsel %vm1247_vm2, %v5131_v34, %v5129_v17 }
0x17fc   :  { %2866 = vrot.lane.b32.xlu0 %v2863_v35, %s5199_s3  ;;  %v2864_v55 = vmul.f32 0.0, %v2863_v35 }
0x186e   :  { %v2867_v47 = vpop.permute.xlu0 %2866 }
0x186f   :  { %v2869_v37 = vmul.f32 %v2867_v47, %v2863_v35 }
0x1871   :  { %2871 = vrot.lane.b32.xlu1 %v2869_v37, %s5199_s3 }
0x18e3   :  { %v2872_v38 = vpop.permute.xlu1 %2871 }
0x18e4   :  { %v2874_v50 = vadd.f32 %v2872_v38, %v2864_v55 }
0x18e6   :  { %5132 = vtanh.f32 %v2874_v50 }
0x18f0   :  { %v5133_v40 = vpop.eup %5132 }
0x18f1   :  { %2877 = vrot.lane.b32.xlu0 %v5133_v40, %s5199_s3 }
0x1963   :  { %v2878_v41 = vpop.permute.xlu0 %2877 }
0x1964   :  { %v2880_v43 = vmul.f32 %v2878_v41, %v2863_v35 }
0x1966   :  { %2882 = vrot.lane.b32.xlu1 %v2880_v43, %s5200_s4 }
0x19d8   :  { %v6306_v44 = vpop.permute.xlu1 %2882 }
0x19d9   :  { %4712 = vmatmul.mubr.msk.f32.vlgmr.msra.gmra.mrb[8].mxu1 %vm1403_vm3, %v6306_v44 }
0x19da   :  { %4944 = vmatpush3.bf16.msra.mxu1 %v6270_v4  ;;  %4722 = vmatprep.mubr.msk.f32.mxu1 %vm5197_vm1, %v5198_v48 }
0x19db   :  { %4945 = vmatprep.subr.bf16.mxu1 %v5196_v42 }
0x19de   :  { %4947 = vmatpush3.bf16.msra.mxu1 %v6280_v8 }
0x19df   :  { %4948 = vmatprep.subr.bf16.mxu1 %v5196_v42 }
0x1aac   :  { %v2952_v45 = vpop.f32.mrb[8].mxu1 }
0x1aad   :  { %v5017_v46 = vadd.f32 %v6297_v9, %v2952_v45  ;;  %v4713_v54 = vpop.f32.mrb[9].mxu1 }
0x1aaf   :  { %v4305_v56 = vmul.f32 -1.442695, %v5017_v46 }
0x1ab1   :  { %5134 = vpow2.f32 %v4305_v56 }
0x1ab2   :  { %5136 = vtanh.f32 %v5017_v46 }
0x1abb   :  { %v5135_v57 = vpop.eup %5134 }
0x1abc   :  { %v2960_v58 = vadd.f32 1.0, %v5135_v57  ;;  %v5137_v59 = vpop.eup %5136 }
0x1abe   :  { %5138 = vrcp.f32 %v2960_v58 }
0x1ac8   :  { %v5139_v12 = vpop.eup %5138 }
0x1ac9   :  { %v2964_v60 = vsel %vm1247_vm2, %v5139_v12, %v5137_v59 }
0x1aca   :  { %2967 = vrot.lane.b32.xlu0 %v2964_v60, %s5199_s3  ;;  %v2965_v61 = vmul.f32 %v2964_v60, %v2874_v50 }
0x1b3c   :  { %v2968_v51 = vpop.permute.xlu0 %2967 }
0x1b3d   :  { %v2970_v16 = vmul.f32 %v2968_v51, %v2964_v60 }
0x1b3f   :  { %2972 = vrot.lane.b32.xlu1 %v2970_v16, %s5199_s3 }
0x1bb1   :  { %v2973_v52 = vpop.permute.xlu1 %2972 }
0x1bb2   :  { %v2975_v53 = vadd.f32 %v2973_v52, %v2965_v61 }
0x1bb4   :  { %5140 = vtanh.f32 %v2975_v53 }
0x1bbe   :  { %v5141_v62 = vpop.eup %5140 }
0x1bbf   :  { %2978 = vrot.lane.b32.xlu0 %v5141_v62, %s5199_s3 }
0x1c31   :  { %v2979_v1 = vpop.permute.xlu0 %2978 }
0x1c32   :  { %v6322_v36 = vmul.f32 %v2979_v1, %v2964_v60 }
0x1c34   :  { %2983 = vrot.lane.b32.xlu1 %v6322_v36, %s5200_s4 }
0x1ca6   :  { %v2984_v2 = vpop.permute.xlu1 %2983 }
0x1ca7   :  { %4723 = vmatmul.mubr.msk.f32.vlgmr.msra.gmra.mrb[10].mxu1 %vm1403_vm3, %v2984_v2 }
0x1ca8   :  { %4950 = vmatpush3.bf16.msra.mxu1 %v6270_v4  ;;  %4733 = vmatprep.mubr.msk.f32.mxu1 %vm5197_vm1, %v5198_v48 }
0x1ca9   :  { %4951 = vmatprep.subr.bf16.mxu1 %v5196_v42 }
0x1cac   :  { %4953 = vmatpush3.bf16.msra.mxu1 %v6280_v8 }
0x1cad   :  { %4954 = vmatprep.subr.bf16.mxu1 %v5196_v42 }
0x1d7a   :  { %v3053_v49 = vpop.f32.mrb[10].mxu1 }
0x1d7b   :  { %v5018_v3 = vadd.f32 %v6297_v9, %v3053_v49  ;;  %v4724_v5 = vpop.f32.mrb[11].mxu1 }
0x1d7d   :  { %v4307_v6 = vmul.f32 -1.442695, %v5018_v3 }
0x1d7f   :  { %5142 = vpow2.f32 %v4307_v6 }
0x1d80   :  { %5144 = vtanh.f32 %v5018_v3 }
0x1d89   :  { %v5143_v7 = vpop.eup %5142 }
0x1d8a   :  { %v3061_v39 = vadd.f32 1.0, %v5143_v7  ;;  %v5145_v10 = vpop.eup %5144 }
0x1d8c   :  { %5146 = vrcp.f32 %v3061_v39 }
0x1d96   :  { %v5147_v11 = vpop.eup %5146 }
0x1d97   :  { %v3065_v13 = vsel %vm1247_vm2, %v5147_v11, %v5145_v10 }
0x1d98   :  { %3068 = vrot.lane.b32.xlu0 %v3065_v13, %s5199_s3  ;;  %v3066_v17 = vmul.f32 %v3065_v13, %v2975_v53 }
0x1e0a   :  { %v3069_v14 = vpop.permute.xlu0 %3068 }
0x1e0b   :  { %v3071_v15 = vmul.f32 %v3069_v14, %v3065_v13 }
0x1e0d   :  { %3073 = vrot.lane.b32.xlu1 %v3071_v15, %s5199_s3 }
0x1e7f   :  { %v3074_v34 = vpop.permute.xlu1 %3073 }
0x1e80   :  { %v3076_v35 = vadd.f32 %v3074_v34, %v3066_v17 }
0x1e82   :  { %5148 = vtanh.f32 %v3076_v35 }
0x1e8c   :  { %v5149_v47 = vpop.eup %5148 }
0x1e8d   :  { %3079 = vrot.lane.b32.xlu0 %v5149_v47, %s5199_s3 }
0x1eff   :  { %v3080_v37 = vpop.permute.xlu0 %3079 }
0x1f00   :  { %v6339_v55 = vmul.f32 %v3080_v37, %v3065_v13 }
0x1f02   :  { %3084 = vrot.lane.b32.xlu1 %v6339_v55, %s5200_s4 }
0x1f74   :  { %v3085_v38 = vpop.permute.xlu1 %3084 }
0x1f75   :  { %4734 = vmatmul.mubr.msk.f32.vlgmr.msra.gmra.mrb[12].mxu1 %vm1403_vm3, %v3085_v38 }
0x1f76   :  { %4956 = vmatpush3.bf16.msra.mxu1 %v6270_v4  ;;  %4744 = vmatprep.mubr.msk.f32.mxu1 %vm5197_vm1, %v5198_v48 }
0x1f77   :  { %4957 = vmatprep.subr.bf16.mxu1 %v5196_v42 }
0x1f7a   :  { %4959 = vmatpush3.bf16.msra.mxu1 %v6280_v8 }
0x1f7b   :  { %4960 = vmatprep.subr.bf16.mxu1 %v5196_v42 }
0x2048   :  { %v3154_v50 = vpop.f32.mrb[12].mxu1 }
0x2049   :  { %v5019_v40 = vadd.f32 %v6297_v9, %v3154_v50  ;;  %v4735_v41 = vpop.f32.mrb[13].mxu1 }
0x204b   :  { %v4309_v43 = vmul.f32 -1.442695, %v5019_v40 }
0x204d   :  { %5150 = vpow2.f32 %v4309_v43 }
0x204e   :  { %5152 = vtanh.f32 %v5019_v40 }
0x2057   :  { %v5151_v45 = vpop.eup %5150 }
0x2058   :  { %v3162_v46 = vadd.f32 1.0, %v5151_v45  ;;  %v5153_v54 = vpop.eup %5152 }
0x205a   :  { %5154 = vrcp.f32 %v3162_v46 }
0x2064   :  { %v5155_v56 = vpop.eup %5154 }
0x2065   :  { %v3166_v57 = vsel %vm1247_vm2, %v5155_v56, %v5153_v54 }
0x2066   :  { %3169 = vrot.lane.b32.xlu0 %v3166_v57, %s5199_s3  ;;  %v3167_v12 = vmul.f32 %v3166_v57, %v3076_v35 }
0x20d8   :  { %v3170_v58 = vpop.permute.xlu0 %3169 }
0x20d9   :  { %v3172_v59 = vmul.f32 %v3170_v58, %v3166_v57 }
0x20db   :  { %3174 = vrot.lane.b32.xlu1 %v3172_v59, %s5199_s3 }
0x214d   :  { %v3175_v60 = vpop.permute.xlu1 %3174 }
0x214e   :  { %v3177_v51 = vadd.f32 %v3175_v60, %v3167_v12 }
0x2150   :  { %5156 = vtanh.f32 %v3177_v51 }
0x215a   :  { %v5157_v16 = vpop.eup %5156 }
0x215b   :  { %3180 = vrot.lane.b32.xlu0 %v5157_v16, %s5199_s3 }
0x21cd   :  { %v3181_v61 = vpop.permute.xlu0 %3180 }
0x21ce   :  { %v6356_v52 = vmul.f32 %v3181_v61, %v3166_v57 }
0x21d0   :  { %3185 = vrot.lane.b32.xlu1 %v6356_v52, %s5200_s4 }
0x2242   :  { %v3186_v53 = vpop.permute.xlu1 %3185 }
0x2243   :  { %4745 = vmatmul.mubr.msk.f32.vlgmr.msra.gmra.mrb[14].mxu1 %vm1403_vm3, %v3186_v53 }
0x2244   :  { %4962 = vmatpush3.bf16.msra.mxu1 %v6270_v4  ;;  %4755 = vmatprep.mubr.msk.f32.mxu1 %vm5197_vm1, %v5198_v48 }
0x2245   :  { %4963 = vmatprep.subr.bf16.mxu1 %v5196_v42 }
0x2248   :  { %4965 = vmatpush3.bf16.msra.mxu1 %v6280_v8 }
0x2249   :  { %4966 = vmatprep.subr.bf16.mxu1 %v5196_v42 }
0x2316   :  { %v3255_v62 = vpop.f32.mrb[14].mxu1 }
0x2317   :  { %v5020_v1 = vadd.f32 %v6297_v9, %v3255_v62  ;;  %v4746_v2 = vpop.f32.mrb[15].mxu1 }
0x2319   :  { %v4311_v49 = vmul.f32 -1.442695, %v5020_v1 }
0x231b   :  { %5158 = vpow2.f32 %v4311_v49 }
0x231c   :  { %5160 = vtanh.f32 %v5020_v1 }
0x2325   :  { %v5159_v3 = vpop.eup %5158 }
0x2326   :  { %v3263_v5 = vadd.f32 1.0, %v5159_v3  ;;  %v5161_v6 = vpop.eup %5160 }
0x2328   :  { %5162 = vrcp.f32 %v3263_v5 }
0x2332   :  { %v5163_v7 = vpop.eup %5162 }
0x2333   :  { %v3267_v39 = vsel %vm1247_vm2, %v5163_v7, %v5161_v6 }
0x2334   :  { %3270 = vrot.lane.b32.xlu0 %v3267_v39, %s5199_s3  ;;  %v3268_v13 = vmul.f32 %v3267_v39, %v3177_v51 }
0x23a6   :  { %v3271_v10 = vpop.permute.xlu0 %3270 }
0x23a7   :  { %v3273_v11 = vmul.f32 %v3271_v10, %v3267_v39 }
0x23a9   :  { %3275 = vrot.lane.b32.xlu1 %v3273_v11, %s5199_s3 }
0x241b   :  { %v3276_v14 = vpop.permute.xlu1 %3275 }
0x241c   :  { %v3278_v15 = vadd.f32 %v3276_v14, %v3268_v13 }
0x241e   :  { %5164 = vtanh.f32 %v3278_v15 }
0x2428   :  { %v5165_v17 = vpop.eup %5164 }
0x2429   :  { %3281 = vrot.lane.b32.xlu0 %v5165_v17, %s5199_s3 }
0x249b   :  { %v3282_v34 = vpop.permute.xlu0 %3281 }
0x249c   :  { %v3284_v35 = vmul.f32 %v3282_v34, %v3267_v39 }
0x249e   :  { %3286 = vrot.lane.b32.xlu1 %v3284_v35, %s5200_s4 }
0x2510   :  { %v6374_v47 = vpop.permute.xlu1 %3286 }
0x2511   :  { %4756 = vmatmul.mubr.msk.f32.vlgmr.msra.gmra.mrb[16].mxu1 %vm1403_vm3, %v6374_v47 }
0x2512   :  { %4968 = vmatpush3.bf16.msra.mxu1 %v6270_v4  ;;  %4766 = vmatprep.mubr.msk.f32.mxu1 %vm5197_vm1, %v5198_v48 }
0x2513   :  { %4969 = vmatprep.subr.bf16.mxu1 %v5196_v42 }
0x2516   :  { %4971 = vmatpush3.bf16.msra.mxu1 %v6280_v8 }
0x2517   :  { %4972 = vmatprep.subr.bf16.mxu1 %v5196_v42 }
0x25e4   :  { %v3356_v37 = vpop.f32.mrb[16].mxu1 }
0x25e5   :  { %v5021_v38 = vadd.f32 %v6297_v9, %v3356_v37  ;;  %v4757_v50 = vpop.f32.mrb[17].mxu1 }
0x25e7   :  { %v4313_v40 = vmul.f32 -1.442695, %v5021_v38 }
0x25e9   :  { %5166 = vpow2.f32 %v4313_v40 }
0x25ea   :  { %5168 = vtanh.f32 %v5021_v38 }
0x25f3   :  { %v5167_v41 = vpop.eup %5166 }
0x25f4   :  { %v3364_v43 = vadd.f32 1.0, %v5167_v41  ;;  %v5169_v45 = vpop.eup %5168 }
0x25f6   :  { %5170 = vrcp.f32 %v3364_v43 }
0x2600   :  { %v5171_v46 = vpop.eup %5170 }
0x2601   :  { %v3368_v54 = vsel %vm1247_vm2, %v5171_v46, %v5169_v45 }
0x2602   :  { %3371 = vrot.lane.b32.xlu0 %v3368_v54, %s5199_s3  ;;  %v3369_v58 = vmul.f32 %v3368_v54, %v3278_v15 }
0x2674   :  { %v3372_v56 = vpop.permute.xlu0 %3371 }
0x2675   :  { %v3374_v57 = vmul.f32 %v3372_v56, %v3368_v54 }
0x2677   :  { %3376 = vrot.lane.b32.xlu1 %v3374_v57, %s5199_s3 }
0x26e9   :  { %v3377_v59 = vpop.permute.xlu1 %3376 }
0x26ea   :  { %v3379_v12 = vadd.f32 %v3377_v59, %v3369_v58 }
0x26ec   :  { %5172 = vtanh.f32 %v3379_v12 }
0x26f6   :  { %v5173_v60 = vpop.eup %5172 }
0x26f7   :  { %3382 = vrot.lane.b32.xlu0 %v5173_v60, %s5199_s3 }
0x2769   :  { %v3383_v51 = vpop.permute.xlu0 %3382 }
0x276a   :  { %v3385_v16 = vmul.f32 %v3383_v51, %v3368_v54 }
0x276c   :  { %3387 = vrot.lane.b32.xlu1 %v3385_v16, %s5200_s4 }
0x27de   :  { %v3388_v61 = vpop.permute.xlu1 %3387 }
0x27df   :  { %4767 = vmatmul.mubr.msk.f32.vlgmr.msra.gmra.mrb[18].mxu1 %vm1403_vm3, %v3388_v61 }
0x27e0   :  { %4974 = vmatpush3.bf16.msra.mxu1 %v6270_v4  ;;  %4777 = vmatprep.mubr.msk.f32.mxu1 %vm5197_vm1, %v5198_v48 }
0x27e1   :  { %4975 = vmatprep.subr.bf16.mxu1 %v5196_v42 }
0x27e4   :  { %4977 = vmatpush3.bf16.msra.mxu1 %v6280_v8 }
0x28b2   :  { %v3457_v53 = vpop.f32.mrb[18].mxu1 }
0x28b3   :  { %v5022_v62 = vadd.f32 %v6297_v9, %v3457_v53  ;;  %v4768_v1 = vpop.f32.mrb[19].mxu1 }
0x28b5   :  { %v4315_v2 = vmul.f32 -1.442695, %v5022_v62 }
0x28b7   :  { %5174 = vpow2.f32 %v4315_v2 }
0x28b8   :  { %5176 = vtanh.f32 %v5022_v62 }
0x28c1   :  { %v5175_v49 = vpop.eup %5174 }
0x28c2   :  { %v3465_v3 = vadd.f32 1.0, %v5175_v49  ;;  %v5177_v5 = vpop.eup %5176 }
0x28c4   :  { %5178 = vrcp.f32 %v3465_v3 }
0x28ce   :  { %v5179_v6 = vpop.eup %5178 }
0x28cf   :  { %v3469_v4 = vsel %vm1247_vm2, %v5179_v6, %v5177_v5 }
0x28d0   :  { %3472 = vrot.lane.b32.xlu0 %v3469_v4, %s5199_s3  ;;  %v3470_v8 = vmul.f32 %v3469_v4, %v3379_v12 }
0x2942   :  { %v3473_v7 = vpop.permute.xlu0 %3472 }
0x2943   :  { %v3475_v39 = vmul.f32 %v3473_v7, %v3469_v4 }
0x2945   :  { %3477 = vrot.lane.b32.xlu1 %v3475_v39, %s5199_s3 }
0x29b7   :  { %v3478_v10 = vpop.permute.xlu1 %3477 }
0x29b8   :  { %v3480_v11 = vadd.f32 %v3478_v10, %v3470_v8 }
0x29ba   :  { %5180 = vtanh.f32 %v3480_v11 }
0x29c4   :  { %v5181_v13 = vpop.eup %5180 }
0x29c5   :  { %3483 = vrot.lane.b32.xlu0 %v5181_v13, %s5199_s3 }
0x2a37   :  { %v3484_v14 = vpop.permute.xlu0 %3483 }
0x2a38   :  { %v3486_v15 = vmul.f32 %v3484_v14, %v3469_v4 }
0x2a3a   :  { %3488 = vrot.lane.b32.xlu1 %v3486_v15, %s5200_s4 }
0x2aac   :  { %v3489_v17 = vpop.permute.xlu1 %3488 }
0x2aad   :  { %4778 = vmatmul.mubr.msk.f32.vlgmr.msra.gmra.mrb[20].mxu1 %vm1403_vm3, %v3489_v17 }
0x2b80   :  { %v3558_v34 = vpop.f32.mrb[20].mxu1 }
0x2b81   :  { %v5023_v35 = vadd.f32 %v6297_v9, %v3558_v34  ;;  %v4779_v37 = vpop.f32.mrb[21].mxu1  ;;  %v5052_v9 = vpack.i.bf16 %v3385_v16, %v6322_v36 }
0x2b83   :  { %v4317_v38 = vmul.f32 -1.442695, %v5023_v35 }
0x2b85   :  { %5182 = vpow2.f32 %v4317_v38 }
0x2b86   :  { %5184 = vtanh.f32 %v5023_v35 }
0x2b8f   :  { %v5183_v50 = vpop.eup %5182 }
0x2b90   :  { %v3566_v40 = vadd.f32 1.0, %v5183_v50  ;;  %v5185_v41 = vpop.eup %5184 }
0x2b92   :  { %5186 = vrcp.f32 %v3566_v40 }
0x2b9c   :  { %v5187_v43 = vpop.eup %5186 }
0x2b9d   :  { %v3570_v45 = vsel %vm1247_vm2, %v5187_v43, %v5185_v41 }
0x2b9e   :  { %3573 = vrot.lane.b32.xlu0 %v3570_v45, %s5199_s3  ;;  %v3571_v56 = vmul.f32 %v3570_v45, %v3480_v11 }
0x2c10   :  { %v3574_v46 = vpop.permute.xlu0 %3573 }
0x2c11   :  { %v3576_v54 = vmul.f32 %v3574_v46, %v3570_v45 }
0x2c13   :  { %3578 = vrot.lane.b32.xlu1 %v3576_v54, %s5199_s3 }
0x2c17   :  { %5053 = vrot.lane.b32.xlu1 %v5052_v9, %s5201_s6 }
0x2c85   :  { %v3579_v57 = vpop.permute.xlu1 %3578 }
0x2c86   :  { %v3581_v58 = vadd.f32 %v3579_v57, %v3571_v56 }
0x2c88   :  { %5188 = vtanh.f32 %v3581_v58 }
0x2c89   :  { %v5054_v51 = vpop.permute.xlu1 %5053 }
0x2c8a   :  { %v5056_v61 = vunpack.i.h.bf16 %v5054_v51  ;;  %v5055_v53 = vunpack.i.l.bf16 %v5054_v51 }
0x2c8c   :  { %v3608_v36 = vsel %vm1403_vm3, %v6374_v47, %v5056_v61  ;;  %v3603_v16 = vsel %vm1403_vm3, %v6306_v44, %v5055_v53 }
0x2c8d   :  { %v3605_v49 = vsel %vm3604_vm4, %v3603_v16, %v6339_v55 }
0x2c92   :  { %v5189_v59 = vpop.eup %5188 }
0x2c93   :  { %3584 = vrot.lane.b32.xlu0 %v5189_v59, %s5199_s3 }
0x2d05   :  { %v3585_v12 = vpop.permute.xlu0 %3584 }
0x2d06   :  { %v3587_v0 = vmul.f32 %v3585_v12, %v3570_v45 }
0x2d08   :  { %v5057_v60 = vpack.i.bf16 %v3587_v0, %v6356_v52  ;;  %v3609_v52 = vsel %vm3604_vm4, %v3608_v36, %v3486_v15 }
0x2d0a   :  { %5058 = vrot.lane.b32.xlu0 %v5057_v60, %s5199_s3 }
0x2d7c   :  { %v5059_v62 = vpop.permute.xlu0 %5058 }
0x2d7d   :  { %v5061_v1 = vunpack.i.h.bf16 %v5059_v62  ;;  %v5060_v2 = vunpack.i.l.bf16 %v5059_v62 }
0x2d7f   :  { %v3610_v3 = vsel %vm3606_vm5, %v3609_v52, %v5061_v1  ;;  %v6421_v5 = vsel %vm3606_vm5, %v3605_v49, %v5060_v2 }
0x2d80   :  { %5190 = dma.done.wait [#allocation5], 8192 }
0x2d81   :  { %5191 = vsyncadd [#allocation5], 4294959104  ;;  %v6423_v6 = vpack.c.bf16 %v3610_v3, %v3610_v3  ;;  %v3616_v44 = vld [vmem:[#allocation2 + $0x8] sm:$0xff]  ;;  %v3615_v47 = vld [vmem:[#allocation2] sm:$0xff]  ;;  %v6428_v61 = vpack.c.bf16 %v6421_v5, %v6421_v5 }
0x2d82   :  { %v3620_v4 = vld [vmem:[#allocation2 + $0x28] sm:$0xff]  ;;  %3703 = vmatprep.subr.bf16.mxu0 %v3616_v44  ;;  %v3619_v7 = vld [vmem:[#allocation2 + $0x20] sm:$0xff]  ;;  %v3618_v51 = vld [vmem:[#allocation2 + $0x18] sm:$0xff] }
0x2d83   :  { %3735 = vmatprep.mubr.bf16.mxu0 %v6423_v6  ;;  %3704 = vmatpush1.bf16.msra.mxu0 %v3615_v47  ;;  %v3624_v39 = vld [vmem:[#allocation2 + $0x48] sm:$0xff]  ;;  %v3623_v55 = vld [vmem:[#allocation2 + $0x40] sm:$0xff]  ;;  %v3617_v53 = vld [vmem:[#allocation2 + $0x10] sm:$0xff] }
0x2d84   :  { %3705 = vmatprep.subr.bf16.mxu0 %v3620_v4  ;;  %v3628_v8 = vld [vmem:[#allocation2 + $0x68] sm:$0xff]  ;;  %v3627_v10 = vld [vmem:[#allocation2 + $0x60] sm:$0xff]  ;;  %v3622_v36 = vld [vmem:[#allocation2 + $0x38] sm:$0xff] }
0x2d85   :  { %v3632_v11 = vld [vmem:[#allocation2 + $0x88] sm:$0xff]  ;;  %v3631_v13 = vld [vmem:[#allocation2 + $0x80] sm:$0xff]  ;;  %v3621_v16 = vld [vmem:[#allocation2 + $0x30] sm:$0xff] }
0x2d86   :  { %v3636_v14 = vld [vmem:[#allocation2 + $0xa8] sm:$0xff]  ;;  %v3635_v15 = vld [vmem:[#allocation2 + $0xa0] sm:$0xff]  ;;  %v3626_v62 = vld [vmem:[#allocation2 + $0x58] sm:$0xff] }
0x2d87   :  { %3706 = vmatpush1.bf16.msra.mxu0 %v3619_v7  ;;  %v3640_v17 = vld [vmem:[#allocation2 + $0xc8] sm:$0xff]  ;;  %v3639_v34 = vld [vmem:[#allocation2 + $0xc0] sm:$0xff]  ;;  %v3625_v1 = vld [vmem:[#allocation2 + $0x50] sm:$0xff] }
0x2d88   :  { %3707 = vmatprep.subr.bf16.mxu0 %v3624_v39  ;;  %v3644_v35 = vld [vmem:[#allocation2 + $0xe8] sm:$0xff]  ;;  %v3643_v37 = vld [vmem:[#allocation2 + $0xe0] sm:$0xff]  ;;  %v3630_v2 = vld [vmem:[#allocation2 + $0x78] sm:$0xff] }
0x2d89   :  { %v3648_v38 = vld [vmem:[#allocation2 + $0x108] sm:$0xff]  ;;  %v3647_v50 = vld [vmem:[#allocation2 + $0x100] sm:$0xff]  ;;  %v3629_v49 = vld [vmem:[#allocation2 + $0x70] sm:$0xff] }
0x2d8a   :  { %v3652_v40 = vld [vmem:[#allocation2 + $0x128] sm:$0xff]  ;;  %v3651_v41 = vld [vmem:[#allocation2 + $0x120] sm:$0xff]  ;;  %v3634_v52 = vld [vmem:[#allocation2 + $0x98] sm:$0xff] }
0x2d8b   :  { %3708 = vmatpush1.bf16.msra.mxu0 %v3623_v55  ;;  %v3656_v43 = vld [vmem:[#allocation2 + $0x148] sm:$0xff]  ;;  %v3655_v45 = vld [vmem:[#allocation2 + $0x140] sm:$0xff]  ;;  %v3633_v3 = vld [vmem:[#allocation2 + $0x90] sm:$0xff] }
0x2d8c   :  { %3709 = vmatprep.subr.bf16.mxu0 %v3628_v8  ;;  %v3660_v46 = vld [vmem:[#allocation2 + $0x168] sm:$0xff]  ;;  %v3659_v54 = vld [vmem:[#allocation2 + $0x160] sm:$0xff]  ;;  %v3638_v5 = vld [vmem:[#allocation2 + $0xb8] sm:$0xff] }
0x2d8d   :  { %v3664_v9 = vld [vmem:[#allocation2 + $0x188] sm:$0xff]  ;;  %v3663_v56 = vld [vmem:[#allocation2 + $0x180] sm:$0xff]  ;;  %v3637_v44 = vld [vmem:[#allocation2 + $0xb0] sm:$0xff] }
0x2d8e   :  { %v3668_v57 = vld [vmem:[#allocation2 + $0x1a8] sm:$0xff]  ;;  %v3667_v58 = vld [vmem:[#allocation2 + $0x1a0] sm:$0xff]  ;;  %v3642_v47 = vld [vmem:[#allocation2 + $0xd8] sm:$0xff] }
0x2d8f   :  { %3710 = vmatpush1.bf16.msra.mxu0 %v3627_v10  ;;  %v3672_v59 = vld [vmem:[#allocation2 + $0x1c8] sm:$0xff]  ;;  %v3671_v12 = vld [vmem:[#allocation2 + $0x1c0] sm:$0xff]  ;;  %v3646_v4 = vld [vmem:[#allocation2 + $0xf8] sm:$0xff] }
0x2d90   :  { %3711 = vmatprep.subr.bf16.mxu0 %v3632_v11  ;;  %v3676_v0 = vld [vmem:[#allocation2 + $0x1e8] sm:$0xff]  ;;  %v3675_v60 = vld [vmem:[#allocation2 + $0x1e0] sm:$0xff]  ;;  %v3645_v7 = vld [vmem:[#allocation2 + $0xf0] sm:$0xff] }
0x2d91   :  { %v3650_v39 = vld [vmem:[#allocation2 + $0x118] sm:$0xff]  ;;  %v3649_v55 = vld [vmem:[#allocation2 + $0x110] sm:$0xff] }
0x2d92   :  { %v3654_v8 = vld [vmem:[#allocation2 + $0x138] sm:$0xff]  ;;  %v3653_v10 = vld [vmem:[#allocation2 + $0x130] sm:$0xff] }
0x2d93   :  { %3712 = vmatpush1.bf16.msra.mxu0 %v3631_v13  ;;  %v3658_v11 = vld [vmem:[#allocation2 + $0x158] sm:$0xff]  ;;  %v3657_v13 = vld [vmem:[#allocation2 + $0x150] sm:$0xff] }
0x2d94   :  { %3713 = vmatprep.subr.bf16.mxu0 %v3636_v14  ;;  %v3662_v14 = vld [vmem:[#allocation2 + $0x178] sm:$0xff] }
0x2d97   :  { %3714 = vmatpush1.bf16.msra.mxu0 %v3635_v15  ;;  %v3661_v15 = vld [vmem:[#allocation2 + $0x170] sm:$0xff] }
0x2d98   :  { %3715 = vmatprep.subr.bf16.mxu0 %v3640_v17  ;;  %v3666_v17 = vld [vmem:[#allocation2 + $0x198] sm:$0xff] }
0x2d9b   :  { %3716 = vmatpush1.bf16.msra.mxu0 %v3639_v34  ;;  %v3665_v34 = vld [vmem:[#allocation2 + $0x190] sm:$0xff] }
0x2d9c   :  { %3717 = vmatprep.subr.bf16.mxu0 %v3644_v35  ;;  %v3670_v35 = vld [vmem:[#allocation2 + $0x1b8] sm:$0xff] }
0x2d9f   :  { %3718 = vmatpush1.bf16.msra.mxu0 %v3643_v37  ;;  %v3669_v37 = vld [vmem:[#allocation2 + $0x1b0] sm:$0xff] }
0x2da0   :  { %3719 = vmatprep.subr.bf16.mxu0 %v3648_v38  ;;  %v3674_v38 = vld [vmem:[#allocation2 + $0x1d8] sm:$0xff] }
0x2da3   :  { %3720 = vmatpush1.bf16.msra.mxu0 %v3647_v50  ;;  %v3673_v50 = vld [vmem:[#allocation2 + $0x1d0] sm:$0xff] }
0x2da4   :  { %3721 = vmatprep.subr.bf16.mxu0 %v3652_v40  ;;  %v3678_v40 = vld [vmem:[#allocation2 + $0x1f8] sm:$0xff] }
0x2da7   :  { %3722 = vmatpush1.bf16.msra.mxu0 %v3651_v41  ;;  %v3677_v41 = vld [vmem:[#allocation2 + $0x1f0] sm:$0xff] }
0x2da8   :  { %3723 = vmatprep.subr.bf16.mxu0 %v3656_v43  ;;  %v6434_v43 = vshrl.u32 %v1245_v63, 7 }
0x2dab   :  { %3724 = vmatpush1.bf16.msra.mxu0 %v3655_v45  ;;  %v3685_v45 = vsub.s32 0, %v6434_v43 }
0x2dac   :  { %3725 = vmatprep.subr.bf16.mxu0 %v3660_v46  ;;  %v3681_v46 = vld [vmem:[%s6596_s7] sm:$0xf] }
0x2daf   :  { %3726 = vmatpush1.bf16.msra.mxu0 %v3659_v54  ;;  %v3689_v54 = vsub.s32 1, %v6434_v43 }
0x2db0   :  { %3727 = vmatprep.subr.bf16.mxu0 %v3664_v9  ;;  %v3686_v9 = vrot.slane %v3681_v46, %v3685_v45 }
0x2db3   :  { %3728 = vmatpush1.bf16.msra.mxu0 %v3663_v56  ;;  %v3690_v56 = vrot.slane %v3681_v46, %v3689_v54 }
0x2db4   :  { %3729 = vmatprep.subr.bf16.mxu0 %v3668_v57 }
0x2db7   :  { %3730 = vmatpush1.bf16.msra.mxu0 %v3667_v58 }
0x2db8   :  { %3731 = vmatprep.subr.bf16.mxu0 %v3672_v59 }
0x2dbb   :  { %3732 = vmatpush1.bf16.msra.mxu0 %v3671_v12 }
0x2dbc   :  { %3733 = vmatprep.subr.bf16.mxu0 %v3676_v0 }
0x2dbf   :  { %3734 = vmatpush1.bf16.msra.mxu0 %v3675_v60 }
0x2dc0   :  { %3744 = vmatprep.subr.bf16.mxu0 %v3618_v51 }
0x2dc2   :  { %3736 = vmatmul.mubr.bf16.vlgmr.msra.gmra.mrb[20].mxu0 %v6428_v61 }
0x2dc3   :  { %3745 = vmatpush1.bf16.msra.mxu0 %v3617_v53  ;;  %3776 = vmatprep.mubr.bf16.mxu0 %v6423_v6  ;;  %v3641_v6 = vld [vmem:[#allocation2 + $0xd0] sm:$0xff]  ;;  %v3697_v53 = vsub.s32 3, %v6434_v43 }
0x2dc4   :  { %3746 = vmatprep.subr.bf16.mxu0 %v3622_v36 }
0x2dc7   :  { %3747 = vmatpush1.bf16.msra.mxu0 %v3621_v16  ;;  %v3698_v16 = vrot.slane %v3681_v46, %v3697_v53 }
0x2dc8   :  { %3748 = vmatprep.subr.bf16.mxu0 %v3626_v62 }
0x2dcb   :  { %3749 = vmatpush1.bf16.msra.mxu0 %v3625_v1 }
0x2dcc   :  { %3750 = vmatprep.subr.bf16.mxu0 %v3630_v2 }
0x2dcf   :  { %3751 = vmatpush1.bf16.msra.mxu0 %v3629_v49 }
0x2dd0   :  { %3752 = vmatprep.subr.bf16.mxu0 %v3634_v52 }
0x2dd3   :  { %3753 = vmatpush1.bf16.msra.mxu0 %v3633_v3 }
0x2dd4   :  { %3754 = vmatprep.subr.bf16.mxu0 %v3638_v5 }
0x2dd7   :  { %3755 = vmatpush1.bf16.msra.mxu0 %v3637_v44 }
0x2dd8   :  { %3756 = vmatprep.subr.bf16.mxu0 %v3642_v47 }
0x2ddb   :  { %3757 = vmatpush1.bf16.msra.mxu0 %v3641_v6 }
0x2ddc   :  { %3758 = vmatprep.subr.bf16.mxu0 %v3646_v4 }
0x2ddf   :  { %3759 = vmatpush1.bf16.msra.mxu0 %v3645_v7 }
0x2de0   :  { %3760 = vmatprep.subr.bf16.mxu0 %v3650_v39 }
0x2de3   :  { %3761 = vmatpush1.bf16.msra.mxu0 %v3649_v55 }
0x2de4   :  { %3762 = vmatprep.subr.bf16.mxu0 %v3654_v8 }
0x2de7   :  { %3763 = vmatpush1.bf16.msra.mxu0 %v3653_v10 }
0x2de8   :  { %3764 = vmatprep.subr.bf16.mxu0 %v3658_v11 }
0x2deb   :  { %3765 = vmatpush1.bf16.msra.mxu0 %v3657_v13 }
0x2dec   :  { %3766 = vmatprep.subr.bf16.mxu0 %v3662_v14 }
0x2def   :  { %3767 = vmatpush1.bf16.msra.mxu0 %v3661_v15 }
0x2df0   :  { %3768 = vmatprep.subr.bf16.mxu0 %v3666_v17 }
0x2df3   :  { %3769 = vmatpush1.bf16.msra.mxu0 %v3665_v34 }
0x2df4   :  { %3770 = vmatprep.subr.bf16.mxu0 %v3670_v35 }
0x2df7   :  { %3771 = vmatpush1.bf16.msra.mxu0 %v3669_v37 }
0x2df8   :  { %3772 = vmatprep.subr.bf16.mxu0 %v3674_v38 }
0x2dfb   :  { %3773 = vmatpush1.bf16.msra.mxu0 %v3673_v50 }
0x2dfc   :  { %3774 = vmatprep.subr.bf16.mxu0 %v3678_v40 }
0x2dff   :  { %3775 = vmatpush1.bf16.msra.mxu0 %v3677_v41 }
0x2e02   :  { %3777 = vmatmul.mubr.bf16.vlgmr.msra.gmra.mrb[24].mxu0 %v6428_v61  ;;  %v3693_v61 = vsub.s32 2, %v6434_v43 }
0x2e04   :  { %v3694_v36 = vrot.slane %v3681_v46, %v3693_v61 }
0x2e95   :  { %v3737_v57 = vpop.f32.mrb[20].mxu0 }
0x2e96   :  { %v6445_v58 = vadd.f32 %v3737_v57, %v3686_v9  ;;  %v3739_v59 = vpop.f32.mrb[21].mxu0 }
0x2e97   :  { %v3740_v63 = vadd.f32 %v3739_v59, %v3690_v56  ;;  %v3741_v12 = vpop.f32.mrb[22].mxu0 }
0x2e98   :  { %v3785_v0 = vmax.f32 %v6445_v58, 0.0  ;;  %v3742_v60 = vpop.f32.mrb[23].mxu0 }
0x2e99   :  { %v3786_v51 = vmax.f32 %v3740_v63, 0.0 }
0x2ed5   :  { %v3778_v62 = vpop.f32.mrb[24].mxu0 }
0x2ed6   :  { %v6450_v1 = vadd.f32 %v3778_v62, %v3694_v36  ;;  %v3780_v2 = vpop.f32.mrb[25].mxu0 }
0x2ed7   :  { %v6452_v49 = vadd.f32 %v3780_v2, %v3698_v16  ;;  %v3782_v52 = vpop.f32.mrb[26].mxu0 }
0x2ed8   :  { %v3787_v3 = vmax.f32 %v6450_v1, 0.0  ;;  %v3783_v5 = vpop.f32.mrb[27].mxu0 }
0x2ed9   :  { %v3788_v44 = vmax.f32 %v6452_v49, 0.0 }
0x2eda   :  { %5192 = dma.done.wait [#allocation5 + $0x1], 8192 }
0x2edb   :  { %5193 = vsyncadd [#allocation5 + $0x1], 4294959104  ;;  %v3858_v47 = vpack.c.bf16 %v3786_v51, %v3786_v51  ;;  %v3794_v6 = vld [vmem:[#allocation3 + $0x8] sm:$0xff]  ;;  %v3793_v4 = vld [vmem:[#allocation3] sm:$0xff]  ;;  %v3857_v2 = vpack.c.bf16 %v3785_v0, %v3785_v0  ;;  %v3860_v52 = vpack.c.bf16 %v3788_v44, %v3788_v44  ;;  %4454 = vmatprep.subr.bf16.mxu0 %v5965_v26 }
0x2edc   :  { %v3796_v7 = vld [vmem:[#allocation3 + $0x18] sm:$0xff]  ;;  %3873 = vmatprep.subr.bf16.mxu1 %v3794_v6  ;;  %v3795_v39 = vld [vmem:[#allocation3 + $0x10] sm:$0xff]  ;;  %v3798_v55 = vld [vmem:[#allocation3 + $0x28] sm:$0xff] }
0x2edd   :  { %3905 = vmatprep.mubr.bf16.mxu1 %v3858_v47  ;;  %3874 = vmatpush1.bf16.msra.mxu1 %v3793_v4  ;;  %v3797_v8 = vld [vmem:[#allocation3 + $0x20] sm:$0xff]  ;;  %v3800_v10 = vld [vmem:[#allocation3 + $0x38] sm:$0xff]  ;;  %v3799_v11 = vld [vmem:[#allocation3 + $0x30] sm:$0xff] }
0x2ede   :  { %3875 = vmatprep.subr.bf16.mxu1 %v3796_v7  ;;  %v3802_v13 = vld [vmem:[#allocation3 + $0x48] sm:$0xff]  ;;  %v3801_v14 = vld [vmem:[#allocation3 + $0x40] sm:$0xff]  ;;  %v3804_v15 = vld [vmem:[#allocation3 + $0x58] sm:$0xff] }
0x2edf   :  { %v3803_v17 = vld [vmem:[#allocation3 + $0x50] sm:$0xff]  ;;  %v3806_v34 = vld [vmem:[#allocation3 + $0x68] sm:$0xff]  ;;  %v3805_v35 = vld [vmem:[#allocation3 + $0x60] sm:$0xff] }
0x2ee0   :  { %v3808_v37 = vld [vmem:[#allocation3 + $0x78] sm:$0xff]  ;;  %v3807_v38 = vld [vmem:[#allocation3 + $0x70] sm:$0xff]  ;;  %v3810_v50 = vld [vmem:[#allocation3 + $0x88] sm:$0xff] }
0x2ee1   :  { %3876 = vmatpush1.bf16.msra.mxu1 %v3795_v39  ;;  %v3809_v40 = vld [vmem:[#allocation3 + $0x80] sm:$0xff]  ;;  %v3812_v41 = vld [vmem:[#allocation3 + $0x98] sm:$0xff]  ;;  %v3811_v46 = vld [vmem:[#allocation3 + $0x90] sm:$0xff] }
0x2ee2   :  { %3877 = vmatprep.subr.bf16.mxu1 %v3798_v55  ;;  %v3814_v9 = vld [vmem:[#allocation3 + $0xa8] sm:$0xff]  ;;  %v3813_v56 = vld [vmem:[#allocation3 + $0xa0] sm:$0xff]  ;;  %v3816_v57 = vld [vmem:[#allocation3 + $0xb8] sm:$0xff] }
0x2ee3   :  { %v3815_v59 = vld [vmem:[#allocation3 + $0xb0] sm:$0xff]  ;;  %v3818_v63 = vld [vmem:[#allocation3 + $0xc8] sm:$0xff]  ;;  %v3817_v12 = vld [vmem:[#allocation3 + $0xc0] sm:$0xff] }
0x2ee4   :  { %v3820_v60 = vld [vmem:[#allocation3 + $0xd8] sm:$0xff]  ;;  %v3819_v51 = vld [vmem:[#allocation3 + $0xd0] sm:$0xff]  ;;  %v3822_v61 = vld [vmem:[#allocation3 + $0xe8] sm:$0xff] }
0x2ee5   :  { %3878 = vmatpush1.bf16.msra.mxu1 %v3797_v8  ;;  %v3821_v53 = vld [vmem:[#allocation3 + $0xe0] sm:$0xff]  ;;  %v3824_v36 = vld [vmem:[#allocation3 + $0xf8] sm:$0xff]  ;;  %v3823_v16 = vld [vmem:[#allocation3 + $0xf0] sm:$0xff] }
0x2ee6   :  { %3879 = vmatprep.subr.bf16.mxu1 %v3800_v10  ;;  %v3826_v62 = vld [vmem:[#allocation3 + $0x108] sm:$0xff]  ;;  %v3825_v5 = vld [vmem:[#allocation3 + $0x100] sm:$0xff]  ;;  %v3828_v47 = vld [vmem:[#allocation3 + $0x118] sm:$0xff] }
0x2ee7   :  { %v3827_v6 = vld [vmem:[#allocation3 + $0x110] sm:$0xff]  ;;  %v3830_v4 = vld [vmem:[#allocation3 + $0x128] sm:$0xff]  ;;  %v3829_v7 = vld [vmem:[#allocation3 + $0x120] sm:$0xff] }
0x2ee8   :  { %v3832_v58 = vld [vmem:[#allocation3 + $0x138] sm:$0xff]  ;;  %v3831_v0 = vld [vmem:[#allocation3 + $0x130] sm:$0xff]  ;;  %v3834_v39 = vld [vmem:[#allocation3 + $0x148] sm:$0xff] }
0x2ee9   :  { %3880 = vmatpush1.bf16.msra.mxu1 %v3799_v11  ;;  %v3833_v49 = vld [vmem:[#allocation3 + $0x140] sm:$0xff]  ;;  %v3836_v44 = vld [vmem:[#allocation3 + $0x158] sm:$0xff]  ;;  %v3835_v55 = vld [vmem:[#allocation3 + $0x150] sm:$0xff] }
0x2eea   :  { %3881 = vmatprep.subr.bf16.mxu1 %v3802_v13  ;;  %v3838_v8 = vld [vmem:[#allocation3 + $0x168] sm:$0xff]  ;;  %v3837_v10 = vld [vmem:[#allocation3 + $0x160] sm:$0xff]  ;;  %v3840_v11 = vld [vmem:[#allocation3 + $0x178] sm:$0xff] }
0x2eeb   :  { %v3839_v13 = vld [vmem:[#allocation3 + $0x170] sm:$0xff] }
0x2eed   :  { %3882 = vmatpush1.bf16.msra.mxu1 %v3801_v14  ;;  %v3842_v14 = vld [vmem:[#allocation3 + $0x188] sm:$0xff] }
0x2eee   :  { %3883 = vmatprep.subr.bf16.mxu1 %v3804_v15  ;;  %v3841_v15 = vld [vmem:[#allocation3 + $0x180] sm:$0xff] }
0x2ef1   :  { %3884 = vmatpush1.bf16.msra.mxu1 %v3803_v17  ;;  %v3844_v17 = vld [vmem:[#allocation3 + $0x198] sm:$0xff] }
0x2ef2   :  { %3885 = vmatprep.subr.bf16.mxu1 %v3806_v34  ;;  %v3843_v34 = vld [vmem:[#allocation3 + $0x190] sm:$0xff] }
0x2ef5   :  { %3886 = vmatpush1.bf16.msra.mxu1 %v3805_v35  ;;  %v3846_v35 = vld [vmem:[#allocation3 + $0x1a8] sm:$0xff] }
0x2ef6   :  { %3887 = vmatprep.subr.bf16.mxu1 %v3808_v37  ;;  %v3845_v37 = vld [vmem:[#allocation3 + $0x1a0] sm:$0xff] }
0x2ef9   :  { %3888 = vmatpush1.bf16.msra.mxu1 %v3807_v38  ;;  %v3848_v38 = vld [vmem:[#allocation3 + $0x1b8] sm:$0xff] }
0x2efa   :  { %3889 = vmatprep.subr.bf16.mxu1 %v3810_v50  ;;  %v3847_v50 = vld [vmem:[#allocation3 + $0x1b0] sm:$0xff] }
0x2efd   :  { %3890 = vmatpush1.bf16.msra.mxu1 %v3809_v40  ;;  %v3850_v40 = vld [vmem:[#allocation3 + $0x1c8] sm:$0xff] }
0x2efe   :  { %3891 = vmatprep.subr.bf16.mxu1 %v3812_v41  ;;  %v3849_v41 = vld [vmem:[#allocation3 + $0x1c0] sm:$0xff] }
0x2f01   :  { %3892 = vmatpush1.bf16.msra.mxu1 %v3811_v46  ;;  %v3852_v46 = vld [vmem:[#allocation3 + $0x1d8] sm:$0xff] }
0x2f02   :  { %3893 = vmatprep.subr.bf16.mxu1 %v3814_v9  ;;  %v3851_v9 = vld [vmem:[#allocation3 + $0x1d0] sm:$0xff] }
0x2f05   :  { %3894 = vmatpush1.bf16.msra.mxu1 %v3813_v56  ;;  %v3854_v56 = vld [vmem:[#allocation3 + $0x1e8] sm:$0xff] }
0x2f06   :  { %3895 = vmatprep.subr.bf16.mxu1 %v3816_v57  ;;  %v3853_v57 = vld [vmem:[#allocation3 + $0x1e0] sm:$0xff] }
0x2f09   :  { %3896 = vmatpush1.bf16.msra.mxu1 %v3815_v59  ;;  %v3856_v59 = vld [vmem:[#allocation3 + $0x1f8] sm:$0xff] }
0x2f0a   :  { %3897 = vmatprep.subr.bf16.mxu1 %v3818_v63  ;;  %v3855_v63 = vld [vmem:[#allocation3 + $0x1f0] sm:$0xff] }
0x2f0d   :  { %3898 = vmatpush1.bf16.msra.mxu1 %v3817_v12  ;;  %v3859_v12 = vpack.c.bf16 %v3787_v3, %v3787_v3 }
0x2f0e   :  { %3899 = vmatprep.subr.bf16.mxu1 %v3820_v60  ;;  %v3861_v60 = vld [vmem:[%s6597_s8] sm:$0x3] }
0x2f11   :  { %3900 = vmatpush1.bf16.msra.mxu1 %v3819_v51  ;;  %v3866_v51 = vrot.slane %v3861_v60, %v3685_v45 }
0x2f12   :  { %3901 = vmatprep.subr.bf16.mxu1 %v3822_v61  ;;  %v3870_v61 = vrot.slane %v3861_v60, %v3689_v54 }
0x2f15   :  { %3902 = vmatpush1.bf16.msra.mxu1 %v3821_v53 }
0x2f16   :  { %3903 = vmatprep.subr.bf16.mxu1 %v3824_v36 }
0x2f19   :  { %3904 = vmatpush1.bf16.msra.mxu1 %v3823_v16 }
0x2f1a   :  { %3914 = vmatprep.subr.bf16.mxu1 %v3826_v62 }
0x2f1c   :  { %3906 = vmatmul.mubr.bf16.vlgmr.msra.gmra.mrb[24].mxu1 %v3857_v2 }
0x2f1d   :  { %3915 = vmatpush1.bf16.msra.mxu1 %v3825_v5  ;;  %3946 = vmatprep.mubr.bf16.mxu1 %v3860_v52 }
0x2f1e   :  { %3916 = vmatprep.subr.bf16.mxu1 %v3828_v47 }
0x2f21   :  { %3917 = vmatpush1.bf16.msra.mxu1 %v3827_v6 }
0x2f22   :  { %3918 = vmatprep.subr.bf16.mxu1 %v3830_v4 }
0x2f25   :  { %3919 = vmatpush1.bf16.msra.mxu1 %v3829_v7 }
0x2f26   :  { %3920 = vmatprep.subr.bf16.mxu1 %v3832_v58 }
0x2f29   :  { %3921 = vmatpush1.bf16.msra.mxu1 %v3831_v0 }
0x2f2a   :  { %3922 = vmatprep.subr.bf16.mxu1 %v3834_v39 }
0x2f2d   :  { %3923 = vmatpush1.bf16.msra.mxu1 %v3833_v49 }
0x2f2e   :  { %3924 = vmatprep.subr.bf16.mxu1 %v3836_v44 }
0x2f31   :  { %3925 = vmatpush1.bf16.msra.mxu1 %v3835_v55 }
0x2f32   :  { %3926 = vmatprep.subr.bf16.mxu1 %v3838_v8 }
0x2f35   :  { %3927 = vmatpush1.bf16.msra.mxu1 %v3837_v10 }
0x2f36   :  { %3928 = vmatprep.subr.bf16.mxu1 %v3840_v11 }
0x2f39   :  { %3929 = vmatpush1.bf16.msra.mxu1 %v3839_v13 }
0x2f3a   :  { %3930 = vmatprep.subr.bf16.mxu1 %v3842_v14 }
0x2f3d   :  { %3931 = vmatpush1.bf16.msra.mxu1 %v3841_v15 }
0x2f3e   :  { %3932 = vmatprep.subr.bf16.mxu1 %v3844_v17 }
0x2f41   :  { %3933 = vmatpush1.bf16.msra.mxu1 %v3843_v34 }
0x2f42   :  { %3934 = vmatprep.subr.bf16.mxu1 %v3846_v35 }
0x2f45   :  { %3935 = vmatpush1.bf16.msra.mxu1 %v3845_v37 }
0x2f46   :  { %3936 = vmatprep.subr.bf16.mxu1 %v3848_v38 }
0x2f49   :  { %3937 = vmatpush1.bf16.msra.mxu1 %v3847_v50 }
0x2f4a   :  { %3938 = vmatprep.subr.bf16.mxu1 %v3850_v40 }
0x2f4d   :  { %3939 = vmatpush1.bf16.msra.mxu1 %v3849_v41 }
0x2f4e   :  { %3940 = vmatprep.subr.bf16.mxu1 %v3852_v46 }
0x2f51   :  { %3941 = vmatpush1.bf16.msra.mxu1 %v3851_v9 }
0x2f52   :  { %3942 = vmatprep.subr.bf16.mxu1 %v3854_v56 }
0x2f55   :  { %3943 = vmatpush1.bf16.msra.mxu1 %v3853_v57 }
0x2f56   :  { %3944 = vmatprep.subr.bf16.mxu1 %v3856_v59 }
0x2f59   :  { %3945 = vmatpush1.bf16.msra.mxu1 %v3855_v63 }
0x2f5c   :  { %3947 = vmatmul.mubr.bf16.vlgmr.msra.gmra.mrb[24].mxu1 %v3859_v12 }
0x302f   :  { %v3948_v53 = vpop.f32.mrb[24].mxu1 }
0x3030   :  { %v5024_v36 = vadd.f32 %v3948_v53, %v3866_v51  ;;  %v3950_v16 = vpop.f32.mrb[25].mxu1 }
0x3031   :  { %v5025_v62 = vadd.f32 %v3950_v16, %v3870_v61  ;;  %v3952_v2 = vpop.f32.mrb[26].mxu1 }
0x3032   :  { %v3955_v1 = vmax.f32 %v5024_v36, 0.0  ;;  %v3953_v52 = vpop.f32.mrb[27].mxu1 }
0x3033   :  { %v3956_v3 = vmax.f32 %v5025_v62, 0.0 }
0x3035   :  { %v3977_v5 = vpack.c.bf16 %v3956_v3, %v3956_v3 }
0x3036   :  { %5194 = dma.done.wait [#allocation5 + $0x2], 2048 }
0x3037   :  { %5195 = vsyncadd [#allocation5 + $0x2], 4294965248  ;;  %4455 = vmatpush3.bf16.msra.mxu0 %v5925_v18  ;;  %4017 = vmatprep.mubr.bf16.mxu0 %v3977_v5  ;;  %v4026_v18 = vld [vmem:[%s6601_s12] sm:$0xff]  ;;  %v4031_v26 = vld [vmem:[%s6601_s12 + $0x28] sm:$0xff]  ;;  %vm4208_vm6 = vcmask 31744  }
0x3038   :  { %4456 = vmatprep.subr.bf16.mxu0 %v5970_v27  ;;  %v4036_v43 = vld [vmem:[%s6601_s12 + $0x50] sm:$0xff]  ;;  %v4037_v45 = vld [vmem:[%s6601_s12 + $0x58] sm:$0xff]  ;;  %v4038_v47 = vld [vmem:[%s6601_s12 + $0x60] sm:$0xff] }
0x3039   :  { %v4994_v54 = vpack.c.bf16 %v4037_v45, %v4036_v43  ;;  %v4039_v6 = vld [vmem:[%s6601_s12 + $0x68] sm:$0xff]  ;;  %v4040_v7 = vld [vmem:[%s6601_s12 + $0x70] sm:$0xff]  ;;  %v4041_v58 = vld [vmem:[%s6601_s12 + $0x78] sm:$0xff] }
0x303a   :  { %v4997_v4 = vpack.c.bf16 %v4039_v6, %v4038_v47  ;;  %v5000_v0 = vpack.c.bf16 %v4041_v58, %v4040_v7  ;;  %v4318_v49 = vld [vmem:[%s6598_s9] ss:$0 sm:$0xff]  ;;  %v4121_v11 = vld [vmem:[%s6602_s13 + $0x8] sm:$0xff]  ;;  %v4122_v34 = vld [vmem:[%s6602_s13 + $0x10] sm:$0xff] }
0x303b   :  { %4457 = vmatpush3.bf16.msra.mxu0 %v5930_v19  ;;  %v4027_v19 = vld [vmem:[%s6601_s12 + $0x8] sm:$0xff]  ;;  %v4120_v10 = vld [vmem:[%s6602_s13] sm:$0xff]  ;;  %v4123_v35 = vld [vmem:[%s6602_s13 + $0x18] sm:$0xff] }
0x303c   :  { %4458 = vmatprep.subr.bf16.mxu0 %v5975_v28  ;;  %v4032_v28 = vld [vmem:[%s6601_s12 + $0x30] sm:$0xff]  ;;  %v5003_v15 = vpack.c.bf16 %v4121_v11, %v4120_v10  ;;  %v5006_v37 = vpack.c.bf16 %v4123_v35, %v4122_v34  ;;  %v4124_v38 = vld [vmem:[%s6602_s13 + $0x20] sm:$0xff]  ;;  %v4125_v50 = vld [vmem:[%s6602_s13 + $0x28] sm:$0xff] }
0x303d   :  { %v5009_v40 = vpack.c.bf16 %v4125_v50, %v4124_v38  ;;  %v4127_v41 = vld [vmem:[%s6602_s13 + $0x38] sm:$0xff]  ;;  %v4319_v9 = vld [vmem:[%s6599_s10] ss:$0 sm:$0xff] }
0x303f   :  { %4459 = vmatpush3.bf16.msra.mxu0 %v5935_v20  ;;  %v3976_v20 = vpack.c.bf16 %v3955_v1, %v3955_v1 }
0x3040   :  { %4460 = vmatprep.subr.bf16.mxu0 %v5980_v29  ;;  %v4033_v29 = vld [vmem:[%s6601_s12 + $0x38] sm:$0xff] }
0x3043   :  { %4461 = vmatpush3.bf16.msra.mxu0 %v5940_v21  ;;  %v4979_v21 = vpack.c.bf16 %v4027_v19, %v4026_v18 }
0x3044   :  { %4462 = vmatprep.subr.bf16.mxu0 %v5985_v30  ;;  %v4988_v30 = vpack.c.bf16 %v4033_v29, %v4032_v28 }
0x3047   :  { %4463 = vmatpush3.bf16.msra.mxu0 %v5945_v22  ;;  %v4028_v22 = vld [vmem:[%s6601_s12 + $0x10] sm:$0xff] }
0x3048   :  { %4464 = vmatprep.subr.bf16.mxu0 %v5990_v31  ;;  %v4034_v31 = vld [vmem:[%s6601_s12 + $0x40] sm:$0xff] }
0x304b   :  { %4465 = vmatpush3.bf16.msra.mxu0 %v5950_v23  ;;  %v4029_v23 = vld [vmem:[%s6601_s12 + $0x18] sm:$0xff] }
0x304c   :  { %4466 = vmatprep.subr.bf16.mxu0 %v5995_v32  ;;  %v4035_v32 = vld [vmem:[%s6601_s12 + $0x48] sm:$0xff] }
0x304f   :  { %4467 = vmatpush3.bf16.msra.mxu0 %v5955_v24  ;;  %v4982_v24 = vpack.c.bf16 %v4029_v23, %v4028_v22 }
0x3050   :  { %4468 = vmatprep.subr.bf16.mxu0 %v6000_v33  ;;  %v4991_v33 = vpack.c.bf16 %v4035_v32, %v4034_v31 }
0x3053   :  { %4469 = vmatpush3.bf16.msra.mxu0 %v5960_v25  ;;  %v4030_v25 = vld [vmem:[%s6601_s12 + $0x20] sm:$0xff] }
0x3054   :  { %4978 = vmatprep.subr.bf16.mxu0 %v5196_v42  ;;  %v4985_v27 = vpack.c.bf16 %v4031_v26, %v4030_v25 }
0x3056   :  { %4018 = vmatmul.mubr.bf16.vlgmr.msra.gmra.mrb[28].mxu0 %v3976_v20 }
0x3057   :  { %4980 = vmatpush3.bf16.msra.mxu0 %v4979_v21  ;;  %4812 = vmatprep.mubr.msk.f32.mxu0 %vm5197_vm1, %v5198_v48 }
0x3058   :  { %4981 = vmatprep.subr.bf16.mxu0 %v5196_v42 }
0x305b   :  { %4983 = vmatpush3.bf16.msra.mxu0 %v4982_v24 }
0x305c   :  { %4984 = vmatprep.subr.bf16.mxu0 %v5196_v42 }
0x305f   :  { %4986 = vmatpush3.bf16.msra.mxu0 %v4985_v27 }
0x3060   :  { %4987 = vmatprep.subr.bf16.mxu0 %v5196_v42 }
0x3063   :  { %4989 = vmatpush3.bf16.msra.mxu0 %v4988_v30 }
0x3064   :  { %4990 = vmatprep.subr.bf16.mxu0 %v5196_v42 }
0x3067   :  { %4992 = vmatpush3.bf16.msra.mxu0 %v4991_v33 }
0x3068   :  { %4993 = vmatprep.subr.bf16.mxu0 %v5196_v42 }
0x306b   :  { %4995 = vmatpush3.bf16.msra.mxu0 %v4994_v54 }
0x306c   :  { %4996 = vmatprep.subr.bf16.mxu0 %v5196_v42 }
0x306f   :  { %4998 = vmatpush3.bf16.msra.mxu0 %v4997_v4 }
0x3070   :  { %4999 = vmatprep.subr.bf16.mxu0 %v5196_v42 }
0x3073   :  { %5001 = vmatpush3.bf16.msra.mxu0 %v5000_v0 }
0x3074   :  { %5002 = vmatprep.subr.bf16.mxu0 %v5196_v42 }
0x3129   :  { %v4470_v39 = vpop.f32.mrb[28].mxu0 }
0x312a   :  { %v4471_v44 = vpop.f32.mrb[29].mxu0 }
0x312b   :  { %v4472_v55 = vadd.f32 %v4471_v44, %v4470_v39  ;;  %v4473_v8 = vpop.f32.mrb[30].mxu0 }
0x312c   :  { %v4474_v13 = vpop.f32.mrb[31].mxu0 }
0x312d   :  { %v4020_v14 = vadd.f32 %v4472_v55, %v4318_v49 }
0x312f   :  { %v4025_v17 = vmax.f32 %v4020_v14, 0.0 }
0x3131   :  { %4813 = vmatmul.mubr.f32.vlgmr.msra.gmra.mrb[18].mxu0 %v4025_v17 }
0x3132   :  { %5004 = vmatpush3.bf16.msra.mxu0 %v5003_v15  ;;  %4831 = vmatprep.mubr.msk.f32.mxu0 %vm5197_vm1, %v5198_v48  ;;  %v4126_v48 = vld [vmem:[%s6602_s13 + $0x30] sm:$0xff] }
0x3133   :  { %5005 = vmatprep.subr.bf16.mxu0 %v5196_v42  ;;  %v5012_v46 = vpack.c.bf16 %v4127_v41, %v4126_v48 }
0x3136   :  { %5007 = vmatpush3.bf16.msra.mxu0 %v5006_v37 }
0x3137   :  { %5008 = vmatprep.subr.bf16.mxu0 %v5196_v42 }
0x313a   :  { %5010 = vmatpush3.bf16.msra.mxu0 %v5009_v40 }
0x313b   :  { %5011 = vmatprep.subr.bf16.mxu0 %v5196_v42  ;;  %v4320_v42 = vld [vmem:[%s6600_s11] ss:$0 sm:$0xff] }
0x313e   :  { %5013 = vmatpush3.bf16.msra.mxu0 %v5012_v46 }
0x3204   :  { %v4115_v56 = vpop.f32.mrb[18].mxu0 }
0x3205   :  { %v4116_v57 = vadd.f32 %v4319_v9, %v4115_v56  ;;  %v4814_v59 = vpop.f32.mrb[19].mxu0 }
0x3207   :  { %v4119_v63 = vmax.f32 %v4116_v57, 0.0 }
0x3209   :  { %4832 = vmatmul.mubr.msk.f32.vlgmr.msra.gmra.mrb[32].mxu0 %vm3604_vm4, %v4119_v63 }
0x32dc   :  { %v4204_v12 = vpop.f32.mrb[32].mxu0 }
0x32dd   :  { %v4205_v60 = vadd.f32 %v4320_v42, %v4204_v12  ;;  %v4833_v51 = vpop.f32.mrb[33].mxu0 }
0x32df   :  { %4209 = vst.msk [vmem:[%s6606_s17] sm:$0xff] %vm4208_vm6, %v4205_v60 }
0x32e0   :  { %4214 = vsyncmov [#allocation5] }
0x32e3   :  { %s4215_s10 = vpop.sfrf %4214 }
0x32e4   :  { %p4322_p0 = scmp.ne.s32.totalorder %s4215_s10, 0 }
0x32e6   :  { %4219 = shalt.err (%p4322_p0)  }
0x32e7   :  { %4221 = vsyncmov [#allocation5 + $0x1] }
0x32ea   :  { %s4222_s21 = vpop.sfrf %4221 }
0x32eb   :  { %p4323_p1 = scmp.ne.s32.totalorder %s4222_s21, 0 }
0x32ed   :  { %4226 = shalt.err (%p4323_p1)  }
0x32ee   :  { %4228 = vsyncmov [#allocation5 + $0x2] }
0x32f1   :  { %s4229_s22 = vpop.sfrf %4228 }
0x32f2   :  { %p4324_p2 = scmp.ne.s32.totalorder %s4229_s22, 0 }
0x32f4   :  { %4233 = shalt.err (%p4324_p2)  }

</bundles_post_ra>
